<compile_context>
chip_gen: v7x
topology: tpu7x:2x2x1
jax: 0.10.0
libtpu: 0.0.40
codegen_flags: <defaults>
</compile_context>

<pallas_src>
import jax
import jax.numpy as jnp
from jax.experimental import pallas as pl
from jax.experimental.pallas import tpu as pltpu


# ---------------------------------------------------------------------------
# Static sizes / tiling
# ---------------------------------------------------------------------------
K_IN = 12 * 10000                       # fc1 in_features = 120000
TK = 8192                               # fc1 K tile (multiple of 128)
TN = 256                                # fc1 N tile (2 blocks of N=512)
K_PAD = ((K_IN + TK - 1) // TK) * TK    # 122880 (padded once at init time)


# ---------------------------------------------------------------------------
# Kernel 1: fc1 + folded bn1 + relu
#   y = relu((x @ W1) * scale + shift), x/W1 in bf16, f32 accumulation.
#   Grid = (N/TN "parallel", K/TK "arbitrary"); the (B, TN) output block stays
#   resident across K and doubles as the accumulator.
# ---------------------------------------------------------------------------
def _fc1_kernel(x_ref, w_ref, scale_ref, shift_ref, o_ref):
    k = pl.program_id(1)

    @pl.when(k == 0)
    def _():
        o_ref[...] = jnp.zeros_like(o_ref)

    o_ref[...] += jnp.dot(x_ref[...], w_ref[...],
                          preferred_element_type=jnp.float32)

    @pl.when(k == pl.num_programs(1) - 1)
    def _():
        o_ref[...] = jnp.maximum(
            o_ref[...] * scale_ref[...] + shift_ref[...], 0.0)


def fc1_forward(x, w, scale, shift, *, tn=TN, tk=TK):
    """x: (B, K_PAD) bf16, w: (K_PAD, N) bf16, scale/shift: (1, N) f32."""
    B, Kp = x.shape
    Kw, N = w.shape
    assert Kp == Kw and Kp % tk == 0 and N % tn == 0

    return pl.pallas_call(
        _fc1_kernel,
        out_shape=jax.ShapeDtypeStruct((B, N), jnp.float32),
        grid_spec=pltpu.PrefetchScalarGridSpec(
            num_scalar_prefetch=0,
            grid=(N // tn, Kp // tk),
            in_specs=[
                pl.BlockSpec((B, tk), lambda n, k: (0, k)),    # x tile
                pl.BlockSpec((tk, tn), lambda n, k: (k, n)),   # w tile
                pl.BlockSpec((1, tn), lambda n, k: (0, n)),    # scale
                pl.BlockSpec((1, tn), lambda n, k: (0, n)),    # shift
            ],
            out_specs=pl.BlockSpec((B, tn), lambda n, k: (0, n)),
        ),
        compiler_params=pltpu.CompilerParams(
            dimension_semantics=("parallel", "arbitrary"),
            vmem_limit_bytes=32 * 1024 * 1024,
        ),
    )(x, w, scale, shift)


# ---------------------------------------------------------------------------
# Kernel 2: fused head = fc2+bn2+relu -> fc3+bn3+relu -> fc4
#   All weights are tiny (<1 MiB) and live fully in VMEM; single launch.
# ---------------------------------------------------------------------------
def _head_kernel(h_ref, w2_ref, s2_ref, t2_ref, w3_ref, s3_ref, t3_ref,
                 w4_ref, b4_ref, feat_ref, out_ref):
    h1 = h_ref[...]
    h2 = jnp.maximum(
        jnp.dot(h1, w2_ref[...], preferred_element_type=jnp.float32)
        * s2_ref[...] + t2_ref[...], 0.0)
    h3 = jnp.maximum(
        jnp.dot(h2, w3_ref[...], preferred_element_type=jnp.float32)
        * s3_ref[...] + t3_ref[...], 0.0)
    feat_ref[...] = h3.astype(feat_ref.dtype)
    out_ref[...] = (
        jnp.dot(h3, w4_ref[...], preferred_element_type=jnp.float32)
        + b4_ref[...]).astype(out_ref.dtype)


def head_forward(h, w2, s2, t2, w3, s3, t3, w4, b4):
    """h: (B, 512) f32 -> (feature (B, 128) f32, output (B, 6) f32)."""
    B = h.shape[0]
    full = lambda a: pl.BlockSpec(a.shape, lambda i: (0, 0))
    return pl.pallas_call(
        _head_kernel,
        out_shape=(jax.ShapeDtypeStruct((B, 128), jnp.float32),
                   jax.ShapeDtypeStruct((B, 6), jnp.float32)),
        grid_spec=pltpu.PrefetchScalarGridSpec(
            num_scalar_prefetch=0,
            grid=(1,),
            in_specs=[full(h), full(w2), full(s2), full(t2),
                      full(w3), full(s3), full(t3), full(w4), full(b4)],
            out_specs=[pl.BlockSpec((B, 128), lambda i: (0, 0)),
                       pl.BlockSpec((B, 6), lambda i: (0, 0))],
        ),
        compiler_params=pltpu.CompilerParams(
            dimension_semantics=("arbitrary",)),
    )(h, w2, s2, t2, w3, s3, t3, w4, b4)


# ---------------------------------------------------------------------------
# Parameter construction (deterministic) and BN folding
# ---------------------------------------------------------------------------
def _init_linear(key, fan_in, fan_out):
    kw, kb = jax.random.split(key)
    bound = 1.0 / jnp.sqrt(float(fan_in))
    # stored as (in, out) = W^T relative to PyTorch's (out, in)
    w = jax.random.uniform(kw, (fan_in, fan_out), jnp.float32, -bound, bound)
    b = jax.random.uniform(kb, (fan_out,), jnp.float32, -bound, bound)
    return w, b


def _init_bn(key, n):
    kg, kb, km, kv = jax.random.split(key, 4)
    gamma = 1.0 + 0.1 * jax.random.normal(kg, (n,), jnp.float32)
    beta = 0.1 * jax.random.normal(kb, (n,), jnp.float32)
    running_mean = 0.1 * jax.random.normal(km, (n,), jnp.float32)
    running_var = jnp.abs(1.0 + 0.1 * jax.random.normal(kv, (n,), jnp.float32))
    return gamma, beta, running_mean, running_var


def _fold_bn(bias, gamma, beta, mean, var, eps=1e-5):
    # y = ((xW + b) - mean) * gamma / sqrt(var+eps) + beta
    scale = gamma / jnp.sqrt(var + eps)
    shift = (bias - mean) * scale + beta
    return scale, shift


def make_params(key):
    keys = jax.random.split(key, 8)
    p = {}

    # fc1 + bn1 (folded).  Pre-pad K to a multiple of TK and cast to bf16
    # ONCE, outside the forward path (fc1 is pure weight streaming).
    w1, b1 = _init_linear(keys[0], K_IN, 512)
    g, be, m, v = _init_bn(keys[1], 512)
    s1, t1 = _fold_bn(b1, g, be, m, v)
    p["w1"] = jnp.pad(w1, ((0, K_PAD - K_IN), (0, 0))).astype(jnp.bfloat16)
    p["scale1"], p["shift1"] = s1.reshape(1, -1), t1.reshape(1, -1)

    # fc2 + bn2 (folded)
    w2, b2 = _init_linear(keys[2], 512, 256)
    g, be, m, v = _init_bn(keys[3], 256)
    s2, t2 = _fold_bn(b2, g, be, m, v)
    p["w2"], p["scale2"], p["shift2"] = w2, s2.reshape(1, -1), t2.reshape(1, -1)

    # fc3 + bn3 (folded)
    w3, b3 = _init_linear(keys[4], 256, 128)
    g, be, m, v = _init_bn(keys[5], 128)
    s3, t3 = _fold_bn(b3, g, be, m, v)
    p["w3"], p["scale3"], p["shift3"] = w3, s3.reshape(1, -1), t3.reshape(1, -1)

    # fc4 (no BN)
    w4, b4 = _init_linear(keys[6], 128, 6)
    p["w4"], p["b4"] = w4, b4.reshape(1, -1)
    return p


# ---------------------------------------------------------------------------
# Forward pass (and a pure-JAX reference for validation)
# ---------------------------------------------------------------------------
def mlp_forward(params, x):
    """x: (B, 12, 10000) f32 -> (feature (B, 128) f32, output (B, 6) f32)."""
    B = x.shape[0]
    h = x.reshape(B, -1).astype(jnp.bfloat16)      # (B, 120000) bf16
    h = jnp.pad(h, ((0, 0), (0, K_PAD - K_IN)))    # x is tiny vs. w1; w1 is pre-padded
    h = fc1_forward(h, params["w1"], params["scale1"], params["shift1"])
    feature, output = head_forward(
        h, params["w2"], params["scale2"], params["shift2"],
        params["w3"], params["scale3"], params["shift3"],
        params["w4"], params["b4"])
    return feature, output


def mlp_reference(params, x):
    B = x.shape[0]
    h = x.reshape(B, -1).astype(jnp.bfloat16).astype(jnp.float32)
    w1 = params["w1"][:K_IN].astype(jnp.float32)
    h = jnp.maximum(h @ w1 * params["scale1"] + params["shift1"], 0.0)
    h = jnp.maximum(h @ params["w2"] * params["scale2"] + params["shift2"], 0.0)
    h = jnp.maximum(h @ params["w3"] * params["scale3"] + params["shift3"], 0.0)
    return h, h @ params["w4"] + params["b4"]


if __name__ == "__main__":
    key = jax.random.PRNGKey(0)
    k_params, k_x = jax.random.split(key)

    params = make_params(k_params)

    # Small batch; feature count fixed by fc1's in_features = 12 * 10000.
    B = 2
    x = jax.random.normal(k_x, (B, 12, 10000), jnp.float32)

    feature, output = jax.jit(mlp_forward)(params, x)
    jax.block_until_ready((feature, output))

    assert feature.shape == (B, 128) and output.shape == (B, 6)
    assert feature.dtype == jnp.float32 and output.dtype == jnp.float32

    # Validate against a pure-JAX reference (loose tolerance: w1/x are bf16).
    feat_ref, out_ref = jax.jit(mlp_reference)(params, x)
    assert bool(jnp.allclose(feature, feat_ref, rtol=2e-2, atol=2e-2))
    assert bool(jnp.allclose(output, out_ref, rtol=2e-2, atol=2e-2))

    print("KERNEL_OK")
</pallas_src>

<mosaic_0001>
module attributes {stable_mosaic.version = 11 : i64} {
  func.func @_fc1_kernel(%arg0: i32, %arg1: i32, %arg2: memref<2x8192xbf16, #tpu.memory_space<vmem>>, %arg3: memref<8192x256xbf16, #tpu.memory_space<vmem>>, %arg4: memref<1x256xf32, #tpu.memory_space<vmem>>, %arg5: memref<1x256xf32, #tpu.memory_space<vmem>>, %arg6: memref<2x256xf32, #tpu.memory_space<vmem>>) attributes {dimension_semantics = [#tpu.dimension_semantics<parallel>, #tpu.dimension_semantics<arbitrary>], iteration_bounds = array<i64: 2, 15>, scalar_prefetch = 0 : i64, scratch_operands = 0 : i64, tpu.core_type = #tpu.core_type<tc>, window_params = [{transform_indices = @transform_0, window_bounds = array<i64: 2, 8192>}, {transform_indices = @transform_1, window_bounds = array<i64: 8192, 256>}, {transform_indices = @transform_2, window_bounds = array<i64: 1, 256>}, {transform_indices = @transform_3, window_bounds = array<i64: 1, 256>}, {transform_indices = @transform_4, window_bounds = array<i64: 2, 256>}]} {
    %c0_i32 = arith.constant 0 : i32
    %0 = arith.cmpi eq, %arg1, %c0_i32 : i32
    %1 = arith.extui %0 : i1 to i32
    %c0_i32_0 = arith.constant 0 : i32
    %2 = arith.cmpi ne, %1, %c0_i32_0 : i32
    scf.if %2 {
      %cst_9 = arith.constant 0.000000e+00 : f32
      %12 = vector.broadcast %cst_9 : f32 to vector<2x256xf32>
      %c0_10 = arith.constant 0 : index
      %c0_11 = arith.constant 0 : index
      %13 = vector.load %arg6[%c0_10, %c0_11] : memref<2x256xf32, #tpu.memory_space<vmem>>, vector<2x256xf32>
      tpu.vector_store %arg6[%c0_10, %c0_11], %12 {strides = array<i32>} : memref<2x256xf32, #tpu.memory_space<vmem>>, vector<2x256xf32>,
    } else {
    }
    %c0 = arith.constant 0 : index
    %c0_1 = arith.constant 0 : index
    %3 = vector.load %arg6[%c0, %c0_1] : memref<2x256xf32, #tpu.memory_space<vmem>>, vector<2x256xf32>
    %c0_2 = arith.constant 0 : index
    %c0_3 = arith.constant 0 : index
    %4 = vector.load %arg2[%c0_2, %c0_3] : memref<2x8192xbf16, #tpu.memory_space<vmem>>, vector<2x8192xbf16>
    %c0_4 = arith.constant 0 : index
    %c0_5 = arith.constant 0 : index
    %5 = vector.load %arg3[%c0_4, %c0_5] : memref<8192x256xbf16, #tpu.memory_space<vmem>>, vector<8192x256xbf16>
    %cst = arith.constant dense<0.000000e+00> : vector<2x256xf32>
    %6 = tpu.matmul %4, %5, %cst {dimension_numbers = #tpu.dot_dimension_numbers<[1], [0], [0], [1], [0, 0, 1, 1], [], []>} : vector<2x8192xbf16>, vector<8192x256xbf16>, vector<2x256xf32> -> vector<2x256xf32>
    %7 = arith.addf %3, %6 : vector<2x256xf32>
    %c0_6 = arith.constant 0 : index
    %c0_7 = arith.constant 0 : index
    %8 = vector.load %arg6[%c0_6, %c0_7] : memref<2x256xf32, #tpu.memory_space<vmem>>, vector<2x256xf32>
    tpu.vector_store %arg6[%c0_6, %c0_7], %7 {strides = array<i32>} : memref<2x256xf32, #tpu.memory_space<vmem>>, vector<2x256xf32>,
    %c14_i32 = arith.constant 14 : i32
    %9 = arith.cmpi eq, %arg1, %c14_i32 : i32
    %10 = arith.extui %9 : i1 to i32
    %c0_i32_8 = arith.constant 0 : i32
    %11 = arith.cmpi ne, %10, %c0_i32_8 : i32
    scf.if %11 {
      %c0_9 = arith.constant 0 : index
      %c0_10 = arith.constant 0 : index
      %12 = vector.load %arg6[%c0_9, %c0_10] : memref<2x256xf32, #tpu.memory_space<vmem>>, vector<2x256xf32>
      %c0_11 = arith.constant 0 : index
      %c0_12 = arith.constant 0 : index
      %13 = vector.load %arg4[%c0_11, %c0_12] : memref<1x256xf32, #tpu.memory_space<vmem>>, vector<1x256xf32>
      %14 = vector.broadcast %13 : vector<1x256xf32> to vector<2x256xf32>
      %15 = arith.mulf %12, %14 : vector<2x256xf32>
      %c0_13 = arith.constant 0 : index
      %c0_14 = arith.constant 0 : index
      %16 = vector.load %arg5[%c0_13, %c0_14] : memref<1x256xf32, #tpu.memory_space<vmem>>, vector<1x256xf32>
      %17 = vector.broadcast %16 : vector<1x256xf32> to vector<2x256xf32>
      %18 = arith.addf %15, %17 : vector<2x256xf32>
      %cst_15 = arith.constant 0.000000e+00 : f32
      %19 = vector.broadcast %cst_15 : f32 to vector<2x256xf32>
      %20 = arith.maximumf %18, %19 : vector<2x256xf32>
      %c0_16 = arith.constant 0 : index
      %c0_17 = arith.constant 0 : index
      %21 = vector.load %arg6[%c0_16, %c0_17] : memref<2x256xf32, #tpu.memory_space<vmem>>, vector<2x256xf32>
      tpu.vector_store %arg6[%c0_16, %c0_17], %20 {strides = array<i32>} : memref<2x256xf32, #tpu.memory_space<vmem>>, vector<2x256xf32>,
    } else {
    }
    return
  }
  func.func @transform_0(%arg0: i32, %arg1: i32) -> (i32, i32) {
    %c0_i32 = arith.constant 0 : i32
    %c0_i32_0 = arith.constant 0 : i32
    return %c0_i32, %arg1 : i32, i32
  }
  func.func @transform_1(%arg0: i32, %arg1: i32) -> (i32, i32) {
    %c0_i32 = arith.constant 0 : i32
    return %arg1, %arg0 : i32, i32
  }
  func.func @transform_2(%arg0: i32, %arg1: i32) -> (i32, i32) {
    %c0_i32 = arith.constant 0 : i32
    %c0_i32_0 = arith.constant 0 : i32
    return %c0_i32, %arg0 : i32, i32
  }
  func.func @transform_3(%arg0: i32, %arg1: i32) -> (i32, i32) {
    %c0_i32 = arith.constant 0 : i32
    %c0_i32_0 = arith.constant 0 : i32
    return %c0_i32, %arg0 : i32, i32
  }
  func.func @transform_4(%arg0: i32, %arg1: i32) -> (i32, i32) {
    %c0_i32 = arith.constant 0 : i32
    %c0_i32_0 = arith.constant 0 : i32
    return %c0_i32, %arg0 : i32, i32
  }
}

module attributes {stable_mosaic.version = 11 : i64} {
  func.func @_head_kernel(%arg0: i32, %arg1: memref<2x512xf32, #tpu.memory_space<vmem>>, %arg2: memref<512x256xf32, #tpu.memory_space<vmem>>, %arg3: memref<1x256xf32, #tpu.memory_space<vmem>>, %arg4: memref<1x256xf32, #tpu.memory_space<vmem>>, %arg5: memref<256x128xf32, #tpu.memory_space<vmem>>, %arg6: memref<1x128xf32, #tpu.memory_space<vmem>>, %arg7: memref<1x128xf32, #tpu.memory_space<vmem>>, %arg8: memref<128x6xf32, #tpu.memory_space<vmem>>, %arg9: memref<1x6xf32, #tpu.memory_space<vmem>>, %arg10: memref<2x128xf32, #tpu.memory_space<vmem>>, %arg11: memref<2x6xf32, #tpu.memory_space<vmem>>) attributes {dimension_semantics = [#tpu.dimension_semantics<arbitrary>], iteration_bounds = array<i64: 1>, scalar_prefetch = 0 : i64, scratch_operands = 0 : i64, tpu.core_type = #tpu.core_type<tc>, window_params = [{pipeline_mode = #tpu.pipeline_mode<synchronous>, transform_indices = @transform_0, window_bounds = array<i64: 2, 512>}, {pipeline_mode = #tpu.pipeline_mode<synchronous>, transform_indices = @transform_1, window_bounds = array<i64: 512, 256>}, {pipeline_mode = #tpu.pipeline_mode<synchronous>, transform_indices = @transform_2, window_bounds = array<i64: 1, 256>}, {pipeline_mode = #tpu.pipeline_mode<synchronous>, transform_indices = @transform_3, window_bounds = array<i64: 1, 256>}, {pipeline_mode = #tpu.pipeline_mode<synchronous>, transform_indices = @transform_4, window_bounds = array<i64: 256, 128>}, {pipeline_mode = #tpu.pipeline_mode<synchronous>, transform_indices = @transform_5, window_bounds = array<i64: 1, 128>}, {pipeline_mode = #tpu.pipeline_mode<synchronous>, transform_indices = @transform_6, window_bounds = array<i64: 1, 128>}, {pipeline_mode = #tpu.pipeline_mode<synchronous>, transform_indices = @transform_7, window_bounds = array<i64: 128, 6>}, {pipeline_mode = #tpu.pipeline_mode<synchronous>, transform_indices = @transform_8, window_bounds = array<i64: 1, 6>}, {pipeline_mode = #tpu.pipeline_mode<synchronous>, transform_indices = @transform_9, window_bounds = array<i64: 2, 128>}, {pipeline_mode = #tpu.pipeline_mode<synchronous>, transform_indices = @transform_10, window_bounds = array<i64: 2, 6>}]} {
    %c0 = arith.constant 0 : index
    %c0_0 = arith.constant 0 : index
    %0 = vector.load %arg1[%c0, %c0_0] : memref<2x512xf32, #tpu.memory_space<vmem>>, vector<2x512xf32>
    %c0_1 = arith.constant 0 : index
    %c0_2 = arith.constant 0 : index
    %1 = vector.load %arg2[%c0_1, %c0_2] : memref<512x256xf32, #tpu.memory_space<vmem>>, vector<512x256xf32>
    %cst = arith.constant dense<0.000000e+00> : vector<2x256xf32>
    %2 = tpu.matmul %0, %1, %cst {dimension_numbers = #tpu.dot_dimension_numbers<[1], [0], [0], [1], [0, 0, 1, 1], [], []>} : vector<2x512xf32>, vector<512x256xf32>, vector<2x256xf32> -> vector<2x256xf32>
    %c0_3 = arith.constant 0 : index
    %c0_4 = arith.constant 0 : index
    %3 = vector.load %arg3[%c0_3, %c0_4] : memref<1x256xf32, #tpu.memory_space<vmem>>, vector<1x256xf32>
    %4 = vector.broadcast %3 : vector<1x256xf32> to vector<2x256xf32>
    %5 = arith.mulf %2, %4 : vector<2x256xf32>
    %c0_5 = arith.constant 0 : index
    %c0_6 = arith.constant 0 : index
    %6 = vector.load %arg4[%c0_5, %c0_6] : memref<1x256xf32, #tpu.memory_space<vmem>>, vector<1x256xf32>
    %7 = vector.broadcast %6 : vector<1x256xf32> to vector<2x256xf32>
    %8 = arith.addf %5, %7 : vector<2x256xf32>
    %cst_7 = arith.constant 0.000000e+00 : f32
    %9 = vector.broadcast %cst_7 : f32 to vector<2x256xf32>
    %10 = arith.maximumf %8, %9 : vector<2x256xf32>
    %c0_8 = arith.constant 0 : index
    %c0_9 = arith.constant 0 : index
    %11 = vector.load %arg5[%c0_8, %c0_9] : memref<256x128xf32, #tpu.memory_space<vmem>>, vector<256x128xf32>
    %cst_10 = arith.constant dense<0.000000e+00> : vector<2x128xf32>
    %12 = tpu.matmul %10, %11, %cst_10 {dimension_numbers = #tpu.dot_dimension_numbers<[1], [0], [0], [1], [0, 0, 1, 1], [], []>} : vector<2x256xf32>, vector<256x128xf32>, vector<2x128xf32> -> vector<2x128xf32>
    %c0_11 = arith.constant 0 : index
    %c0_12 = arith.constant 0 : index
    %13 = vector.load %arg6[%c0_11, %c0_12] : memref<1x128xf32, #tpu.memory_space<vmem>>, vector<1x128xf32>
    %14 = vector.broadcast %13 : vector<1x128xf32> to vector<2x128xf32>
    %15 = arith.mulf %12, %14 : vector<2x128xf32>
    %c0_13 = arith.constant 0 : index
    %c0_14 = arith.constant 0 : index
    %16 = vector.load %arg7[%c0_13, %c0_14] : memref<1x128xf32, #tpu.memory_space<vmem>>, vector<1x128xf32>
    %17 = vector.broadcast %16 : vector<1x128xf32> to vector<2x128xf32>
    %18 = arith.addf %15, %17 : vector<2x128xf32>
    %cst_15 = arith.constant 0.000000e+00 : f32
    %19 = vector.broadcast %cst_15 : f32 to vector<2x128xf32>
    %20 = arith.maximumf %18, %19 : vector<2x128xf32>
    %c0_16 = arith.constant 0 : index
    %c0_17 = arith.constant 0 : index
    %21 = vector.load %arg10[%c0_16, %c0_17] : memref<2x128xf32, #tpu.memory_space<vmem>>, vector<2x128xf32>
    tpu.vector_store %arg10[%c0_16, %c0_17], %20 {strides = array<i32>} : memref<2x128xf32, #tpu.memory_space<vmem>>, vector<2x128xf32>,
    %c0_18 = arith.constant 0 : index
    %c0_19 = arith.constant 0 : index
    %22 = vector.load %arg8[%c0_18, %c0_19] : memref<128x6xf32, #tpu.memory_space<vmem>>, vector<128x6xf32>
    %cst_20 = arith.constant dense<0.000000e+00> : vector<2x6xf32>
    %23 = tpu.matmul %20, %22, %cst_20 {dimension_numbers = #tpu.dot_dimension_numbers<[1], [0], [0], [1], [0, 0, 1, 1], [], []>} : vector<2x128xf32>, vector<128x6xf32>, vector<2x6xf32> -> vector<2x6xf32>
    %c0_21 = arith.constant 0 : index
    %c0_22 = arith.constant 0 : index
    %24 = vector.load %arg9[%c0_21, %c0_22] : memref<1x6xf32, #tpu.memory_space<vmem>>, vector<1x6xf32>
    %25 = vector.broadcast %24 : vector<1x6xf32> to vector<2x6xf32>
    %26 = arith.addf %23, %25 : vector<2x6xf32>
    %c0_23 = arith.constant 0 : index
    %c0_24 = arith.constant 0 : index
    %27 = vector.load %arg11[%c0_23, %c0_24] : memref<2x6xf32, #tpu.memory_space<vmem>>, vector<2x6xf32>
    tpu.vector_store %arg11[%c0_23, %c0_24], %26 {strides = array<i32>} : memref<2x6xf32, #tpu.memory_space<vmem>>, vector<2x6xf32>,
    return
  }
  func.func @transform_0(%arg0: i32) -> (i32, i32) {
    %c0_i32 = arith.constant 0 : i32
    %c0_i32_0 = arith.constant 0 : i32
    %c0_i32_1 = arith.constant 0 : i32
    return %c0_i32, %c0_i32_0 : i32, i32
  }
  func.func @transform_1(%arg0: i32) -> (i32, i32) {
    %c0_i32 = arith.constant 0 : i32
    %c0_i32_0 = arith.constant 0 : i32
    %c0_i32_1 = arith.constant 0 : i32
    return %c0_i32, %c0_i32_0 : i32, i32
  }
  func.func @transform_2(%arg0: i32) -> (i32, i32) {
    %c0_i32 = arith.constant 0 : i32
    %c0_i32_0 = arith.constant 0 : i32
    %c0_i32_1 = arith.constant 0 : i32
    return %c0_i32, %c0_i32_0 : i32, i32
  }
  func.func @transform_3(%arg0: i32) -> (i32, i32) {
    %c0_i32 = arith.constant 0 : i32
    %c0_i32_0 = arith.constant 0 : i32
    %c0_i32_1 = arith.constant 0 : i32
    return %c0_i32, %c0_i32_0 : i32, i32
  }
  func.func @transform_4(%arg0: i32) -> (i32, i32) {
    %c0_i32 = arith.constant 0 : i32
    %c0_i32_0 = arith.constant 0 : i32
    %c0_i32_1 = arith.constant 0 : i32
    return %c0_i32, %c0_i32_0 : i32, i32
  }
  func.func @transform_5(%arg0: i32) -> (i32, i32) {
    %c0_i32 = arith.constant 0 : i32
    %c0_i32_0 = arith.constant 0 : i32
    %c0_i32_1 = arith.constant 0 : i32
    return %c0_i32, %c0_i32_0 : i32, i32
  }
  func.func @transform_6(%arg0: i32) -> (i32, i32) {
    %c0_i32 = arith.constant 0 : i32
    %c0_i32_0 = arith.constant 0 : i32
    %c0_i32_1 = arith.constant 0 : i32
    return %c0_i32, %c0_i32_0 : i32, i32
  }
  func.func @transform_7(%arg0: i32) -> (i32, i32) {
    %c0_i32 = arith.constant 0 : i32
    %c0_i32_0 = arith.constant 0 : i32
    %c0_i32_1 = arith.constant 0 : i32
    return %c0_i32, %c0_i32_0 : i32, i32
  }
  func.func @transform_8(%arg0: i32) -> (i32, i32) {
    %c0_i32 = arith.constant 0 : i32
    %c0_i32_0 = arith.constant 0 : i32
    %c0_i32_1 = arith.constant 0 : i32
    return %c0_i32, %c0_i32_0 : i32, i32
  }
  func.func @transform_9(%arg0: i32) -> (i32, i32) {
    %c0_i32 = arith.constant 0 : i32
    %c0_i32_0 = arith.constant 0 : i32
    %c0_i32_1 = arith.constant 0 : i32
    return %c0_i32, %c0_i32_0 : i32, i32
  }
  func.func @transform_10(%arg0: i32) -> (i32, i32) {
    %c0_i32 = arith.constant 0 : i32
    %c0_i32_0 = arith.constant 0 : i32
    %c0_i32_1 = arith.constant 0 : i32
    return %c0_i32, %c0_i32_0 : i32, i32
  }
}

</mosaic_0001>

<bundles_post_ra>
// kernel: mlp_forward.3
= control target key start
LH: loop header
LB: loop body
LE: loop exit
PB: predicated region body
PF: predicated region fallthrough
CT: control target
= control target key end

     0   :  { %16 = vsyncpa [#allocation3], 0  ;;  %v933_v25 = vmov 1983009808   ;;  %v170_v27 = vlaneseq  ;;  %s1588_s0 = inlined_call_operand.vmem [shape: f32[2,512], index: 0, kind: input, shape index: {}]   ;;  %s1589_s1 = inlined_call_operand.vmem [shape: f32[512,256], index: 1, kind: input, shape index: {}]   ;;  %s1590_s2 = inlined_call_operand.vmem [shape: f32[1,256], index: 2, kind: input, shape index: {}]   ;;  %s1591_s3 = inlined_call_operand.vmem [shape: f32[1,256], index: 3, kind: input, shape index: {}]   ;;  %s1592_s4 = inlined_call_operand.vmem [shape: f32[256,128], index: 4, kind: input, shape index: {}]   ;;  %s1593_s5 = inlined_call_operand.vmem [shape: f32[1,128], index: 5, kind: input, shape index: {}]   ;;  %s1594_s6 = inlined_call_operand.vmem [shape: f32[1,128], index: 6, kind: input, shape index: {}]   ;;  %s1595_s7 = inlined_call_operand.vmem [shape: f32[128,6], index: 7, kind: input, shape index: {}]   ;;  %s1596_s8 = inlined_call_operand.vmem [shape: f32[1,6], index: 8, kind: input, shape index: {}]   ;;  %s1597_s9 = inlined_call_operand.hbm [shape: f32[2,128], index: 9, kind: output, shape index: {0}]   ;;  %s1598_s10 = inlined_call_operand.hbm [shape: f32[2,6], index: 10, kind: output, shape index: {1}]  }
   0x1   :  { %v38_v0 = vld [vmem:[%s1589_s1 + $0x8] sm:$0xff]  ;;  %v40_v1 = vld [vmem:[%s1589_s1 + $0x18] sm:$0xff]  ;;  %v37_v2 = vld [vmem:[%s1589_s1] sm:$0xff]  ;;  %v168_v26 = vunpack.c.l.s4 %v933_v25 }
   0x2   :  { %v692_v3 = vpack.c.bf16 %v40_v1, %v38_v0  ;;  %v39_v4 = vld [vmem:[%s1589_s1 + $0x10] sm:$0xff]  ;;  %v42_v5 = vld [vmem:[%s1589_s1 + $0x28] sm:$0xff]  ;;  %v44_v6 = vld [vmem:[%s1589_s1 + $0x38] sm:$0xff]  ;;  %v1060_v35 = vshrl.u32 %v170_v27, 7 }
   0x3   :  { %v694_v7 = vpack.c.bf16 %v39_v4, %v37_v2  ;;  %v696_v8 = vpack.c.bf16 %v44_v6, %v42_v5  ;;  %v41_v9 = vld [vmem:[%s1589_s1 + $0x20] sm:$0xff]  ;;  %v43_v10 = vld [vmem:[%s1589_s1 + $0x30] sm:$0xff]  ;;  %v46_v11 = vld [vmem:[%s1589_s1 + $0x48] sm:$0xff]  ;;  %v169_v34 = vunpack.c.0.s8 %v168_v26 }
   0x4   :  { %693 = vmatprep.subr.bf16.mxu0 %v692_v3  ;;  %v48_v12 = vld [vmem:[%s1589_s1 + $0x58] sm:$0xff]  ;;  %v698_v13 = vpack.c.bf16 %v43_v10, %v41_v9  ;;  %v45_v15 = vld [vmem:[%s1589_s1 + $0x40] sm:$0xff]  ;;  %v47_v16 = vld [vmem:[%s1589_s1 + $0x50] sm:$0xff] }
   0x5   :  { %695 = vmatpush1.bf16.msra.mxu0 %v694_v7  ;;  %v700_v14 = vpack.c.bf16 %v48_v12, %v46_v11  ;;  %v50_v17 = vld [vmem:[%s1589_s1 + $0x68] sm:$0xff]  ;;  %v52_v18 = vld [vmem:[%s1589_s1 + $0x78] sm:$0xff]  ;;  %v702_v19 = vpack.c.bf16 %v47_v16, %v45_v15  ;;  %v49_v21 = vld [vmem:[%s1589_s1 + $0x60] sm:$0xff]  ;;  %v1075_v42 = vsub.s32 %v169_v34, %v1060_v35 }
   0x6   :  { %697 = vmatprep.subr.bf16.mxu0 %v696_v8  ;;  %v704_v20 = vpack.c.bf16 %v52_v18, %v50_v17  ;;  %v51_v22 = vld [vmem:[%s1589_s1 + $0x70] sm:$0xff]  ;;  %v54_v23 = vld [vmem:[%s1589_s1 + $0x88] sm:$0xff]  ;;  %v56_v24 = vld [vmem:[%s1589_s1 + $0x98] sm:$0xff] }
   0x7   :  { %v706_v28 = vpack.c.bf16 %v51_v22, %v49_v21  ;;  %v708_v29 = vpack.c.bf16 %v56_v24, %v54_v23  ;;  %v53_v30 = vld [vmem:[%s1589_s1 + $0x80] sm:$0xff]  ;;  %v55_v31 = vld [vmem:[%s1589_s1 + $0x90] sm:$0xff]  ;;  %v58_v32 = vld [vmem:[%s1589_s1 + $0xa8] sm:$0xff] }
   0x8   :  { %v60_v33 = vld [vmem:[%s1589_s1 + $0xb8] sm:$0xff]  ;;  %v710_v36 = vpack.c.bf16 %v55_v31, %v53_v30  ;;  %v57_v38 = vld [vmem:[%s1589_s1 + $0xa0] sm:$0xff]  ;;  %v59_v39 = vld [vmem:[%s1589_s1 + $0xb0] sm:$0xff] }
   0x9   :  { %699 = vmatpush1.bf16.msra.mxu0 %v698_v13  ;;  %v712_v37 = vpack.c.bf16 %v60_v33, %v58_v32  ;;  %v62_v40 = vld [vmem:[%s1589_s1 + $0xc8] sm:$0xff]  ;;  %v64_v41 = vld [vmem:[%s1589_s1 + $0xd8] sm:$0xff]  ;;  %v714_v43 = vpack.c.bf16 %v59_v39, %v57_v38  ;;  %v61_v45 = vld [vmem:[%s1589_s1 + $0xc0] sm:$0xff] }
   0xa   :  { %701 = vmatprep.subr.bf16.mxu0 %v700_v14  ;;  %v716_v44 = vpack.c.bf16 %v64_v41, %v62_v40  ;;  %v63_v46 = vld [vmem:[%s1589_s1 + $0xd0] sm:$0xff]  ;;  %v1086_v47 = vld [vmem:[%s1588_s0] sm:$0xff]  ;;  %v66_v48 = vld [vmem:[%s1589_s1 + $0xe8] sm:$0xff] }
   0xb   :  { %v68_v49 = vld [vmem:[%s1589_s1 + $0xf8] sm:$0xff]  ;;  %v1096_v50 = vrot.slane %v1086_v47, %v1075_v42  ;;  %v718_v51 = vpack.c.bf16 %v63_v46, %v61_v45  ;;  %v65_v54 = vld [vmem:[%s1589_s1 + $0xe0] sm:$0xff]  ;;  %v67_v55 = vld [vmem:[%s1589_s1 + $0xf0] sm:$0xff] }
   0xc   :  { %v720_v53 = vpack.c.bf16 %v68_v49, %v66_v48  ;;  %v70_v56 = vld [vmem:[%s1589_s1 + $0x108] sm:$0xff]  ;;  %v72_v57 = vld [vmem:[%s1589_s1 + $0x118] sm:$0xff]  ;;  %v722_v58 = vpack.c.bf16 %v67_v55, %v65_v54  ;;  %v69_v60 = vld [vmem:[%s1589_s1 + $0x100] sm:$0xff] }
   0xd   :  { %703 = vmatpush1.bf16.msra.mxu0 %v702_v19  ;;  %v181_v52 = vcombine.high %v1096_v50, %v1096_v50  ;;  %v724_v59 = vpack.c.bf16 %v72_v57, %v70_v56  ;;  %v71_v61 = vld [vmem:[%s1589_s1 + $0x110] sm:$0xff]  ;;  %v74_v62 = vld [vmem:[%s1589_s1 + $0x128] sm:$0xff]  ;;  %v76_v63 = vld [vmem:[%s1589_s1 + $0x138] sm:$0xff] }
   0xe   :  { %705 = vmatprep.subr.bf16.mxu0 %v704_v20  ;;  %v726_v0 = vpack.c.bf16 %v71_v61, %v69_v60  ;;  %v728_v1 = vpack.c.bf16 %v76_v63, %v74_v62  ;;  %v73_v2 = vld [vmem:[%s1589_s1 + $0x120] sm:$0xff]  ;;  %v75_v3 = vld [vmem:[%s1589_s1 + $0x130] sm:$0xff]  ;;  %v78_v4 = vld [vmem:[%s1589_s1 + $0x148] sm:$0xff] }
   0xf   :  { %251 = vmatprep.mubr.f32.mxu0 %v181_v52  ;;  %v80_v5 = vld [vmem:[%s1589_s1 + $0x158] sm:$0xff]  ;;  %v730_v6 = vpack.c.bf16 %v75_v3, %v73_v2  ;;  %v77_v8 = vld [vmem:[%s1589_s1 + $0x140] sm:$0xff]  ;;  %v79_v9 = vld [vmem:[%s1589_s1 + $0x150] sm:$0xff] }
  0x10   :  { %v732_v7 = vpack.c.bf16 %v80_v5, %v78_v4  ;;  %v82_v10 = vld [vmem:[%s1589_s1 + $0x168] sm:$0xff]  ;;  %v84_v11 = vld [vmem:[%s1589_s1 + $0x178] sm:$0xff]  ;;  %v734_v12 = vpack.c.bf16 %v79_v9, %v77_v8  ;;  %v81_v14 = vld [vmem:[%s1589_s1 + $0x160] sm:$0xff] }
  0x11   :  { %707 = vmatpush1.bf16.msra.mxu0 %v706_v28  ;;  %v736_v13 = vpack.c.bf16 %v84_v11, %v82_v10  ;;  %v83_v15 = vld [vmem:[%s1589_s1 + $0x170] sm:$0xff]  ;;  %v86_v16 = vld [vmem:[%s1589_s1 + $0x188] sm:$0xff]  ;;  %v88_v17 = vld [vmem:[%s1589_s1 + $0x198] sm:$0xff] }
  0x12   :  { %709 = vmatprep.subr.bf16.mxu0 %v708_v29  ;;  %v85_v18 = vld [vmem:[%s1589_s1 + $0x180] sm:$0xff]  ;;  %v87_v19 = vld [vmem:[%s1589_s1 + $0x190] sm:$0xff]  ;;  %v376_v21 = vld [vmem:[%s1592_s4 + $0x88] sm:$0xff]  ;;  %v738_v23 = vpack.c.bf16 %v83_v15, %v81_v14  ;;  %v740_v28 = vpack.c.bf16 %v88_v17, %v86_v16 }
  0x13   :  { %v375_v20 = vld [vmem:[%s1592_s4 + $0x80] sm:$0xff]  ;;  %v360_v25 = vld [vmem:[%s1592_s4 + $0x8] sm:$0xff]  ;;  %v377_v26 = vld [vmem:[%s1592_s4 + $0x90] sm:$0xff]  ;;  %v742_v39 = vpack.c.bf16 %v87_v19, %v85_v18 }
  0x14   :  { %v359_v22 = vld [vmem:[%s1592_s4] sm:$0xff]  ;;  %v820_v24 = vpack.c.bf16 %v376_v21, %v375_v20  ;;  %v378_v27 = vld [vmem:[%s1592_s4 + $0x98] sm:$0xff]  ;;  %v361_v31 = vld [vmem:[%s1592_s4 + $0x10] sm:$0xff] }
  0x15   :  { %711 = vmatpush1.bf16.msra.mxu0 %v710_v36  ;;  %v822_v29 = vpack.c.bf16 %v360_v25, %v359_v22  ;;  %v824_v30 = vpack.c.bf16 %v378_v27, %v377_v26  ;;  %v362_v32 = vld [vmem:[%s1592_s4 + $0x18] sm:$0xff]  ;;  %v379_v33 = vld [vmem:[%s1592_s4 + $0xa0] sm:$0xff]  ;;  %v90_v34 = vld [vmem:[%s1589_s1 + $0x1a8] sm:$0xff] }
  0x16   :  { %713 = vmatprep.subr.bf16.mxu0 %v712_v37  ;;  %v92_v36 = vld [vmem:[%s1589_s1 + $0x1b8] sm:$0xff]  ;;  %821 = vmatprep.subr.bf16.mxu1 %v820_v24  ;;  %v380_v37 = vld [vmem:[%s1592_s4 + $0xa8] sm:$0xff]  ;;  %v826_v38 = vpack.c.bf16 %v362_v32, %v361_v31  ;;  %v89_v40 = vld [vmem:[%s1589_s1 + $0x1a0] sm:$0xff] }
  0x17   :  { %823 = vmatpush3.bf16.msra.mxu1 %v822_v29  ;;  %v828_v41 = vpack.c.bf16 %v380_v37, %v379_v33  ;;  %v744_v45 = vpack.c.bf16 %v92_v36, %v90_v34  ;;  %v91_v46 = vld [vmem:[%s1589_s1 + $0x1b0] sm:$0xff]  ;;  %v382_v49 = vld [vmem:[%s1592_s4 + $0xb8] sm:$0xff] }
  0x18   :  { %825 = vmatprep.subr.bf16.mxu1 %v824_v30  ;;  %v381_v48 = vld [vmem:[%s1592_s4 + $0xb0] sm:$0xff]  ;;  %v96_v52 = vld [vmem:[%s1589_s1 + $0x1d8] sm:$0xff] }
  0x19   :  { %715 = vmatpush1.bf16.msra.mxu0 %v714_v43  ;;  %v363_v43 = vld [vmem:[%s1592_s4 + $0x20] sm:$0xff] }
  0x1a   :  { %717 = vmatprep.subr.bf16.mxu0 %v716_v44  ;;  %v364_v44 = vld [vmem:[%s1592_s4 + $0x28] sm:$0xff] }
  0x1b   :  { %827 = vmatpush3.bf16.msra.mxu1 %v826_v38 }
  0x1d   :  { %719 = vmatpush1.bf16.msra.mxu0 %v718_v51  ;;  %v94_v51 = vld [vmem:[%s1589_s1 + $0x1c8] sm:$0xff] }
  0x1e   :  { %721 = vmatprep.subr.bf16.mxu0 %v720_v53  ;;  %v830_v53 = vpack.c.bf16 %v364_v44, %v363_v43 }
  0x21   :  { %723 = vmatpush1.bf16.msra.mxu0 %v722_v58 }
  0x22   :  { %725 = vmatprep.subr.bf16.mxu0 %v724_v59 }
  0x25   :  { %727 = vmatpush1.bf16.msra.mxu0 %v726_v0 }
  0x26   :  { %729 = vmatprep.subr.bf16.mxu0 %v728_v1 }
  0x29   :  { %731 = vmatpush1.bf16.msra.mxu0 %v730_v6 }
  0x2a   :  { %733 = vmatprep.subr.bf16.mxu0 %v732_v7 }
  0x2d   :  { %735 = vmatpush1.bf16.msra.mxu0 %v734_v12 }
  0x2e   :  { %737 = vmatprep.subr.bf16.mxu0 %v736_v13 }
  0x31   :  { %739 = vmatpush1.bf16.msra.mxu0 %v738_v23 }
  0x32   :  { %741 = vmatprep.subr.bf16.mxu0 %v740_v28 }
  0x33   :  { %17 = vsyncpa [#allocation5], 0  ;;  %v746_v54 = vpack.c.bf16 %v91_v46, %v89_v40  ;;  %v93_v55 = vld [vmem:[%s1589_s1 + $0x1c0] sm:$0xff]  ;;  %829 = vmatprep.subr.bf16.mxu1 %v828_v41  ;;  %v832_v56 = vpack.c.bf16 %v382_v49, %v381_v48  ;;  %v365_v57 = vld [vmem:[%s1592_s4 + $0x30] sm:$0xff]  ;;  %v748_v59 = vpack.c.bf16 %v96_v52, %v94_v51  ;;  %v166_v4 = vcombine.high %v1086_v47, %v1086_v47 }
  0x34   :  { %v366_v58 = vld [vmem:[%s1592_s4 + $0x38] sm:$0xff]  ;;  %v95_v60 = vld [vmem:[%s1589_s1 + $0x1d0] sm:$0xff]  ;;  %v383_v61 = vld [vmem:[%s1592_s4 + $0xc0] sm:$0xff]  ;;  %831 = vmatpush3.bf16.msra.mxu1 %v830_v53  ;;  %vm935_vm0 = vmmov 0  }
  0x35   :  { %743 = vmatpush1.bf16.msra.mxu0 %v742_v39  ;;  %v384_v62 = vld [vmem:[%s1592_s4 + $0xc8] sm:$0xff]  ;;  %v100_v0 = vld [vmem:[%s1589_s1 + $0x1f8] sm:$0xff]  ;;  %v834_v1 = vpack.c.bf16 %v366_v58, %v365_v57  ;;  %v750_v2 = vpack.c.bf16 %v95_v60, %v93_v55  ;;  %v97_v3 = vld [vmem:[%s1589_s1 + $0x1e0] sm:$0xff]  ;;  %833 = vmatprep.subr.bf16.mxu1 %v832_v56  ;;  %v1277_v15 = vrot.slane %v166_v4, %v1075_v42 }
  0x36   :  { %745 = vmatprep.subr.bf16.mxu0 %v744_v45  ;;  %v98_v63 = vld [vmem:[%s1589_s1 + $0x1e8] sm:$0xff]  ;;  %v836_v5 = vpack.c.bf16 %v384_v62, %v383_v61  ;;  %v367_v6 = vld [vmem:[%s1592_s4 + $0x40] sm:$0xff]  ;;  %v99_v9 = vld [vmem:[%s1589_s1 + $0x1f0] sm:$0xff] }
  0x37   :  { %v368_v7 = vld [vmem:[%s1592_s4 + $0x48] sm:$0xff]  ;;  %v752_v8 = vpack.c.bf16 %v100_v0, %v98_v63  ;;  %v385_v47 = vld [vmem:[%s1592_s4 + $0xd0] sm:$0xff]  ;;  %v386_v10 = vld [vmem:[%s1592_s4 + $0xd8] sm:$0xff]  ;;  %v754_v14 = vpack.c.bf16 %v99_v9, %v97_v3  ;;  %v182_v25 = vcombine.high %v1277_v15, %v1277_v15 }
  0x38   :  { %v102_v11 = vld [vmem:[%s1589_s1 + $0x208] sm:$0xff]  ;;  %v104_v12 = vld [vmem:[%s1589_s1 + $0x218] sm:$0xff]  ;;  %835 = vmatpush3.bf16.msra.mxu1 %v834_v1  ;;  %v838_v13 = vpack.c.bf16 %v368_v7, %v367_v6  ;;  %v840_v16 = vpack.c.bf16 %v386_v10, %v385_v47  ;;  %v369_v17 = vld [vmem:[%s1592_s4 + $0x50] sm:$0xff] }
  0x39   :  { %747 = vmatpush1.bf16.msra.mxu0 %v746_v54  ;;  %837 = vmatprep.subr.bf16.mxu1 %v836_v5  ;;  %v370_v18 = vld [vmem:[%s1592_s4 + $0x58] sm:$0xff]  ;;  %v756_v19 = vpack.c.bf16 %v104_v12, %v102_v11  ;;  %v101_v20 = vld [vmem:[%s1589_s1 + $0x200] sm:$0xff]  ;;  %v103_v42 = vld [vmem:[%s1589_s1 + $0x210] sm:$0xff] }
  0x3a   :  { %749 = vmatprep.subr.bf16.mxu0 %v748_v59  ;;  %v106_v21 = vld [vmem:[%s1589_s1 + $0x228] sm:$0xff]  ;;  %v108_v22 = vld [vmem:[%s1589_s1 + $0x238] sm:$0xff]  ;;  %v842_v23 = vpack.c.bf16 %v370_v18, %v369_v17  ;;  %v758_v24 = vpack.c.bf16 %v103_v42, %v101_v20  ;;  %v105_v27 = vld [vmem:[%s1589_s1 + $0x220] sm:$0xff] }
  0x3b   :  { %v760_v26 = vpack.c.bf16 %v108_v22, %v106_v21  ;;  %v107_v28 = vld [vmem:[%s1589_s1 + $0x230] sm:$0xff]  ;;  %v110_v29 = vld [vmem:[%s1589_s1 + $0x248] sm:$0xff]  ;;  %v112_v30 = vld [vmem:[%s1589_s1 + $0x258] sm:$0xff] }
  0x3c   :  { %839 = vmatpush3.bf16.msra.mxu1 %v838_v13  ;;  %v762_v31 = vpack.c.bf16 %v107_v28, %v105_v27  ;;  %v764_v32 = vpack.c.bf16 %v112_v30, %v110_v29  ;;  %v109_v33 = vld [vmem:[%s1589_s1 + $0x240] sm:$0xff]  ;;  %v111_v34 = vld [vmem:[%s1589_s1 + $0x250] sm:$0xff]  ;;  %v114_v36 = vld [vmem:[%s1589_s1 + $0x268] sm:$0xff] }
  0x3d   :  { %751 = vmatpush1.bf16.msra.mxu0 %v750_v2  ;;  %841 = vmatprep.subr.bf16.mxu1 %v840_v16  ;;  %v766_v37 = vpack.c.bf16 %v111_v34, %v109_v33  ;;  %v113_v39 = vld [vmem:[%s1589_s1 + $0x260] sm:$0xff]  ;;  %v115_v40 = vld [vmem:[%s1589_s1 + $0x270] sm:$0xff]  ;;  %v118_v41 = vld [vmem:[%s1589_s1 + $0x288] sm:$0xff] }
  0x3e   :  { %753 = vmatprep.subr.bf16.mxu0 %v752_v8  ;;  %v120_v43 = vld [vmem:[%s1589_s1 + $0x298] sm:$0xff]  ;;  %v770_v44 = vpack.c.bf16 %v115_v40, %v113_v39  ;;  %v117_v46 = vld [vmem:[%s1589_s1 + $0x280] sm:$0xff]  ;;  %v119_v48 = vld [vmem:[%s1589_s1 + $0x290] sm:$0xff] }
  0x3f   :  { %v772_v45 = vpack.c.bf16 %v120_v43, %v118_v41  ;;  %v122_v49 = vld [vmem:[%s1589_s1 + $0x2a8] sm:$0xff]  ;;  %v124_v51 = vld [vmem:[%s1589_s1 + $0x2b8] sm:$0xff]  ;;  %v774_v52 = vpack.c.bf16 %v119_v48, %v117_v46  ;;  %v121_v54 = vld [vmem:[%s1589_s1 + $0x2a0] sm:$0xff] }
  0x40   :  { %843 = vmatpush3.bf16.msra.mxu1 %v842_v23  ;;  %v776_v53 = vpack.c.bf16 %v124_v51, %v122_v49  ;;  %v123_v55 = vld [vmem:[%s1589_s1 + $0x2b0] sm:$0xff]  ;;  %v126_v56 = vld [vmem:[%s1589_s1 + $0x2c8] sm:$0xff]  ;;  %v128_v57 = vld [vmem:[%s1589_s1 + $0x2d8] sm:$0xff] }
  0x41   :  { %755 = vmatpush1.bf16.msra.mxu0 %v754_v14  ;;  %v778_v58 = vpack.c.bf16 %v123_v55, %v121_v54  ;;  %v780_v59 = vpack.c.bf16 %v128_v57, %v126_v56  ;;  %v125_v60 = vld [vmem:[%s1589_s1 + $0x2c0] sm:$0xff]  ;;  %v127_v61 = vld [vmem:[%s1589_s1 + $0x2d0] sm:$0xff]  ;;  %v130_v62 = vld [vmem:[%s1589_s1 + $0x2e8] sm:$0xff] }
  0x42   :  { %757 = vmatprep.subr.bf16.mxu0 %v756_v19  ;;  %v132_v63 = vld [vmem:[%s1589_s1 + $0x2f8] sm:$0xff]  ;;  %v782_v0 = vpack.c.bf16 %v127_v61, %v125_v60  ;;  %v129_v2 = vld [vmem:[%s1589_s1 + $0x2e0] sm:$0xff]  ;;  %v131_v3 = vld [vmem:[%s1589_s1 + $0x2f0] sm:$0xff] }
  0x43   :  { %v784_v1 = vpack.c.bf16 %v132_v63, %v130_v62  ;;  %v134_v4 = vld [vmem:[%s1589_s1 + $0x308] sm:$0xff]  ;;  %v136_v5 = vld [vmem:[%s1589_s1 + $0x318] sm:$0xff]  ;;  %v786_v6 = vpack.c.bf16 %v131_v3, %v129_v2  ;;  %v133_v8 = vld [vmem:[%s1589_s1 + $0x300] sm:$0xff]  ;;  %v934_v2 = vmov 0.0|0.0   ;;  %v333_v3 = vsub.s32 0, %v1060_v35 }
  0x44   :  { %252 = vmatmul.mubr.f32.vlgmr.msra.gmra.mrb[0].mxu0 %v1096_v50  ;;  %v116_v50 = vld [vmem:[%s1589_s1 + $0x278] sm:$0xff]  ;;  %v788_v7 = vpack.c.bf16 %v136_v5, %v134_v4  ;;  %v135_v9 = vld [vmem:[%s1589_s1 + $0x310] sm:$0xff]  ;;  %v138_v47 = vld [vmem:[%s1589_s1 + $0x328] sm:$0xff]  ;;  %v337_v5 = vsub.s32 1, %v1060_v35 }
  0x45   :  { %759 = vmatpush1.bf16.msra.mxu0 %v758_v24  ;;  %322 = vmatprep.mubr.f32.mxu0 %v182_v25  ;;  %v768_v38 = vpack.c.bf16 %v116_v50, %v114_v36  ;;  %v140_v10 = vld [vmem:[%s1589_s1 + $0x338] sm:$0xff]  ;;  %v790_v11 = vpack.c.bf16 %v135_v9, %v133_v8  ;;  %v137_v13 = vld [vmem:[%s1589_s1 + $0x320] sm:$0xff]  ;;  %v139_v14 = vld [vmem:[%s1589_s1 + $0x330] sm:$0xff] }
  0x46   :  { %761 = vmatprep.subr.bf16.mxu0 %v760_v26  ;;  %v792_v12 = vpack.c.bf16 %v140_v10, %v138_v47  ;;  %v142_v16 = vld [vmem:[%s1589_s1 + $0x348] sm:$0xff]  ;;  %v144_v17 = vld [vmem:[%s1589_s1 + $0x358] sm:$0xff]  ;;  %v794_v18 = vpack.c.bf16 %v139_v14, %v137_v13  ;;  %v141_v20 = vld [vmem:[%s1589_s1 + $0x340] sm:$0xff] }
  0x47   :  { %v796_v19 = vpack.c.bf16 %v144_v17, %v142_v16  ;;  %v143_v42 = vld [vmem:[%s1589_s1 + $0x350] sm:$0xff]  ;;  %v146_v21 = vld [vmem:[%s1589_s1 + $0x368] sm:$0xff]  ;;  %v148_v22 = vld [vmem:[%s1589_s1 + $0x378] sm:$0xff] }
  0x48   :  { %v798_v23 = vpack.c.bf16 %v143_v42, %v141_v20  ;;  %v800_v24 = vpack.c.bf16 %v148_v22, %v146_v21  ;;  %v145_v25 = vld [vmem:[%s1589_s1 + $0x360] sm:$0xff]  ;;  %v147_v26 = vld [vmem:[%s1589_s1 + $0x370] sm:$0xff]  ;;  %v150_v27 = vld [vmem:[%s1589_s1 + $0x388] sm:$0xff] }
  0x49   :  { %763 = vmatpush1.bf16.msra.mxu0 %v762_v31  ;;  %v152_v28 = vld [vmem:[%s1589_s1 + $0x398] sm:$0xff]  ;;  %v802_v29 = vpack.c.bf16 %v147_v26, %v145_v25  ;;  %v149_v31 = vld [vmem:[%s1589_s1 + $0x380] sm:$0xff]  ;;  %v154_v33 = vld [vmem:[%s1589_s1 + $0x3a8] sm:$0xff] }
  0x4a   :  { %765 = vmatprep.subr.bf16.mxu0 %v764_v32  ;;  %v804_v30 = vpack.c.bf16 %v152_v28, %v150_v27  ;;  %v151_v32 = vld [vmem:[%s1589_s1 + $0x390] sm:$0xff]  ;;  %v156_v34 = vld [vmem:[%s1589_s1 + $0x3b8] sm:$0xff]  ;;  %v158_v39 = vld [vmem:[%s1589_s1 + $0x3c8] sm:$0xff] }
  0x4b   :  { %v806_v36 = vpack.c.bf16 %v151_v32, %v149_v31  ;;  %v808_v50 = vpack.c.bf16 %v156_v34, %v154_v33  ;;  %v160_v40 = vld [vmem:[%s1589_s1 + $0x3d8] sm:$0xff]  ;;  %v162_v46 = vld [vmem:[%s1589_s1 + $0x3e8] sm:$0xff]  ;;  %v387_v55 = vld [vmem:[%s1592_s4 + $0xe0] sm:$0xff] }
  0x4c   :  { %v812_v43 = vpack.c.bf16 %v160_v40, %v158_v39  ;;  %v164_v48 = vld [vmem:[%s1589_s1 + $0x3f8] sm:$0xff]  ;;  %v388_v56 = vld [vmem:[%s1592_s4 + $0xe8] sm:$0xff]  ;;  %v373_v63 = vld [vmem:[%s1592_s4 + $0x70] sm:$0xff] }
  0x4d   :  { %767 = vmatpush1.bf16.msra.mxu0 %v766_v37  ;;  %v153_v37 = vld [vmem:[%s1589_s1 + $0x3a0] sm:$0xff]  ;;  %v816_v51 = vpack.c.bf16 %v164_v48, %v162_v46  ;;  %v844_v57 = vpack.c.bf16 %v388_v56, %v387_v55  ;;  %v390_v61 = vld [vmem:[%s1592_s4 + $0xf8] sm:$0xff]  ;;  %v480_v35 = vld [vmem:[%s1595_s7 + $0x8] sm:$0xff] }
  0x4e   :  { %769 = vmatprep.subr.bf16.mxu0 %v768_v38  ;;  %v155_v38 = vld [vmem:[%s1589_s1 + $0x3b0] sm:$0xff]  ;;  %v329_v4 = vld [vmem:[%s1590_s2] sm:$0x3]  ;;  %v482_v21 = vld [vmem:[%s1595_s7 + $0x18] sm:$0xff] }
  0x4f   :  { %v810_v41 = vpack.c.bf16 %v155_v38, %v153_v37  ;;  %845 = vmatprep.subr.bf16.mxu1 %v844_v57  ;;  %v338_v8 = vrot.slane %v329_v4, %v337_v5  ;;  %v479_v16 = vld [vmem:[%s1595_s7] sm:$0xff]  ;;  %v481_v42 = vld [vmem:[%s1595_s7 + $0x10] sm:$0xff]  ;;  %v486_v27 = vld [vmem:[%s1595_s7 + $0x38] sm:$0xff] }
  0x50   :  { %v856_v22 = vpack.c.bf16 %v482_v21, %v481_v42  ;;  %v485_v26 = vld [vmem:[%s1595_s7 + $0x30] sm:$0xff]  ;;  %v490_v33 = vld [vmem:[%s1595_s7 + $0x58] sm:$0xff]  ;;  %v603_v48 = vld [vmem:[%s1594_s6] ss:$0 sm:$0xff] }
  0x51   :  { %771 = vmatpush1.bf16.msra.mxu0 %v770_v44  ;;  %v157_v44 = vld [vmem:[%s1589_s1 + $0x3c0] sm:$0xff]  ;;  %v862_v28 = vpack.c.bf16 %v486_v27, %v485_v26  ;;  %v489_v32 = vld [vmem:[%s1595_s7 + $0x50] sm:$0xff]  ;;  %v494_v39 = vld [vmem:[%s1595_s7 + $0x78] sm:$0xff] }
  0x52   :  { %773 = vmatprep.subr.bf16.mxu0 %v772_v45  ;;  %v159_v45 = vld [vmem:[%s1589_s1 + $0x3d0] sm:$0xff]  ;;  %v868_v34 = vpack.c.bf16 %v490_v33, %v489_v32 }
  0x53   :  { %v814_v49 = vpack.c.bf16 %v159_v45, %v157_v44  ;;  %v493_v38 = vld [vmem:[%s1595_s7 + $0x70] sm:$0xff]  ;;  %v602_v45 = vld [vmem:[%s1593_s5] ss:$0 sm:$0xff] }
  0x54   :  { %v874_v40 = vpack.c.bf16 %v494_v39, %v493_v38 }
  0x55   :  { %775 = vmatpush1.bf16.msra.mxu0 %v774_v52  ;;  %v161_v52 = vld [vmem:[%s1589_s1 + $0x3e0] sm:$0xff] }
  0x56   :  { %777 = vmatprep.subr.bf16.mxu0 %v776_v53  ;;  %v163_v53 = vld [vmem:[%s1589_s1 + $0x3f0] sm:$0xff] }
  0x57   :  { %v818_v54 = vpack.c.bf16 %v163_v53, %v161_v52 }
  0x59   :  { %779 = vmatpush1.bf16.msra.mxu0 %v778_v58  ;;  %v371_v58 = vld [vmem:[%s1592_s4 + $0x60] sm:$0xff] }
  0x5a   :  { %781 = vmatprep.subr.bf16.mxu0 %v780_v59  ;;  %v372_v59 = vld [vmem:[%s1592_s4 + $0x68] sm:$0xff] }
  0x5b   :  { %v846_v60 = vpack.c.bf16 %v372_v59, %v371_v58 }
  0x5d   :  { %783 = vmatpush1.bf16.msra.mxu0 %v782_v0  ;;  %847 = vmatpush3.bf16.msra.mxu1 %v846_v60  ;;  %v374_v0 = vld [vmem:[%s1592_s4 + $0x78] sm:$0xff] }
  0x5e   :  { %785 = vmatprep.subr.bf16.mxu0 %v784_v1  ;;  %v850_v1 = vpack.c.bf16 %v374_v0, %v373_v63 }
  0x61   :  { %787 = vmatpush1.bf16.msra.mxu0 %v786_v6  ;;  %v343_v6 = vld [vmem:[%s1591_s3] sm:$0x3] }
  0x62   :  { %789 = vmatprep.subr.bf16.mxu0 %v788_v7  ;;  %v334_v7 = vrot.slane %v329_v4, %v333_v3  ;;  %v348_v9 = vrot.slane %v343_v6, %v333_v3  ;;  %v352_v10 = vrot.slane %v343_v6, %v337_v5 }
  0x65   :  { %791 = vmatpush1.bf16.msra.mxu0 %v790_v11 }
  0x66   :  { %793 = vmatprep.subr.bf16.mxu0 %v792_v12 }
  0x69   :  { %795 = vmatpush1.bf16.msra.mxu0 %v794_v18 }
  0x6a   :  { %797 = vmatprep.subr.bf16.mxu0 %v796_v19  ;;  %v853_v19 = vpack.c.bf16 %v480_v35, %v479_v16 }
  0x6d   :  { %799 = vmatpush1.bf16.msra.mxu0 %v798_v23  ;;  %v483_v23 = vld [vmem:[%s1595_s7 + $0x20] sm:$0xff] }
  0x6e   :  { %801 = vmatprep.subr.bf16.mxu0 %v800_v24  ;;  %v484_v24 = vld [vmem:[%s1595_s7 + $0x28] sm:$0xff] }
  0x6f   :  { %v859_v25 = vpack.c.bf16 %v484_v24, %v483_v23 }
  0x71   :  { %803 = vmatpush1.bf16.msra.mxu0 %v802_v29  ;;  %v487_v29 = vld [vmem:[%s1595_s7 + $0x40] sm:$0xff] }
  0x72   :  { %805 = vmatprep.subr.bf16.mxu0 %v804_v30  ;;  %v488_v30 = vld [vmem:[%s1595_s7 + $0x48] sm:$0xff] }
  0x73   :  { %v865_v31 = vpack.c.bf16 %v488_v30, %v487_v29 }
  0x75   :  { %807 = vmatpush1.bf16.msra.mxu0 %v806_v36  ;;  %v491_v36 = vld [vmem:[%s1595_s7 + $0x60] sm:$0xff] }
  0x76   :  { %809 = vmatprep.subr.bf16.mxu0 %v808_v50  ;;  %v492_v50 = vld [vmem:[%s1595_s7 + $0x68] sm:$0xff]  ;;  %s937_s7 = smov [#allocation2]  }
  0x77   :  { %v871_v37 = vpack.c.bf16 %v492_v50, %v491_v36  ;;  %s580_s1 = sshll.u32 %s937_s7, 4  ;;  %s581_s1 = int_to_ptr.vmem [resolvable:$true] %s580_s1 }
  0x78   :  { %s885_s13 = scalar_lea.vmem %s581_s1, 32  ;;  %p890_p1 = scmp.lt.s32.totalorder %s581_s1, %s581_s1 }
  0x79   :  { %811 = vmatpush1.bf16.msra.mxu0 %v810_v41  ;;  %v936_v41 = vmov 0.0   ;;  %p886_p0 = scmp.ne.s32.totalorder %s581_s1, %s885_s13  ;;  %p891_p2 = scmp.lt.s32.totalorder %s885_s13, %s885_s13 }
  0x7a   :  { %813 = vmatprep.subr.bf16.mxu0 %v812_v43 }
  0x7b   :  { %p892_p3 = por %p891_p2, %p890_p1 }
  0x7d   :  { %815 = vmatpush1.bf16.msra.mxu0 %v814_v49  ;;  %p893_p4 = pnand %p892_p3, %p886_p0 }
  0x7e   :  { %817 = vmatprep.subr.bf16.mxu0 %v816_v51 }
  0x81   :  { %819 = vmatpush1.bf16.msra.mxu0 %v818_v54 }
  0x84   :  { %323 = vmatmul.mubr.f32.vlgmr.msra.gmra.mrb[0].mxu0 %v1277_v15  ;;  %v389_v15 = vld [vmem:[%s1592_s4 + $0xf0] sm:$0xff] }
  0x85   :  { %v848_v62 = vpack.c.bf16 %v390_v61, %v389_v15 }
  0x87   :  { %849 = vmatprep.subr.bf16.mxu1 %v848_v62 }
  0x88   :  { %851 = vmatpush3.bf16.msra.mxu1 %v850_v1 }
  0x89   :  { %852 = vmatprep.subr.bf16.mxu1 %v934_v2 }
 0x157   :  { %v324_v47 = vpop.f32.mrb[0].mxu0 }
 0x158   :  { %v341_v11 = vmul.f32 %v334_v7, %v324_v47  ;;  %v326_v12 = vpop.f32.mrb[1].mxu0 }
 0x159   :  { %v342_v13 = vmul.f32 %v338_v8, %v326_v12 }
 0x15a   :  { %v355_v14 = vadd.f32 %v348_v9, %v341_v11 }
 0x15b   :  { %v356_v17 = vadd.f32 %v352_v10, %v342_v13 }
 0x15c   :  { %v357_v20 = vmax.f32 %v355_v14, 0.0 }
 0x15d   :  { %v358_v18 = vmax.f32 %v356_v17, 0.0 }
 0x15f   :  { %455 = vmatprep.mubr.f32.mxu1 %v358_v18 }
 0x160   :  { %456 = vmatmul.mubr.f32.vlgmr.msra.gmra.mrb[0].mxu1 %v357_v20 }
 0x161   :  { %854 = vmatpush3.bf16.msra.mxu1 %v853_v19  ;;  %689 = vmatprep.mubr.msk.f32.mxu1 %vm935_vm0, %v936_v41 }
 0x162   :  { %855 = vmatprep.subr.bf16.mxu1 %v934_v2 }
 0x165   :  { %857 = vmatpush3.bf16.msra.mxu1 %v856_v22 }
 0x166   :  { %858 = vmatprep.subr.bf16.mxu1 %v934_v2 }
 0x169   :  { %860 = vmatpush3.bf16.msra.mxu1 %v859_v25 }
 0x16a   :  { %861 = vmatprep.subr.bf16.mxu1 %v934_v2 }
 0x16d   :  { %863 = vmatpush3.bf16.msra.mxu1 %v862_v28 }
 0x16e   :  { %864 = vmatprep.subr.bf16.mxu1 %v934_v2 }
 0x171   :  { %866 = vmatpush3.bf16.msra.mxu1 %v865_v31 }
 0x172   :  { %867 = vmatprep.subr.bf16.mxu1 %v934_v2 }
 0x175   :  { %869 = vmatpush3.bf16.msra.mxu1 %v868_v34 }
 0x176   :  { %870 = vmatprep.subr.bf16.mxu1 %v934_v2 }
 0x179   :  { %872 = vmatpush3.bf16.msra.mxu1 %v871_v37 }
 0x17a   :  { %873 = vmatprep.subr.bf16.mxu1 %v934_v2 }
 0x17d   :  { %875 = vmatpush3.bf16.msra.mxu1 %v874_v40 }
 0x233   :  { %v637_v43 = vpop.f32.mrb[0].mxu1 }
 0x234   :  { %v638_v44 = vpop.f32.mrb[1].mxu1 }
 0x235   :  { %v639_v46 = vadd.f32 %v638_v44, %v637_v43 }
 0x237   :  { %v468_v49 = vmul.f32 %v639_v46, %v602_v45 }
 0x239   :  { %v476_v51 = vadd.f32 %v603_v48, %v468_v49 }
 0x23b   :  { %v477_v52 = vmax.f32 %v476_v51, 0.0 }
 0x23d   :  { %478 = vst [vmem:[#allocation2] sm:$0x3] %v477_v52  ;;  %690 = vmatmul.mubr.f32.vlgmr.msra.gmra.mrb[2].mxu1 %v477_v52 }
 0x23e   :  { %896 = shalt.err (!%p893_p4)
}
 0x23f   :  { %s897_s0 = scalar_lea.hbm %s1597_s9, 32 }
 0x240   :  { %p898_p5 = scmp.ne.s32.totalorder %s1597_s9, %s897_s0  ;;  %p901_p6 = scmp.lt.u32.totalorder %s897_s0, %s1597_s9 }
 0x242   :  { %p903_p7 = pnand %p901_p6, %p898_p5 }
 0x244   :  { %906 = shalt.err (!%p903_p7)
}
 0x245   :  { %583 = dma.vmem_to_hbm [thread:$0]  %s581_s1, 32, %s1597_s9, [#allocation3]   ;;  %v604_v53 = vld [vmem:[%s1596_s8] ss:$0 sm:$0xff]  ;;  %vm572_vm1 = vcmask 41984  }
 0x246   :  { %s938_s22 = smov [#allocation4]  }
 0x247   :  { %s590_s23 = sshll.u32 %s938_s22, 4  ;;  %s591_s23 = int_to_ptr.vmem [resolvable:$true] %s590_s23 }
 0x248   :  { %s907_s24 = scalar_lea.vmem %s591_s23, 32  ;;  %p912_p9 = scmp.lt.s32.totalorder %s591_s23, %s591_s23 }
 0x249   :  { %p908_p8 = scmp.ne.s32.totalorder %s591_s23, %s907_s24  ;;  %p913_p10 = scmp.lt.s32.totalorder %s907_s24, %s907_s24 }
 0x24b   :  { %p914_p11 = por %p913_p10, %p912_p9 }
 0x24d   :  { %p915_p12 = pnand %p914_p11, %p908_p8 }
 0x310   :  { %v568_v54 = vpop.f32.mrb[2].mxu1 }
 0x311   :  { %v569_v55 = vadd.f32 %v604_v53, %v568_v54  ;;  %v691_v56 = vpop.f32.mrb[3].mxu1 }
 0x313   :  { %573 = vst.msk [vmem:[#allocation4] sm:$0x3] %vm572_vm1, %v569_v55 }
 0x314   :  { %918 = shalt.err (!%p915_p12)
}
 0x315   :  { %s919_s25 = scalar_lea.hbm %s1598_s10, 32 }
 0x316   :  { %p920_p13 = scmp.ne.s32.totalorder %s1598_s10, %s919_s25  ;;  %p923_p0 = scmp.lt.u32.totalorder %s919_s25, %s1598_s10 }
 0x318   :  { %p925_p1 = pnand %p923_p0, %p920_p13 }
 0x31a   :  { %928 = shalt.err (!%p925_p1)
}
 0x31b   :  { %593 = dma.vmem_to_hbm [thread:$0]  %s591_s23, 32, %s1598_s10, [#allocation5]  }
 0x31c   :  { %929 = dma.done.wait [#allocation3], 32  }
 0x31d   :  { %930 = vsyncadd [#allocation3], 4294967264 }
 0x31e   :  { %931 = dma.done.wait [#allocation5], 32  }
 0x31f   :  { %932 = vsyncadd [#allocation5], 4294967264 }
 0x320   :  { %600 = vsyncpa [#allocation3], 1 }
 0x321   :  { %601 = vsyncpa [#allocation5], 1 }

// kernel: mlp_forward.2
= control target key start
LH: loop header
LB: loop body
LE: loop exit
PB: predicated region body
PF: predicated region fallthrough
CT: control target
= control target key end

     0   :  { %s13165_s0 = inlined_call_operand.vmem [shape: bf16[2,122880], index: 0, kind: input, shape index: {}]   ;;  %s13166_s1 = inlined_call_operand.hbm [shape: bf16[122880,512], index: 1, kind: input, shape index: {}]   ;;  %s13167_s2 = inlined_call_operand.hbm [shape: f32[1,512], index: 2, kind: input, shape index: {}]   ;;  %s13168_s3 = inlined_call_operand.hbm [shape: f32[1,512], index: 3, kind: input, shape index: {}]   ;;  %s13169_s4 = inlined_call_operand.vmem [shape: f32[2,512], index: 4, kind: output, shape index: {}]  }
   0x1   :  { %13178 = sst [smem:[#allocation15_spill]] %s13166_s1 }
   0x2   :  { %13179 = sst [smem:[#allocation16_spill]] %s13167_s2 }
   0x3   :  { %13180 = sst [smem:[#allocation17_spill]] %s13169_s4 }
   0x4   :  { %9 = vsyncpa [#allocation3], 0 }
   0x5   :  { %11 = vsyncpa [#allocation3 + $0x1], 0 }
   0x6   :  { %12 = vsyncpa [#allocation5], 0 }
   0x7   :  { %14 = vsyncpa [#allocation5 + $0x1], 0  ;;  %s11514_s15 = smov 0   ;;  %s11516_s16 = smov 0  }
   0x8   :  { %s11518_s17 = smov 0   ;;  %s11520_s18 = smov 0  }
   0x9   :  { %s11522_s19 = smov 0   ;;  %s11524_s20 = smov 0  }
   0xa   :  { %s11526_s21 = smov 0   ;;  %s11528_s22 = smov 0  }
   0xb   :  { %s11530_s23 = smov 0   ;;  %s11532_s24 = smov 0  }
   0xc   :  { %s11534_s25 = smov 0  }
   0xd LB: > { %13181 = sst [smem:[#allocation9_spill]] %s11446_s17  ;;  %s13170_s26 = sadd.s32 4294967295, %s11478_s25   ;;  %s11478_s25 = sphi %s11534_s25, %s20_s25   ;;  %s11474_s24 = sphi %s11532_s24, %s13210_s24   ;;  %s11470_s23 = sphi %s11530_s23, %s13218_s23   ;;  %s11466_s22 = sphi %s11528_s22, %s13217_s22   ;;  %s11462_s21 = sphi %s11526_s21, %s13216_s21   ;;  %s11458_s20 = sphi %s11524_s20, %s13215_s20   ;;  %s11454_s19 = sphi %s11522_s19, %s13214_s19   ;;  %s11450_s18 = sphi %s11520_s18, %s13213_s18   ;;  %s11446_s17 = sphi %s11518_s17, %s13206_s17   ;;  %s11442_s16 = sphi %s11516_s16, %s13212_s16   ;;  %s11438_s15 = sphi %s11514_s15, %s13211_s15  }
   0xe   : > { %13182 = sst [smem:[#allocation10_spill]] %s11474_s24  ;;  %s29_s27 = sadd.s32 1, %s11470_s23 }
   0xf   : > { %p30_p0 = scmp.ge.s32.totalorder %s29_s27, 15  ;;  %s32_s28 = sadd.s32 1, %s11474_s24 }
  0x10   : > { %s67_s29 = sadd.s32 1, %s11458_s20  ;;  %p74_p1 = scmp.ne.s32.totalorder %s11458_s20, %s11454_s19 }
  0x11   : > { %s13220_s27 = smov (%p30_p0, %s29_s27), 0  ;;  %s13222_s28 = smov (!%p30_p0, %s32_s28), %s11474_s24 }
  0x12   : > { %13183 = sst [smem:[#allocation11_spill]] %s13220_s27  ;;  %s62_s30 = ssub.s32 %s11470_s23, %s13220_s27 }
  0x13   : > { %p75_p2 = scmp.eq.s32.totalorder %s11478_s25, 0  ;;  %p34_p3 = scmp.ge.s32.totalorder %s13222_s28, 2 }
  0x14   : > { %p80_p4 = scmp.ne.s32.totalorder %s11454_s19, %s11450_s18  ;;  %p11588_p6 = scmp.eq.s32.totalorder %s13170_s26, 0 }
  0x15   : > { %p11582_p5 = por %p75_p2, %p74_p1  ;;  %s13224_s28 = smov (%p34_p3, %s13222_s28), 0 }
  0x16   : > { %13186 = sst [smem:[#allocation12_spill]] %s13224_s28  ;;  %p11596_p7 = por %p11588_p6, %p80_p4 }
  0x17   : > { %s93_s8 = sadd.s32 1, %s11446_s17  ;;  %s63_s9 = ssub.s32 %s11474_s24, %s13224_s28 }
  0x18   : > { %s13187_s7 = scalar_select %p11596_p7, 1, 0 }
  0x19   : > { %p100_p8 = scmp.ne.s32.totalorder %s11446_s17, %s11442_s16  ;;  %s64_s10 = sor.u32 %s63_s9, %s62_s30 }
  0x1a   : > { %p91_p9 = scmp.eq.s32.totalorder %s63_s9, 0  ;;  %p65_p10 = scmp.eq.s32.totalorder %s64_s10, 0 }
  0x1b   : > { %p11607_p11 = por %p100_p8, %p75_p2  ;;  %p106_p12 = scmp.ne.s32.totalorder %s11442_s16, %s11438_s15 }
  0x1c   : > { %s11612_s12 = scalar_select %p91_p9, %s11446_s17, %s93_s8  }
  0x1d   : > { %s11615_s13 = scalar_select %p65_p10, %s11458_s20, %s67_s29  }
  0x1e   : > { %13189 = sst [smem:[#allocation13_spill]] %s11612_s12  ;;  %p9651_p13 = scmp.lt.s32.totalorder %s11478_s25, 30 }
  0x1f   : > { %13190 = sst [smem:[#allocation14_spill]] %s11615_s13  ;;  %s214_s14 = sand.u32 1, %s11478_s25  }
  0x20   : > { %p11623_p0 = por %p106_p12, %p11588_p6  ;;  %p11629_p1 = pnand %p9651_p13, %p11582_p5 }
  0x21   : > { %s216_s9 = sand.u32 1, %s11446_s17   ;;  %s9511_s8 = sshll.u32 %s11474_s24, 5 }
  0x22   : > { %s13191_s18 = scalar_select %p11623_p0, 1, 0 }
  0x23   : > { %s11634_s10 = sshll.u32 %s216_s9, 1  ;;  %s13193_s2 = sld [smem:[#allocation16_spill]] }
  0x24   : > { %s218_s6 = scalar_lea.vmem [#allocation4], %s11634_s10  ;;  %p11647_p2 = pnand %p9651_p13, %p11607_p11 }
  0x25   : > { %s226_s5 = sshll.u32 %s218_s6, 4  ;;  %s11654_s26 = scalar_lea.hbm %s13168_s3, %s9511_s8  ;;  %s11643_s5 = int_to_ptr.vmem [resolvable:$true] %s226_s5 }
  0x26   : > { %s11657_s29 = scalar_lea.sflag [#allocation5], %s214_s14  ;;  %p13177_p5 = pneg %p11647_p2 }
  0x29   : > { %s11640_s15 = scalar_lea.hbm %s13193_s2, %s9511_s8  ;;  %s11299_s12 = scalar_lea.hbm %s13193_s2, 64 }
  0x2a   : > { %s11294_s13 = scalar_lea.hbm %s11640_s15, 32  ;;  %p11300_p9 = scmp.lt.u32.totalorder %s11640_s15, %s13193_s2 }
  0x2b   : > { %p11295_p4 = scmp.ne.s32.totalorder %s11640_s15, %s11294_s13  ;;  %p11301_p10 = scmp.lt.u32.totalorder %s11299_s12, %s11294_s13 }
  0x2c   : > { %p11303_p12 = scmp.lt.u32.totalorder %s11294_s13, %s11640_s15 }
  0x2d   : > { %p11297_p6 = pnand %p13177_p5, %p11295_p4  ;;  %p11302_p11 = por %p11301_p10, %p11300_p9 }
  0x2f   : > { %p11298_p8 = pneg %p11297_p6  ;;  %p11304_p13 = por %p11303_p12, %p11302_p11 }
  0x31   : > { %p11305_p3 = pnand %p11304_p13, %p11298_p8 }
  0x33   : > { %11308 = shalt.err (!%p11305_p3)
}
  0x34   : > { %s11309_s14 = scalar_lea.vmem %s11643_s5, 32  ;;  %s11480_s8 = smov [#allocation4]  }
  0x35   : > { %p11310_p4 = scmp.ne.s32.totalorder %s11643_s5, %s11309_s14  ;;  %s11314_s11 = sshll.u32 %s11480_s8, 4  ;;  %s11315_s11 = int_to_ptr.vmem [resolvable:$false] %s11314_s11 }
  0x36   : > { %s11316_s6 = scalar_lea.vmem %s11315_s11, 64  ;;  %p11317_p7 = scmp.lt.s32.totalorder %s11643_s5, %s11315_s11 }
  0x37   : > { %p11312_p6 = pnand %p11310_p4, %p13177_p5  ;;  %p11318_p9 = scmp.lt.s32.totalorder %s11316_s6, %s11309_s14 }
  0x39   : > { %p11313_p0 = pneg %p11312_p6  ;;  %p11319_p10 = por %p11318_p9, %p11317_p7 }
  0x3b   : > { %p11320_p11 = pnand %p11319_p10, %p11313_p0 }
  0x3d   : > { %11323 = shalt.err (!%p11320_p11)
}
  0x3e   : > { %9647 = dma.hbm_to_vmem [thread:$0]  (!%p11647_p2), %s11640_s15, 32, %s11643_s5, %s11657_s29  }
  0x3f   : > { %p250_p3 = scmp.lt.s32.totalorder %s11478_s25, 31  ;;  %p13195_p8 = scmp.ge.s32.totalorder %s11478_s25, 1 }
  0x40   : > { %s190_s13 = sand.u32 1, %s11458_s20   ;;  %s8466_s27 = sshll.u32 %s11474_s24, 1 }
  0x41   : > { %p11688_p12 = pnand %p13195_p8, %p250_p3  ;;  %s8464_s9 = sshll.u32 %s190_s13, 13 }
  0x42   : > { %s9510_s14 = sshll.u32 %s11470_s23, 12  ;;  %s194_s11 = scalar_lea.vmem [#allocation2], %s8464_s9 }
  0x43   : > { %s13196_s12 = scalar_select %p11688_p12, 1, 0 }
  0x44   : > { %s201_s8 = sadd.s32 %s9510_s14, %s8466_s27  ;;  %s204_s6 = sshll.u32 %s194_s11, 4  ;;  %s11695_s6 = int_to_ptr.vmem [resolvable:$true] %s204_s6 }
  0x45   : > { %s8468_s2 = sshll.u32 %s201_s8, 6  ;;  %s13197_s1 = sld [smem:[#allocation15_spill]] }
  0x46   : > { %s11702_s4 = scalar_lea.sflag [#allocation3], %s190_s13  ;;  %p11326_p0 = pneg %p11629_p1 }
  0x4b   : > { %s11700_s5 = scalar_lea.hbm %s13197_s1, %s8468_s2  ;;  %s11329_s17 = scalar_lea.hbm %s13197_s1, 3932160 }
  0x4c   : > { %s11324_s24 = scalar_lea.hbm %s11700_s5, 131072  ;;  %p11330_p6 = scmp.lt.u32.totalorder %s11700_s5, %s13197_s1 }
  0x4d   : > { %p11325_p7 = scmp.ne.s32.totalorder %s11700_s5, %s11324_s24  ;;  %p11331_p9 = scmp.lt.u32.totalorder %s11329_s17, %s11324_s24 }
  0x4e   : > { %p11333_p11 = scmp.lt.u32.totalorder %s11324_s24, %s11700_s5 }
  0x4f   : > { %p11327_p13 = pnand %p11326_p0, %p11325_p7  ;;  %p11332_p10 = por %p11331_p9, %p11330_p6 }
  0x51   : > { %p11328_p4 = pneg %p11327_p13  ;;  %p11334_p3 = por %p11333_p11, %p11332_p10 }
  0x53   : > { %p11335_p8 = pnand %p11334_p3, %p11328_p4 }
  0x55   : > { %11338 = shalt.err (!%p11335_p8)
}
  0x56   : > { %s11339_s13 = scalar_lea.vmem %s11695_s6, 131072  ;;  %s11481_s8 = smov [#allocation2]  }
  0x57   : > { %p11340_p7 = scmp.ne.s32.totalorder %s11695_s6, %s11339_s13  ;;  %s11344_s11 = sshll.u32 %s11481_s8, 4  ;;  %s11345_s11 = int_to_ptr.vmem [resolvable:$false] %s11344_s11 }
  0x58   : > { %s11346_s15 = scalar_lea.vmem %s11345_s11, 262144  ;;  %p11347_p12 = scmp.lt.s32.totalorder %s11695_s6, %s11345_s11 }
  0x59   : > { %p11342_p13 = pnand %p11340_p7, %p11326_p0  ;;  %p11348_p6 = scmp.lt.s32.totalorder %s11346_s15, %s11339_s13 }
  0x5b   : > { %p11343_p5 = pneg %p11342_p13  ;;  %p11349_p9 = por %p11348_p6, %p11347_p12 }
  0x5d   : > { %p11350_p10 = pnand %p11349_p9, %p11343_p5 }
  0x5f   : > { %11353 = shalt.err (!%p11350_p10)
}
  0x60   : > { %s11482_s24 = smov 256   ;;  %s11483_s27 = smov 128  }
  0x61   : > { %s11484_s9 = smov 8   ;;  %s237_s17 = scalar_lea.vmem [#allocation6], %s11634_s10 }
  0x62   : > { %9644 = dma.hbm_to_vmem [thread:$0]  (!%p11629_p1), %s11700_s5, 131072, %s11695_s6, %s11702_s4, %s11482_s24, %s11483_s27, %s11484_s9  }
  0x63   : > { %s245_s2 = sshll.u32 %s237_s17, 4  ;;  %s11354_s14 = scalar_lea.hbm %s11654_s26, 32  ;;  %s246_s2 = int_to_ptr.vmem [resolvable:$true] %s245_s2 }
  0x64   : > { %p11355_p5 = scmp.ne.s32.totalorder %s11654_s26, %s11354_s14  ;;  %p13198_p12 = pneg %p11647_p2 }
  0x65   : > { %s11359_s11 = scalar_lea.hbm %s13168_s3, 64  ;;  %p11360_p11 = scmp.lt.u32.totalorder %s11654_s26, %s13168_s3 }
  0x66   : > { %p11357_p0 = pnand %p11355_p5, %p13198_p12  ;;  %p11361_p3 = scmp.lt.u32.totalorder %s11359_s11, %s11354_s14 }
  0x67   : > { %p11363_p1 = scmp.lt.u32.totalorder %s11354_s14, %s11654_s26 }
  0x68   : > { %p11358_p4 = pneg %p11357_p0  ;;  %p11362_p8 = por %p11361_p3, %p11360_p11 }
  0x6a   : > { %p11364_p7 = por %p11363_p1, %p11362_p8 }
  0x6c   : > { %p11365_p13 = pnand %p11364_p7, %p11358_p4 }
  0x6e   : > { %11368 = shalt.err (!%p11365_p13)
}
  0x6f   : > { %s11369_s4 = scalar_lea.vmem %s246_s2, 32  ;;  %p13199_p9 = pmov %p13198_p12 }
  0x70   : > { %p11370_p6 = scmp.ne.s32.totalorder %s246_s2, %s11369_s4  ;;  %s11485_s30 = smov [#allocation6]  }
  0x71   : > { %s11374_s10 = sshll.u32 %s11485_s30, 4  ;;  %s11375_s10 = int_to_ptr.vmem [resolvable:$false] %s11374_s10 }
  0x72   : > { %p11372_p10 = pnand %p11370_p6, %p13199_p9  ;;  %s11376_s6 = scalar_lea.vmem %s11375_s10, 64 }
  0x73   : > { %p11377_p12 = scmp.lt.s32.totalorder %s246_s2, %s11375_s10  ;;  %p11378_p0 = scmp.lt.s32.totalorder %s11376_s6, %s11369_s4 }
  0x74   : > { %p11373_p5 = pneg %p11372_p10 }
  0x75   : > { %p11379_p3 = por %p11378_p0, %p11377_p12 }
  0x77   : > { %p11380_p11 = pnand %p11379_p3, %p11373_p5 }
  0x79   : > { %11383 = shalt.err (!%p11380_p11)
}
  0x7a   : > { %9650 = dma.hbm_to_vmem [thread:$0]  (!%p11647_p2), %s11654_s26, 32, %s246_s2, %s11657_s29  }
  0x7b   : > { %p13200_p4 = scmp.ne.s32.totalorder %s13196_s12, 0 }
  0x7c   : > { %s256_s1 = sand.u32 (!%p13200_p4), 1, %s11454_s19   ;;  %p13201_p8 = scmp.ne.s32.totalorder (!%p13200_p4), %s13187_s7, 0 }
  0x7d   : > { %254 = sbr.rel (%p13200_p4) target bundleno = 1415 (0x587), region = 36  ;;  %s8476_s5 = sshll.u32 (!%p13200_p4), %s256_s1, 13 }
  0x7e   : > { %s257_s24 = scalar_lea.sflag (!%p13200_p4), [#allocation3], %s256_s1  ;;  %s11754_s27 = scalar_lea.vmem (!%p13200_p4), [#allocation2], %s8476_s5 }
  0x84   : > { %11429 = dma.done.wait (%p13201_p8), %s257_s24, 131072  }
  0x85   : > { %11431 = vsyncadd (%p13201_p8), %s257_s24, 4294836224  ;;  %s13202_s28 = sadd.s32 4294967295, %s11478_s25   ;;  %s267_s29 = sand.u32 1, %s11442_s16  }
  0x86   : > { %s265_s26 = sand.u32 1, %s13202_s28   ;;  %s11763_s12 = sshll.u32 %s267_s29, 1 }
  0x87   : > { %s266_s9 = scalar_lea.sflag [#allocation5], %s265_s26  ;;  %s269_s17 = scalar_lea.vmem [#allocation4], %s11763_s12 }
  0x88   : > { %p13203_p2 = scmp.ne.s32.totalorder %s13191_s18, 0 }
  0x8a   : > { %11433 = dma.done.wait (%p13203_p2), %s266_s9, 64  }
  0x8b   : > { %11435 = vsyncadd (%p13203_p2), %s266_s9, 4294967232  ;;  %s8479_s7 = sshll.u32 %s11462_s21, 6  ;;  %s8480_s2 = sshll.u32 %s11466_s22, 1 }
  0x8c   : > { %p318_p1 = scmp.lt.s32.totalorder %s8479_s7, 959  ;;  %p327_p7 = scmp.lt.s32.totalorder %s8480_s2, 3 }
  0x8d   : > { %s13204_s30 = sld [smem:[#allocation17_spill]]  ;;  %s278_s10 = scalar_lea.vmem [#allocation6], %s11763_s12 }
  0x8e   : > { %s13226_s7 = smov (!%p318_p1, %s8479_s7), 959  ;;  %s13228_s2 = smov (!%p327_p7, %s8480_s2), 3 }
  0x8f   : > { %s11775_s8 = scalar_lea.vmem %s13165_s0, %s13226_s7  ;;  %s8481_s11 = sshll.u32 %s13228_s2, 1 }
  0x90   : > { %p8482_p13 = scmp.ne.s32.totalorder %s11462_s21, 0 }
  0x91   : > { %v11486_v0 = vmov (!%p8482_p13), 0.0  }
  0x92   : > { %335 = sbr.rel (%p8482_p13) target bundleno = 153 (0x99), region = 52 }
  0x93   : > { %s11780_s18 = scalar_lea.vmem %s13204_s30, %s8481_s11 }
  0x94   : > { %336 = vst [vmem:[%s11780_s18] sm:$0xf] (!%p8482_p13), %v11486_v0 }
  0x99 PF: > { %v9746_v1 = vld [vmem:[%s11754_s27 + $0x4] ss:$8 sps:$4 sm:$0xff]   ;;  %v9750_v3 = vld [vmem:[%s11754_s27] ss:$8 sps:$4 sm:$0xff]   ;;  %v9752_v5 = vld [vmem:[%s11754_s27 + $0x14] ss:$8 sps:$4 sm:$0xff]   ;;  %v1382_v39 = vlaneseq }
  0x9a   : > { %v9748_v2 = vld [vmem:[%s11754_s27 + $0x1004] ss:$8 sps:$4 sm:$0xff]   ;;  %6954 = vmatprep.subr.bf16.mxu1 %v9746_v1  ;;  %v9751_v4 = vld [vmem:[%s11754_s27 + $0x1000] ss:$8 sps:$4 sm:$0xff]   ;;  %v9754_v6 = vld [vmem:[%s11754_s27 + $0x1014] ss:$8 sps:$4 sm:$0xff]  }
  0x9b   : > { %7610 = vmatprep.subr.bf16.mxu0 %v9748_v2  ;;  %6955 = vmatpush1.bf16.msra.mxu1 %v9750_v3  ;;  %v9756_v7 = vld [vmem:[%s11754_s27 + $0x10] ss:$8 sps:$4 sm:$0xff]   ;;  %v9758_v9 = vld [vmem:[%s11754_s27 + $0x24] ss:$8 sps:$4 sm:$0xff]   ;;  %v9762_v11 = vld [vmem:[%s11754_s27 + $0x20] ss:$8 sps:$4 sm:$0xff]  }
  0x9c   : > { %7611 = vmatpush1.bf16.msra.mxu0 %v9751_v4  ;;  %6956 = vmatprep.subr.bf16.mxu1 %v9752_v5  ;;  %v9757_v8 = vld [vmem:[%s11754_s27 + $0x1010] ss:$8 sps:$4 sm:$0xff]   ;;  %v9760_v10 = vld [vmem:[%s11754_s27 + $0x1024] ss:$8 sps:$4 sm:$0xff]   ;;  %v9763_v12 = vld [vmem:[%s11754_s27 + $0x1020] ss:$8 sps:$4 sm:$0xff]  }
  0x9d   : > { %7612 = vmatprep.subr.bf16.mxu0 %v9754_v6  ;;  %v9764_v13 = vld [vmem:[%s11754_s27 + $0x34] ss:$8 sps:$4 sm:$0xff]   ;;  %v9768_v15 = vld [vmem:[%s11754_s27 + $0x30] ss:$8 sps:$4 sm:$0xff]   ;;  %v9770_v17 = vld [vmem:[%s11754_s27 + $0x44] ss:$8 sps:$4 sm:$0xff]  }
  0x9e   : > { %v9766_v14 = vld [vmem:[%s11754_s27 + $0x1034] ss:$8 sps:$4 sm:$0xff]   ;;  %v9769_v16 = vld [vmem:[%s11754_s27 + $0x1030] ss:$8 sps:$4 sm:$0xff]   ;;  %v9772_v18 = vld [vmem:[%s11754_s27 + $0x1044] ss:$8 sps:$4 sm:$0xff]  }
  0x9f   : > { %6957 = vmatpush1.bf16.msra.mxu1 %v9756_v7  ;;  %v9774_v19 = vld [vmem:[%s11754_s27 + $0x40] ss:$8 sps:$4 sm:$0xff]   ;;  %v9776_v21 = vld [vmem:[%s11754_s27 + $0x54] ss:$8 sps:$4 sm:$0xff]   ;;  %v9780_v23 = vld [vmem:[%s11754_s27 + $0x50] ss:$8 sps:$4 sm:$0xff]  }
  0xa0   : > { %7613 = vmatpush1.bf16.msra.mxu0 %v9757_v8  ;;  %6958 = vmatprep.subr.bf16.mxu1 %v9758_v9  ;;  %v9775_v20 = vld [vmem:[%s11754_s27 + $0x1040] ss:$8 sps:$4 sm:$0xff]   ;;  %v9778_v22 = vld [vmem:[%s11754_s27 + $0x1054] ss:$8 sps:$4 sm:$0xff]   ;;  %v9781_v24 = vld [vmem:[%s11754_s27 + $0x1050] ss:$8 sps:$4 sm:$0xff]  }
  0xa1   : > { %7614 = vmatprep.subr.bf16.mxu0 %v9760_v10  ;;  %v9782_v25 = vld [vmem:[%s11754_s27 + $0x64] ss:$8 sps:$4 sm:$0xff]   ;;  %v9786_v27 = vld [vmem:[%s11754_s27 + $0x60] ss:$8 sps:$4 sm:$0xff]   ;;  %v9788_v29 = vld [vmem:[%s11754_s27 + $0x74] ss:$8 sps:$4 sm:$0xff]  }
  0xa2   : > { %v9784_v26 = vld [vmem:[%s11754_s27 + $0x1064] ss:$8 sps:$4 sm:$0xff]   ;;  %v9787_v28 = vld [vmem:[%s11754_s27 + $0x1060] ss:$8 sps:$4 sm:$0xff]   ;;  %v9790_v30 = vld [vmem:[%s11754_s27 + $0x1074] ss:$8 sps:$4 sm:$0xff]  }
  0xa3   : > { %6959 = vmatpush1.bf16.msra.mxu1 %v9762_v11  ;;  %v9792_v31 = vld [vmem:[%s11754_s27 + $0x70] ss:$8 sps:$4 sm:$0xff]   ;;  %v9794_v33 = vld [vmem:[%s11754_s27 + $0x84] ss:$8 sps:$4 sm:$0xff]   ;;  %v9798_v35 = vld [vmem:[%s11754_s27 + $0x80] ss:$8 sps:$4 sm:$0xff]  }
  0xa4   : > { %7615 = vmatpush1.bf16.msra.mxu0 %v9763_v12  ;;  %6960 = vmatprep.subr.bf16.mxu1 %v9764_v13  ;;  %v9793_v32 = vld [vmem:[%s11754_s27 + $0x1070] ss:$8 sps:$4 sm:$0xff]   ;;  %v9796_v34 = vld [vmem:[%s11754_s27 + $0x1084] ss:$8 sps:$4 sm:$0xff]   ;;  %v9799_v36 = vld [vmem:[%s11754_s27 + $0x1080] ss:$8 sps:$4 sm:$0xff]  }
  0xa5   : > { %7616 = vmatprep.subr.bf16.mxu0 %v9766_v14  ;;  %v11487_v37 = vmov 1966171168   ;;  %v9800_v40 = vld [vmem:[%s11754_s27 + $0x94] ss:$8 sps:$4 sm:$0xff]   ;;  %v9804_v42 = vld [vmem:[%s11754_s27 + $0x90] ss:$8 sps:$4 sm:$0xff]  }
  0xa6   : > { %v1380_v38 = vunpack.c.l.s4 %v11487_v37  ;;  %v9802_v41 = vld [vmem:[%s11754_s27 + $0x1094] ss:$8 sps:$4 sm:$0xff]   ;;  %v11824_v44 = vshrl.u32 %v1382_v39, 7  ;;  %v9805_v45 = vld [vmem:[%s11754_s27 + $0x1090] ss:$8 sps:$4 sm:$0xff]   ;;  %v11837_v53 = vld [vmem:[%s11775_s8] sm:$0xff] }
  0xa7   : > { %6961 = vmatpush1.bf16.msra.mxu1 %v9768_v15  ;;  %v9806_v46 = vld [vmem:[%s11754_s27 + $0xa4] ss:$8 sps:$4 sm:$0xff]   ;;  %v9810_v48 = vld [vmem:[%s11754_s27 + $0xa0] ss:$8 sps:$4 sm:$0xff]   ;;  %v9812_v51 = vld [vmem:[%s11754_s27 + $0xb4] ss:$8 sps:$4 sm:$0xff]  }
  0xa8   : > { %7617 = vmatpush1.bf16.msra.mxu0 %v9769_v16  ;;  %6962 = vmatprep.subr.bf16.mxu1 %v9770_v17  ;;  %v1381_v43 = vunpack.c.0.s8 %v1380_v38  ;;  %v9808_v47 = vld [vmem:[%s11754_s27 + $0x10a4] ss:$8 sps:$4 sm:$0xff]   ;;  %v9811_v49 = vld [vmem:[%s11754_s27 + $0x10a0] ss:$8 sps:$4 sm:$0xff]   ;;  %v9814_v52 = vld [vmem:[%s11754_s27 + $0x10b4] ss:$8 sps:$4 sm:$0xff]  }
  0xa9   : > { %7618 = vmatprep.subr.bf16.mxu0 %v9772_v18  ;;  %v9816_v54 = vld [vmem:[%s11754_s27 + $0xb0] ss:$8 sps:$4 sm:$0xff]   ;;  %v11844_v57 = vld [vmem:[%s11775_s8 + $0x20] sm:$0xff]  ;;  %v9824_v2 = vld [vmem:[%s11754_s27 + $0xd4] ss:$8 sps:$4 sm:$0xff]   ;;  %p9507_p6 = scmp.ne.s32.totalorder %s11462_s21, 14 }
  0xaa   : > { %v11832_v50 = vsub.s32 %v1381_v43, %v11824_v44  ;;  %v9817_v56 = vld [vmem:[%s11754_s27 + $0x10b0] ss:$8 sps:$4 sm:$0xff]   ;;  %v9818_v58 = vld [vmem:[%s11754_s27 + $0xc4] ss:$8 sps:$4 sm:$0xff]   ;;  %v9822_v0 = vld [vmem:[%s11754_s27 + $0xc0] ss:$8 sps:$4 sm:$0xff]  }
  0xab   : > { %6963 = vmatpush1.bf16.msra.mxu1 %v9774_v19  ;;  %v9820_v59 = vld [vmem:[%s11754_s27 + $0x10c4] ss:$8 sps:$4 sm:$0xff]   ;;  %v9823_v1 = vld [vmem:[%s11754_s27 + $0x10c0] ss:$8 sps:$4 sm:$0xff]   ;;  %v9826_v3 = vld [vmem:[%s11754_s27 + $0x10d4] ss:$8 sps:$4 sm:$0xff]  }
  0xac   : > { %7619 = vmatpush1.bf16.msra.mxu0 %v9775_v20  ;;  %6964 = vmatprep.subr.bf16.mxu1 %v9776_v21  ;;  %v1385_v55 = vrot.slane %v11837_v53, %v11832_v50  ;;  %v1581_v61 = vrot.slane %v11844_v57, %v11832_v50  ;;  %v9828_v5 = vld [vmem:[%s11754_s27 + $0xd0] ss:$8 sps:$4 sm:$0xff]   ;;  %v9830_v7 = vld [vmem:[%s11754_s27 + $0xe4] ss:$8 sps:$4 sm:$0xff]   ;;  %v9834_v9 = vld [vmem:[%s11754_s27 + $0xe0] ss:$8 sps:$4 sm:$0xff]  }
  0xad   : > { %7620 = vmatprep.subr.bf16.mxu0 %v9778_v22  ;;  %v9829_v6 = vld [vmem:[%s11754_s27 + $0x10d0] ss:$8 sps:$4 sm:$0xff]   ;;  %v9832_v8 = vld [vmem:[%s11754_s27 + $0x10e4] ss:$8 sps:$4 sm:$0xff]   ;;  %v9835_v10 = vld [vmem:[%s11754_s27 + $0x10e0] ss:$8 sps:$4 sm:$0xff]  }
  0xae   : > { %v1393_v60 = vcombine.high %v1385_v55, %v1385_v55  ;;  %v1589_v63 = vcombine.high %v1581_v61, %v1581_v61  ;;  %v9836_v11 = vld [vmem:[%s11754_s27 + $0xf4] ss:$8 sps:$4 sm:$0xff]   ;;  %v9840_v13 = vld [vmem:[%s11754_s27 + $0xf0] ss:$8 sps:$4 sm:$0xff]   ;;  %v9845_v15 = vld [vmem:[%s11754_s27 + $0x104] ss:$8 sps:$4 sm:$0xff]   ;;  %v11869_v17 = vrot.slane %v1385_v55, %v11832_v50  ;;  %v11872_v18 = vrot.slane %v1581_v61, %v11832_v50 }
  0xaf   : > { %6965 = vmatpush1.bf16.msra.mxu1 %v9780_v23  ;;  %v9838_v12 = vld [vmem:[%s11754_s27 + $0x10f4] ss:$8 sps:$4 sm:$0xff]   ;;  %v9841_v14 = vld [vmem:[%s11754_s27 + $0x10f0] ss:$8 sps:$4 sm:$0xff]   ;;  %v9849_v16 = vld [vmem:[%s11754_s27 + $0x1104] ss:$8 sps:$4 sm:$0xff]  }
  0xb0   : > { %7621 = vmatpush1.bf16.msra.mxu0 %v9781_v24  ;;  %6966 = vmatprep.subr.bf16.mxu1 %v9782_v25  ;;  %v1415_v62 = vrot.slane %v1393_v60, %v11832_v50  ;;  %v1611_v4 = vrot.slane %v1589_v63, %v11832_v50  ;;  %v9843_v19 = vld [vmem:[%s11754_s27 + $0x100] ss:$8 sps:$4 sm:$0xff]   ;;  %v9852_v21 = vld [vmem:[%s11754_s27 + $0x114] ss:$8 sps:$4 sm:$0xff]   ;;  %v9850_v25 = vld [vmem:[%s11754_s27 + $0x110] ss:$8 sps:$4 sm:$0xff]  }
  0xb1   : > { %7622 = vmatprep.subr.bf16.mxu0 %v9784_v26  ;;  %v9847_v20 = vld [vmem:[%s11754_s27 + $0x1100] ss:$8 sps:$4 sm:$0xff]   ;;  %v9855_v22 = vld [vmem:[%s11754_s27 + $0x1114] ss:$8 sps:$4 sm:$0xff]   ;;  %v9853_v26 = vld [vmem:[%s11754_s27 + $0x1110] ss:$8 sps:$4 sm:$0xff]  }
  0xb2   : > { %6986 = vmatprep.mubr.bf16.mxu1 %v1415_v62  ;;  %7642 = vmatprep.mubr.bf16.mxu0 %v1611_v4  ;;  %v1425_v23 = vcombine.high %v1415_v62, %v1415_v62  ;;  %v1621_v24 = vcombine.high %v1611_v4, %v1611_v4  ;;  %v9868_v37 = vld [vmem:[%s11754_s27 + $0x140] ss:$8 sps:$4 sm:$0xff]   ;;  %v9876_v39 = vld [vmem:[%s11754_s27 + $0x154] ss:$8 sps:$4 sm:$0xff]   ;;  %v9882_v43 = vld [vmem:[%s11754_s27 + $0x164] ss:$8 sps:$4 sm:$0xff]  }
  0xb3   : > { %6967 = vmatpush1.bf16.msra.mxu1 %v9786_v27  ;;  %v9858_v27 = vld [vmem:[%s11754_s27 + $0x124] ss:$8 sps:$4 sm:$0xff]   ;;  %v9871_v38 = vld [vmem:[%s11754_s27 + $0x1140] ss:$8 sps:$4 sm:$0xff]   ;;  %v9903_v60 = vld [vmem:[%s11754_s27 + $0x1194] ss:$8 sps:$4 sm:$0xff]  }
  0xb4   : > { %7623 = vmatpush1.bf16.msra.mxu0 %v9787_v28  ;;  %6968 = vmatprep.subr.bf16.mxu1 %v9788_v29  ;;  %v9861_v28 = vld [vmem:[%s11754_s27 + $0x1124] ss:$8 sps:$4 sm:$0xff]   ;;  %v9856_v29 = vld [vmem:[%s11754_s27 + $0x120] ss:$8 sps:$4 sm:$0xff]   ;;  %v9898_v61 = vld [vmem:[%s11754_s27 + $0x190] ss:$8 sps:$4 sm:$0xff]  }
  0xb5   : > { %7624 = vmatprep.subr.bf16.mxu0 %v9790_v30  ;;  %v9859_v30 = vld [vmem:[%s11754_s27 + $0x1120] ss:$8 sps:$4 sm:$0xff]   ;;  %v9897_v55 = vld [vmem:[%s11754_s27 + $0x1184] ss:$8 sps:$4 sm:$0xff]   ;;  %v9901_v62 = vld [vmem:[%s11754_s27 + $0x1190] ss:$8 sps:$4 sm:$0xff]  }
  0xb6   : > { %v9906_v63 = vld [vmem:[%s11754_s27 + $0x1a4] ss:$8 sps:$4 sm:$0xff]   ;;  %v9915_v4 = vld [vmem:[%s11754_s27 + $0x11b4] ss:$8 sps:$4 sm:$0xff]  }
  0xb7   : > { %6969 = vmatpush1.bf16.msra.mxu1 %v9792_v31  ;;  %v9864_v31 = vld [vmem:[%s11754_s27 + $0x134] ss:$8 sps:$4 sm:$0xff]  }
  0xb8   : > { %7625 = vmatpush1.bf16.msra.mxu0 %v9793_v32  ;;  %6970 = vmatprep.subr.bf16.mxu1 %v9794_v33  ;;  %v9867_v32 = vld [vmem:[%s11754_s27 + $0x1134] ss:$8 sps:$4 sm:$0xff]   ;;  %v9862_v33 = vld [vmem:[%s11754_s27 + $0x130] ss:$8 sps:$4 sm:$0xff]  }
  0xb9   : > { %7626 = vmatprep.subr.bf16.mxu0 %v9796_v34  ;;  %v9865_v34 = vld [vmem:[%s11754_s27 + $0x1130] ss:$8 sps:$4 sm:$0xff]  }
  0xbb   : > { %6971 = vmatpush1.bf16.msra.mxu1 %v9798_v35  ;;  %v9870_v35 = vld [vmem:[%s11754_s27 + $0x144] ss:$8 sps:$4 sm:$0xff]  }
  0xbc   : > { %7627 = vmatpush1.bf16.msra.mxu0 %v9799_v36  ;;  %6972 = vmatprep.subr.bf16.mxu1 %v9800_v40  ;;  %v9873_v36 = vld [vmem:[%s11754_s27 + $0x1144] ss:$8 sps:$4 sm:$0xff]   ;;  %v9879_v40 = vld [vmem:[%s11754_s27 + $0x1154] ss:$8 sps:$4 sm:$0xff]  }
  0xbd   : > { %7628 = vmatprep.subr.bf16.mxu0 %v9802_v41  ;;  %v9874_v41 = vld [vmem:[%s11754_s27 + $0x150] ss:$8 sps:$4 sm:$0xff]  }
  0xbf   : > { %6973 = vmatpush1.bf16.msra.mxu1 %v9804_v42  ;;  %v9877_v42 = vld [vmem:[%s11754_s27 + $0x1150] ss:$8 sps:$4 sm:$0xff]  }
  0xc0   : > { %7629 = vmatpush1.bf16.msra.mxu0 %v9805_v45  ;;  %6974 = vmatprep.subr.bf16.mxu1 %v9806_v46  ;;  %v9885_v45 = vld [vmem:[%s11754_s27 + $0x1164] ss:$8 sps:$4 sm:$0xff]   ;;  %v9880_v46 = vld [vmem:[%s11754_s27 + $0x160] ss:$8 sps:$4 sm:$0xff]  }
  0xc1   : > { %7630 = vmatprep.subr.bf16.mxu0 %v9808_v47  ;;  %v9883_v47 = vld [vmem:[%s11754_s27 + $0x1160] ss:$8 sps:$4 sm:$0xff]  }
  0xc3   : > { %6975 = vmatpush1.bf16.msra.mxu1 %v9810_v48  ;;  %v9888_v48 = vld [vmem:[%s11754_s27 + $0x174] ss:$8 sps:$4 sm:$0xff]  }
  0xc4   : > { %7631 = vmatpush1.bf16.msra.mxu0 %v9811_v49  ;;  %6976 = vmatprep.subr.bf16.mxu1 %v9812_v51  ;;  %v9891_v49 = vld [vmem:[%s11754_s27 + $0x1174] ss:$8 sps:$4 sm:$0xff]   ;;  %v9886_v51 = vld [vmem:[%s11754_s27 + $0x170] ss:$8 sps:$4 sm:$0xff]  }
  0xc5   : > { %7632 = vmatprep.subr.bf16.mxu0 %v9814_v52  ;;  %v9889_v52 = vld [vmem:[%s11754_s27 + $0x1170] ss:$8 sps:$4 sm:$0xff]  }
  0xc7   : > { %6977 = vmatpush1.bf16.msra.mxu1 %v9816_v54  ;;  %v9894_v54 = vld [vmem:[%s11754_s27 + $0x184] ss:$8 sps:$4 sm:$0xff]  }
  0xc8   : > { %7633 = vmatpush1.bf16.msra.mxu0 %v9817_v56  ;;  %6978 = vmatprep.subr.bf16.mxu1 %v9818_v58  ;;  %v9892_v56 = vld [vmem:[%s11754_s27 + $0x180] ss:$8 sps:$4 sm:$0xff]  }
  0xc9   : > { %7634 = vmatprep.subr.bf16.mxu0 %v9820_v59  ;;  %v9895_v58 = vld [vmem:[%s11754_s27 + $0x1180] ss:$8 sps:$4 sm:$0xff]   ;;  %v9900_v59 = vld [vmem:[%s11754_s27 + $0x194] ss:$8 sps:$4 sm:$0xff]  }
  0xcb   : > { %6979 = vmatpush1.bf16.msra.mxu1 %v9822_v0  ;;  %v9909_v0 = vld [vmem:[%s11754_s27 + $0x11a4] ss:$8 sps:$4 sm:$0xff]  }
  0xcc   : > { %7635 = vmatpush1.bf16.msra.mxu0 %v9823_v1  ;;  %6980 = vmatprep.subr.bf16.mxu1 %v9824_v2  ;;  %v9904_v1 = vld [vmem:[%s11754_s27 + $0x1a0] ss:$8 sps:$4 sm:$0xff]  }
  0xcd   : > { %7636 = vmatprep.subr.bf16.mxu0 %v9826_v3  ;;  %v9907_v2 = vld [vmem:[%s11754_s27 + $0x11a0] ss:$8 sps:$4 sm:$0xff]   ;;  %v9912_v3 = vld [vmem:[%s11754_s27 + $0x1b4] ss:$8 sps:$4 sm:$0xff]  }
  0xcf   : > { %6981 = vmatpush1.bf16.msra.mxu1 %v9828_v5  ;;  %v9910_v5 = vld [vmem:[%s11754_s27 + $0x1b0] ss:$8 sps:$4 sm:$0xff]  }
  0xd0   : > { %7637 = vmatpush1.bf16.msra.mxu0 %v9829_v6  ;;  %6982 = vmatprep.subr.bf16.mxu1 %v9830_v7  ;;  %v9913_v6 = vld [vmem:[%s11754_s27 + $0x11b0] ss:$8 sps:$4 sm:$0xff]   ;;  %v9918_v7 = vld [vmem:[%s11754_s27 + $0x1c4] ss:$8 sps:$4 sm:$0xff]  }
  0xd1   : > { %7638 = vmatprep.subr.bf16.mxu0 %v9832_v8  ;;  %v9921_v8 = vld [vmem:[%s11754_s27 + $0x11c4] ss:$8 sps:$4 sm:$0xff]  }
  0xd3   : > { %6983 = vmatpush1.bf16.msra.mxu1 %v9834_v9  ;;  %v9916_v9 = vld [vmem:[%s11754_s27 + $0x1c0] ss:$8 sps:$4 sm:$0xff]  }
  0xd4   : > { %7639 = vmatpush1.bf16.msra.mxu0 %v9835_v10  ;;  %6984 = vmatprep.subr.bf16.mxu1 %v9836_v11  ;;  %v9919_v10 = vld [vmem:[%s11754_s27 + $0x11c0] ss:$8 sps:$4 sm:$0xff]   ;;  %v9924_v11 = vld [vmem:[%s11754_s27 + $0x1d4] ss:$8 sps:$4 sm:$0xff]  }
  0xd5   : > { %7640 = vmatprep.subr.bf16.mxu0 %v9838_v12  ;;  %v9927_v12 = vld [vmem:[%s11754_s27 + $0x11d4] ss:$8 sps:$4 sm:$0xff]  }
  0xd7   : > { %6985 = vmatpush1.bf16.msra.mxu1 %v9840_v13  ;;  %v9922_v13 = vld [vmem:[%s11754_s27 + $0x1d0] ss:$8 sps:$4 sm:$0xff]  }
  0xd8   : > { %7641 = vmatpush1.bf16.msra.mxu0 %v9841_v14  ;;  %6995 = vmatprep.subr.bf16.mxu1 %v9845_v15  ;;  %v9925_v14 = vld [vmem:[%s11754_s27 + $0x11d0] ss:$8 sps:$4 sm:$0xff]   ;;  %v9930_v15 = vld [vmem:[%s11754_s27 + $0x1e4] ss:$8 sps:$4 sm:$0xff]  }
  0xd9   : > { %7651 = vmatprep.subr.bf16.mxu0 %v9849_v16  ;;  %v9933_v16 = vld [vmem:[%s11754_s27 + $0x11e4] ss:$8 sps:$4 sm:$0xff]  }
  0xda   : > { %6987 = vmatmul.mubr.bf16.vlgmr.msra.gmra.mrb[0].mxu1 %v11869_v17 }
  0xdb   : > { %7643 = vmatmul.mubr.bf16.vlgmr.msra.gmra.mrb[0].mxu0 %v11872_v18  ;;  %6996 = vmatpush1.bf16.msra.mxu1 %v9843_v19  ;;  %v1378_v19 = vcombine.high %v11837_v53, %v11837_v53  ;;  %v9934_v53 = vld [vmem:[%s11754_s27 + $0x1f0] ss:$8 sps:$4 sm:$0xff]  }
  0xdc   : > { %7652 = vmatpush1.bf16.msra.mxu0 %v9847_v20  ;;  %6997 = vmatprep.subr.bf16.mxu1 %v9852_v21  ;;  %v1574_v20 = vcombine.high %v11844_v57, %v11844_v57  ;;  %v9928_v21 = vld [vmem:[%s11754_s27 + $0x1e0] ss:$8 sps:$4 sm:$0xff]   ;;  %v9937_v57 = vld [vmem:[%s11754_s27 + $0x11f0] ss:$8 sps:$4 sm:$0xff]  }
  0xdd   : > { %7653 = vmatprep.subr.bf16.mxu0 %v9855_v22  ;;  %7027 = vmatprep.mubr.bf16.mxu1 %v1425_v23  ;;  %v9931_v22 = vld [vmem:[%s11754_s27 + $0x11e0] ss:$8 sps:$4 sm:$0xff]   ;;  %v9936_v23 = vld [vmem:[%s11754_s27 + $0x1f4] ss:$8 sps:$4 sm:$0xff]  }
  0xde   : > { %7683 = vmatprep.mubr.bf16.mxu0 %v1621_v24  ;;  %v9939_v24 = vld [vmem:[%s11754_s27 + $0x11f4] ss:$8 sps:$4 sm:$0xff]  }
  0xdf   : > { %6998 = vmatpush1.bf16.msra.mxu1 %v9850_v25  ;;  %v11941_v25 = vrot.slane %v1378_v19, %v11832_v50  ;;  %v10006_v19 = vld [vmem:[%s11754_s27 + $0x2b0] ss:$8 sps:$4 sm:$0xff]  }
  0xe0   : > { %7654 = vmatpush1.bf16.msra.mxu0 %v9853_v26  ;;  %6999 = vmatprep.subr.bf16.mxu1 %v9858_v27  ;;  %v11944_v26 = vrot.slane %v1574_v20, %v11832_v50  ;;  %v9942_v27 = vld [vmem:[%s11754_s27 + $0x204] ss:$8 sps:$4 sm:$0xff]   ;;  %v10009_v20 = vld [vmem:[%s11754_s27 + $0x12b0] ss:$8 sps:$4 sm:$0xff]  }
  0xe1   : > { %7655 = vmatprep.subr.bf16.mxu0 %v9861_v28  ;;  %v9945_v28 = vld [vmem:[%s11754_s27 + $0x1204] ss:$8 sps:$4 sm:$0xff]  }
  0xe3   : > { %7000 = vmatpush1.bf16.msra.mxu1 %v9856_v29  ;;  %v1394_v29 = vcombine.high %v11941_v25, %v11941_v25 }
  0xe4   : > { %7656 = vmatpush1.bf16.msra.mxu0 %v9859_v30  ;;  %7001 = vmatprep.subr.bf16.mxu1 %v9864_v31  ;;  %v1590_v30 = vcombine.high %v11944_v26, %v11944_v26  ;;  %v1423_v31 = vcombine.high %v11869_v17, %v11869_v17 }
  0xe5   : > { %7657 = vmatprep.subr.bf16.mxu0 %v9867_v32  ;;  %v1619_v32 = vcombine.high %v11872_v18, %v11872_v18  ;;  %v9946_v18 = vld [vmem:[%s11754_s27 + $0x210] ss:$8 sps:$4 sm:$0xff]  }
  0xe6   : > { %v11966_v17 = vrot.slane %v1590_v30, %v11832_v50  ;;  %v10029_v30 = vld [vmem:[%s11754_s27 + $0x12e4] ss:$8 sps:$4 sm:$0xff]  }
  0xe7   : > { %7002 = vmatpush1.bf16.msra.mxu1 %v9862_v33  ;;  %v9940_v33 = vld [vmem:[%s11754_s27 + $0x200] ss:$8 sps:$4 sm:$0xff]  }
  0xe8   : > { %7658 = vmatpush1.bf16.msra.mxu0 %v9865_v34  ;;  %7003 = vmatprep.subr.bf16.mxu1 %v9870_v35  ;;  %v9943_v34 = vld [vmem:[%s11754_s27 + $0x1200] ss:$8 sps:$4 sm:$0xff]   ;;  %v9948_v35 = vld [vmem:[%s11754_s27 + $0x214] ss:$8 sps:$4 sm:$0xff]  }
  0xe9   : > { %7659 = vmatprep.subr.bf16.mxu0 %v9873_v36  ;;  %v9951_v36 = vld [vmem:[%s11754_s27 + $0x1214] ss:$8 sps:$4 sm:$0xff]  }
  0xeb   : > { %7004 = vmatpush1.bf16.msra.mxu1 %v9868_v37  ;;  %v11963_v37 = vrot.slane %v1394_v29, %v11832_v50  ;;  %v10026_v29 = vld [vmem:[%s11754_s27 + $0x2e4] ss:$8 sps:$4 sm:$0xff]  }
  0xec   : > { %7660 = vmatpush1.bf16.msra.mxu0 %v9871_v38  ;;  %7005 = vmatprep.subr.bf16.mxu1 %v9876_v39  ;;  %v9949_v38 = vld [vmem:[%s11754_s27 + $0x1210] ss:$8 sps:$4 sm:$0xff]   ;;  %v9954_v39 = vld [vmem:[%s11754_s27 + $0x224] ss:$8 sps:$4 sm:$0xff]  }
  0xed   : > { %7661 = vmatprep.subr.bf16.mxu0 %v9879_v40  ;;  %v9957_v40 = vld [vmem:[%s11754_s27 + $0x1224] ss:$8 sps:$4 sm:$0xff]  }
  0xef   : > { %7006 = vmatpush1.bf16.msra.mxu1 %v9874_v41  ;;  %v9952_v41 = vld [vmem:[%s11754_s27 + $0x220] ss:$8 sps:$4 sm:$0xff]  }
  0xf0   : > { %7662 = vmatpush1.bf16.msra.mxu0 %v9877_v42  ;;  %7007 = vmatprep.subr.bf16.mxu1 %v9882_v43  ;;  %v9955_v42 = vld [vmem:[%s11754_s27 + $0x1220] ss:$8 sps:$4 sm:$0xff]   ;;  %v9960_v43 = vld [vmem:[%s11754_s27 + $0x234] ss:$8 sps:$4 sm:$0xff]  }
  0xf1   : > { %7663 = vmatprep.subr.bf16.mxu0 %v9885_v45  ;;  %v9963_v45 = vld [vmem:[%s11754_s27 + $0x1234] ss:$8 sps:$4 sm:$0xff]  }
  0xf3   : > { %7008 = vmatpush1.bf16.msra.mxu1 %v9880_v46  ;;  %v9958_v46 = vld [vmem:[%s11754_s27 + $0x230] ss:$8 sps:$4 sm:$0xff]  }
  0xf4   : > { %7664 = vmatpush1.bf16.msra.mxu0 %v9883_v47  ;;  %7009 = vmatprep.subr.bf16.mxu1 %v9888_v48  ;;  %v9961_v47 = vld [vmem:[%s11754_s27 + $0x1230] ss:$8 sps:$4 sm:$0xff]   ;;  %v9966_v48 = vld [vmem:[%s11754_s27 + $0x244] ss:$8 sps:$4 sm:$0xff]  }
  0xf5   : > { %7665 = vmatprep.subr.bf16.mxu0 %v9891_v49  ;;  %v9969_v49 = vld [vmem:[%s11754_s27 + $0x1244] ss:$8 sps:$4 sm:$0xff]  }
  0xf7   : > { %7010 = vmatpush1.bf16.msra.mxu1 %v9886_v51  ;;  %v9964_v51 = vld [vmem:[%s11754_s27 + $0x240] ss:$8 sps:$4 sm:$0xff]  }
  0xf8   : > { %7666 = vmatpush1.bf16.msra.mxu0 %v9889_v52  ;;  %7011 = vmatprep.subr.bf16.mxu1 %v9894_v54  ;;  %v9967_v52 = vld [vmem:[%s11754_s27 + $0x1240] ss:$8 sps:$4 sm:$0xff]   ;;  %v9972_v54 = vld [vmem:[%s11754_s27 + $0x254] ss:$8 sps:$4 sm:$0xff]  }
  0xf9   : > { %7667 = vmatprep.subr.bf16.mxu0 %v9897_v55  ;;  %v9975_v55 = vld [vmem:[%s11754_s27 + $0x1254] ss:$8 sps:$4 sm:$0xff]  }
  0xfb   : > { %7012 = vmatpush1.bf16.msra.mxu1 %v9892_v56  ;;  %v9970_v56 = vld [vmem:[%s11754_s27 + $0x250] ss:$8 sps:$4 sm:$0xff]  }
  0xfc   : > { %7668 = vmatpush1.bf16.msra.mxu0 %v9895_v58  ;;  %7013 = vmatprep.subr.bf16.mxu1 %v9900_v59  ;;  %v9973_v58 = vld [vmem:[%s11754_s27 + $0x1250] ss:$8 sps:$4 sm:$0xff]   ;;  %v9978_v59 = vld [vmem:[%s11754_s27 + $0x264] ss:$8 sps:$4 sm:$0xff]  }
  0xfd   : > { %7669 = vmatprep.subr.bf16.mxu0 %v9903_v60  ;;  %v9981_v60 = vld [vmem:[%s11754_s27 + $0x1264] ss:$8 sps:$4 sm:$0xff]  }
  0xff   : > { %7014 = vmatpush1.bf16.msra.mxu1 %v9898_v61  ;;  %v9976_v61 = vld [vmem:[%s11754_s27 + $0x260] ss:$8 sps:$4 sm:$0xff]  }
 0x100   : > { %7670 = vmatpush1.bf16.msra.mxu0 %v9901_v62  ;;  %7015 = vmatprep.subr.bf16.mxu1 %v9906_v63  ;;  %v9979_v62 = vld [vmem:[%s11754_s27 + $0x1260] ss:$8 sps:$4 sm:$0xff]   ;;  %v9984_v63 = vld [vmem:[%s11754_s27 + $0x274] ss:$8 sps:$4 sm:$0xff]  }
 0x101   : > { %7671 = vmatprep.subr.bf16.mxu0 %v9909_v0  ;;  %v9987_v0 = vld [vmem:[%s11754_s27 + $0x1274] ss:$8 sps:$4 sm:$0xff]  }
 0x103   : > { %7016 = vmatpush1.bf16.msra.mxu1 %v9904_v1  ;;  %v9982_v1 = vld [vmem:[%s11754_s27 + $0x270] ss:$8 sps:$4 sm:$0xff]  }
 0x104   : > { %7672 = vmatpush1.bf16.msra.mxu0 %v9907_v2  ;;  %7017 = vmatprep.subr.bf16.mxu1 %v9912_v3  ;;  %v9985_v2 = vld [vmem:[%s11754_s27 + $0x1270] ss:$8 sps:$4 sm:$0xff]   ;;  %v9990_v3 = vld [vmem:[%s11754_s27 + $0x284] ss:$8 sps:$4 sm:$0xff]  }
 0x105   : > { %7673 = vmatprep.subr.bf16.mxu0 %v9915_v4  ;;  %v9993_v4 = vld [vmem:[%s11754_s27 + $0x1284] ss:$8 sps:$4 sm:$0xff]  }
 0x107   : > { %7018 = vmatpush1.bf16.msra.mxu1 %v9910_v5  ;;  %v9988_v5 = vld [vmem:[%s11754_s27 + $0x280] ss:$8 sps:$4 sm:$0xff]  }
 0x108   : > { %7674 = vmatpush1.bf16.msra.mxu0 %v9913_v6  ;;  %7019 = vmatprep.subr.bf16.mxu1 %v9918_v7  ;;  %v9991_v6 = vld [vmem:[%s11754_s27 + $0x1280] ss:$8 sps:$4 sm:$0xff]   ;;  %v9996_v7 = vld [vmem:[%s11754_s27 + $0x294] ss:$8 sps:$4 sm:$0xff]  }
 0x109   : > { %7675 = vmatprep.subr.bf16.mxu0 %v9921_v8  ;;  %v9999_v8 = vld [vmem:[%s11754_s27 + $0x1294] ss:$8 sps:$4 sm:$0xff]  }
 0x10b   : > { %7020 = vmatpush1.bf16.msra.mxu1 %v9916_v9  ;;  %v9994_v9 = vld [vmem:[%s11754_s27 + $0x290] ss:$8 sps:$4 sm:$0xff]  }
 0x10c   : > { %7676 = vmatpush1.bf16.msra.mxu0 %v9919_v10  ;;  %7021 = vmatprep.subr.bf16.mxu1 %v9924_v11  ;;  %v9997_v10 = vld [vmem:[%s11754_s27 + $0x1290] ss:$8 sps:$4 sm:$0xff]   ;;  %v10002_v11 = vld [vmem:[%s11754_s27 + $0x2a4] ss:$8 sps:$4 sm:$0xff]  }
 0x10d   : > { %7677 = vmatprep.subr.bf16.mxu0 %v9927_v12  ;;  %v10005_v12 = vld [vmem:[%s11754_s27 + $0x12a4] ss:$8 sps:$4 sm:$0xff]  }
 0x10f   : > { %7022 = vmatpush1.bf16.msra.mxu1 %v9922_v13  ;;  %v10000_v13 = vld [vmem:[%s11754_s27 + $0x2a0] ss:$8 sps:$4 sm:$0xff]  }
 0x110   : > { %7678 = vmatpush1.bf16.msra.mxu0 %v9925_v14  ;;  %7023 = vmatprep.subr.bf16.mxu1 %v9930_v15  ;;  %v10003_v14 = vld [vmem:[%s11754_s27 + $0x12a0] ss:$8 sps:$4 sm:$0xff]   ;;  %v10008_v15 = vld [vmem:[%s11754_s27 + $0x2b4] ss:$8 sps:$4 sm:$0xff]  }
 0x111   : > { %7679 = vmatprep.subr.bf16.mxu0 %v9933_v16  ;;  %v10011_v16 = vld [vmem:[%s11754_s27 + $0x12b4] ss:$8 sps:$4 sm:$0xff]  }
 0x113   : > { %7024 = vmatpush1.bf16.msra.mxu1 %v9928_v21  ;;  %v10014_v21 = vld [vmem:[%s11754_s27 + $0x2c4] ss:$8 sps:$4 sm:$0xff]  }
 0x114   : > { %7680 = vmatpush1.bf16.msra.mxu0 %v9931_v22  ;;  %7025 = vmatprep.subr.bf16.mxu1 %v9936_v23  ;;  %v10017_v22 = vld [vmem:[%s11754_s27 + $0x12c4] ss:$8 sps:$4 sm:$0xff]   ;;  %v10012_v23 = vld [vmem:[%s11754_s27 + $0x2c0] ss:$8 sps:$4 sm:$0xff]  }
 0x115   : > { %7681 = vmatprep.subr.bf16.mxu0 %v9939_v24  ;;  %v10015_v24 = vld [vmem:[%s11754_s27 + $0x12c0] ss:$8 sps:$4 sm:$0xff]  }
 0x117   : > { %7026 = vmatpush1.bf16.msra.mxu1 %v9934_v53  ;;  %v10020_v53 = vld [vmem:[%s11754_s27 + $0x2d4] ss:$8 sps:$4 sm:$0xff]  }
 0x118   : > { %7682 = vmatpush1.bf16.msra.mxu0 %v9937_v57  ;;  %7036 = vmatprep.subr.bf16.mxu1 %v9942_v27  ;;  %v10023_v57 = vld [vmem:[%s11754_s27 + $0x12d4] ss:$8 sps:$4 sm:$0xff]   ;;  %v10018_v27 = vld [vmem:[%s11754_s27 + $0x2d0] ss:$8 sps:$4 sm:$0xff]  }
 0x119   : > { %7692 = vmatprep.subr.bf16.mxu0 %v9945_v28  ;;  %v10021_v28 = vld [vmem:[%s11754_s27 + $0x12d0] ss:$8 sps:$4 sm:$0xff]  }
 0x11a   : > { %7028 = vmatmul.mubr.bf16.vlgmr.msra.gmra.mrb[0].mxu1 %v1423_v31  ;;  %v10024_v31 = vld [vmem:[%s11754_s27 + $0x2e0] ss:$8 sps:$4 sm:$0xff]  }
 0x11b   : > { %7684 = vmatmul.mubr.bf16.vlgmr.msra.gmra.mrb[0].mxu0 %v1619_v32  ;;  %7037 = vmatpush1.bf16.msra.mxu1 %v9940_v33  ;;  %v10027_v32 = vld [vmem:[%s11754_s27 + $0x12e0] ss:$8 sps:$4 sm:$0xff]   ;;  %v10032_v33 = vld [vmem:[%s11754_s27 + $0x2f4] ss:$8 sps:$4 sm:$0xff]  }
 0x11c   : > { %7693 = vmatpush1.bf16.msra.mxu0 %v9943_v34  ;;  %7038 = vmatprep.subr.bf16.mxu1 %v9948_v35  ;;  %v10035_v34 = vld [vmem:[%s11754_s27 + $0x12f4] ss:$8 sps:$4 sm:$0xff]   ;;  %v10030_v35 = vld [vmem:[%s11754_s27 + $0x2f0] ss:$8 sps:$4 sm:$0xff]  }
 0x11d   : > { %7694 = vmatprep.subr.bf16.mxu0 %v9951_v36  ;;  %7068 = vmatprep.mubr.bf16.mxu1 %v11963_v37  ;;  %v10033_v36 = vld [vmem:[%s11754_s27 + $0x12f0] ss:$8 sps:$4 sm:$0xff]  }
 0x11e   : > { %7724 = vmatprep.mubr.bf16.mxu0 %v11966_v17 }
 0x11f   : > { %7039 = vmatpush1.bf16.msra.mxu1 %v9946_v18  ;;  %v10038_v18 = vld [vmem:[%s11754_s27 + $0x304] ss:$8 sps:$4 sm:$0xff]  }
 0x120   : > { %7695 = vmatpush1.bf16.msra.mxu0 %v9949_v38  ;;  %7040 = vmatprep.subr.bf16.mxu1 %v9954_v39  ;;  %v10041_v38 = vld [vmem:[%s11754_s27 + $0x1304] ss:$8 sps:$4 sm:$0xff]   ;;  %v12032_v39 = vrot.slane %v11941_v25, %v11832_v50  ;;  %v1426_v25 = vcombine.high %v11963_v37, %v11963_v37 }
 0x121   : > { %7696 = vmatprep.subr.bf16.mxu0 %v9957_v40  ;;  %v12036_v40 = vrot.slane %v11944_v26, %v11832_v50  ;;  %v10042_v26 = vld [vmem:[%s11754_s27 + $0x310] ss:$8 sps:$4 sm:$0xff]   ;;  %v10050_v37 = vld [vmem:[%s11754_s27 + $0x324] ss:$8 sps:$4 sm:$0xff]  }
 0x123   : > { %7041 = vmatpush1.bf16.msra.mxu1 %v9952_v41  ;;  %v10036_v41 = vld [vmem:[%s11754_s27 + $0x300] ss:$8 sps:$4 sm:$0xff]  }
 0x124   : > { %7697 = vmatpush1.bf16.msra.mxu0 %v9955_v42  ;;  %7042 = vmatprep.subr.bf16.mxu1 %v9960_v43  ;;  %v10039_v42 = vld [vmem:[%s11754_s27 + $0x1300] ss:$8 sps:$4 sm:$0xff]   ;;  %v10044_v43 = vld [vmem:[%s11754_s27 + $0x314] ss:$8 sps:$4 sm:$0xff]  }
 0x125   : > { %7698 = vmatprep.subr.bf16.mxu0 %v9963_v45  ;;  %v10047_v45 = vld [vmem:[%s11754_s27 + $0x1314] ss:$8 sps:$4 sm:$0xff]  }
 0x127   : > { %7043 = vmatpush1.bf16.msra.mxu1 %v9958_v46  ;;  %v1622_v46 = vcombine.high %v11966_v17, %v11966_v17  ;;  %v10048_v17 = vld [vmem:[%s11754_s27 + $0x320] ss:$8 sps:$4 sm:$0xff]  }
 0x128   : > { %7699 = vmatpush1.bf16.msra.mxu0 %v9961_v47  ;;  %7044 = vmatprep.subr.bf16.mxu1 %v9966_v48  ;;  %v10045_v47 = vld [vmem:[%s11754_s27 + $0x1310] ss:$8 sps:$4 sm:$0xff]   ;;  %v10053_v48 = vld [vmem:[%s11754_s27 + $0x1324] ss:$8 sps:$4 sm:$0xff]  }
 0x129   : > { %7700 = vmatprep.subr.bf16.mxu0 %v9969_v49  ;;  %v10051_v49 = vld [vmem:[%s11754_s27 + $0x1320] ss:$8 sps:$4 sm:$0xff]  }
 0x12b   : > { %7045 = vmatpush1.bf16.msra.mxu1 %v9964_v51  ;;  %v10056_v51 = vld [vmem:[%s11754_s27 + $0x334] ss:$8 sps:$4 sm:$0xff]  }
 0x12c   : > { %7701 = vmatpush1.bf16.msra.mxu0 %v9967_v52  ;;  %7046 = vmatprep.subr.bf16.mxu1 %v9972_v54  ;;  %v10059_v52 = vld [vmem:[%s11754_s27 + $0x1334] ss:$8 sps:$4 sm:$0xff]   ;;  %v10054_v54 = vld [vmem:[%s11754_s27 + $0x330] ss:$8 sps:$4 sm:$0xff]  }
 0x12d   : > { %7702 = vmatprep.subr.bf16.mxu0 %v9975_v55  ;;  %v10057_v55 = vld [vmem:[%s11754_s27 + $0x1330] ss:$8 sps:$4 sm:$0xff]  }
 0x12f   : > { %7047 = vmatpush1.bf16.msra.mxu1 %v9970_v56  ;;  %v10062_v56 = vld [vmem:[%s11754_s27 + $0x344] ss:$8 sps:$4 sm:$0xff]  }
 0x130   : > { %7703 = vmatpush1.bf16.msra.mxu0 %v9973_v58  ;;  %7048 = vmatprep.subr.bf16.mxu1 %v9978_v59  ;;  %v10065_v58 = vld [vmem:[%s11754_s27 + $0x1344] ss:$8 sps:$4 sm:$0xff]   ;;  %v10060_v59 = vld [vmem:[%s11754_s27 + $0x340] ss:$8 sps:$4 sm:$0xff]  }
 0x131   : > { %7704 = vmatprep.subr.bf16.mxu0 %v9981_v60  ;;  %v10063_v60 = vld [vmem:[%s11754_s27 + $0x1340] ss:$8 sps:$4 sm:$0xff]  }
 0x133   : > { %7049 = vmatpush1.bf16.msra.mxu1 %v9976_v61  ;;  %v10068_v61 = vld [vmem:[%s11754_s27 + $0x354] ss:$8 sps:$4 sm:$0xff]  }
 0x134   : > { %7705 = vmatpush1.bf16.msra.mxu0 %v9979_v62  ;;  %7050 = vmatprep.subr.bf16.mxu1 %v9984_v63  ;;  %v10071_v62 = vld [vmem:[%s11754_s27 + $0x1354] ss:$8 sps:$4 sm:$0xff]   ;;  %v10066_v63 = vld [vmem:[%s11754_s27 + $0x350] ss:$8 sps:$4 sm:$0xff]  }
 0x135   : > { %7706 = vmatprep.subr.bf16.mxu0 %v9987_v0  ;;  %v10069_v0 = vld [vmem:[%s11754_s27 + $0x1350] ss:$8 sps:$4 sm:$0xff]  }
 0x137   : > { %7051 = vmatpush1.bf16.msra.mxu1 %v9982_v1  ;;  %v10074_v1 = vld [vmem:[%s11754_s27 + $0x364] ss:$8 sps:$4 sm:$0xff]  }
 0x138   : > { %7707 = vmatpush1.bf16.msra.mxu0 %v9985_v2  ;;  %7052 = vmatprep.subr.bf16.mxu1 %v9990_v3  ;;  %v10077_v2 = vld [vmem:[%s11754_s27 + $0x1364] ss:$8 sps:$4 sm:$0xff]   ;;  %v10072_v3 = vld [vmem:[%s11754_s27 + $0x360] ss:$8 sps:$4 sm:$0xff]  }
 0x139   : > { %7708 = vmatprep.subr.bf16.mxu0 %v9993_v4  ;;  %v10075_v4 = vld [vmem:[%s11754_s27 + $0x1360] ss:$8 sps:$4 sm:$0xff]  }
 0x13b   : > { %7053 = vmatpush1.bf16.msra.mxu1 %v9988_v5  ;;  %v10080_v5 = vld [vmem:[%s11754_s27 + $0x374] ss:$8 sps:$4 sm:$0xff]  }
 0x13c   : > { %7709 = vmatpush1.bf16.msra.mxu0 %v9991_v6  ;;  %7054 = vmatprep.subr.bf16.mxu1 %v9996_v7  ;;  %v10083_v6 = vld [vmem:[%s11754_s27 + $0x1374] ss:$8 sps:$4 sm:$0xff]   ;;  %v10078_v7 = vld [vmem:[%s11754_s27 + $0x370] ss:$8 sps:$4 sm:$0xff]  }
 0x13d   : > { %7710 = vmatprep.subr.bf16.mxu0 %v9999_v8  ;;  %v10081_v8 = vld [vmem:[%s11754_s27 + $0x1370] ss:$8 sps:$4 sm:$0xff]  }
 0x13f   : > { %7055 = vmatpush1.bf16.msra.mxu1 %v9994_v9  ;;  %v10086_v9 = vld [vmem:[%s11754_s27 + $0x384] ss:$8 sps:$4 sm:$0xff]  }
 0x140   : > { %7711 = vmatpush1.bf16.msra.mxu0 %v9997_v10  ;;  %7056 = vmatprep.subr.bf16.mxu1 %v10002_v11  ;;  %v10089_v10 = vld [vmem:[%s11754_s27 + $0x1384] ss:$8 sps:$4 sm:$0xff]   ;;  %v10084_v11 = vld [vmem:[%s11754_s27 + $0x380] ss:$8 sps:$4 sm:$0xff]  }
 0x141   : > { %7712 = vmatprep.subr.bf16.mxu0 %v10005_v12  ;;  %v10087_v12 = vld [vmem:[%s11754_s27 + $0x1380] ss:$8 sps:$4 sm:$0xff]  }
 0x143   : > { %7057 = vmatpush1.bf16.msra.mxu1 %v10000_v13  ;;  %v10092_v13 = vld [vmem:[%s11754_s27 + $0x394] ss:$8 sps:$4 sm:$0xff]  }
 0x144   : > { %7713 = vmatpush1.bf16.msra.mxu0 %v10003_v14  ;;  %7058 = vmatprep.subr.bf16.mxu1 %v10008_v15  ;;  %v10095_v14 = vld [vmem:[%s11754_s27 + $0x1394] ss:$8 sps:$4 sm:$0xff]   ;;  %v10090_v15 = vld [vmem:[%s11754_s27 + $0x390] ss:$8 sps:$4 sm:$0xff]  }
 0x145   : > { %7714 = vmatprep.subr.bf16.mxu0 %v10011_v16  ;;  %v10093_v16 = vld [vmem:[%s11754_s27 + $0x1390] ss:$8 sps:$4 sm:$0xff]  }
 0x147   : > { %7059 = vmatpush1.bf16.msra.mxu1 %v10006_v19  ;;  %v10098_v19 = vld [vmem:[%s11754_s27 + $0x3a4] ss:$8 sps:$4 sm:$0xff]  }
 0x148   : > { %7715 = vmatpush1.bf16.msra.mxu0 %v10009_v20  ;;  %7060 = vmatprep.subr.bf16.mxu1 %v10014_v21  ;;  %v10101_v20 = vld [vmem:[%s11754_s27 + $0x13a4] ss:$8 sps:$4 sm:$0xff]   ;;  %v10096_v21 = vld [vmem:[%s11754_s27 + $0x3a0] ss:$8 sps:$4 sm:$0xff]  }
 0x149   : > { %7716 = vmatprep.subr.bf16.mxu0 %v10017_v22  ;;  %v10099_v22 = vld [vmem:[%s11754_s27 + $0x13a0] ss:$8 sps:$4 sm:$0xff]  }
 0x14b   : > { %7061 = vmatpush1.bf16.msra.mxu1 %v10012_v23  ;;  %v10104_v23 = vld [vmem:[%s11754_s27 + $0x3b4] ss:$8 sps:$4 sm:$0xff]  }
 0x14c   : > { %7717 = vmatpush1.bf16.msra.mxu0 %v10015_v24  ;;  %7062 = vmatprep.subr.bf16.mxu1 %v10020_v53  ;;  %v10107_v24 = vld [vmem:[%s11754_s27 + $0x13b4] ss:$8 sps:$4 sm:$0xff]   ;;  %v10102_v53 = vld [vmem:[%s11754_s27 + $0x3b0] ss:$8 sps:$4 sm:$0xff]  }
 0x14d   : > { %7718 = vmatprep.subr.bf16.mxu0 %v10023_v57  ;;  %v10105_v57 = vld [vmem:[%s11754_s27 + $0x13b0] ss:$8 sps:$4 sm:$0xff]  }
 0x14f   : > { %7063 = vmatpush1.bf16.msra.mxu1 %v10018_v27  ;;  %v10110_v27 = vld [vmem:[%s11754_s27 + $0x3c4] ss:$8 sps:$4 sm:$0xff]  }
 0x150   : > { %7719 = vmatpush1.bf16.msra.mxu0 %v10021_v28  ;;  %7064 = vmatprep.subr.bf16.mxu1 %v10026_v29  ;;  %v10113_v28 = vld [vmem:[%s11754_s27 + $0x13c4] ss:$8 sps:$4 sm:$0xff]   ;;  %v10108_v29 = vld [vmem:[%s11754_s27 + $0x3c0] ss:$8 sps:$4 sm:$0xff]  }
 0x151   : > { %7720 = vmatprep.subr.bf16.mxu0 %v10029_v30  ;;  %v10111_v30 = vld [vmem:[%s11754_s27 + $0x13c0] ss:$8 sps:$4 sm:$0xff]  }
 0x153   : > { %7065 = vmatpush1.bf16.msra.mxu1 %v10024_v31  ;;  %v10116_v31 = vld [vmem:[%s11754_s27 + $0x3d4] ss:$8 sps:$4 sm:$0xff]  }
 0x154   : > { %7721 = vmatpush1.bf16.msra.mxu0 %v10027_v32  ;;  %7066 = vmatprep.subr.bf16.mxu1 %v10032_v33  ;;  %v10119_v32 = vld [vmem:[%s11754_s27 + $0x13d4] ss:$8 sps:$4 sm:$0xff]   ;;  %v10114_v33 = vld [vmem:[%s11754_s27 + $0x3d0] ss:$8 sps:$4 sm:$0xff]  }
 0x155   : > { %7722 = vmatprep.subr.bf16.mxu0 %v10035_v34  ;;  %v10117_v34 = vld [vmem:[%s11754_s27 + $0x13d0] ss:$8 sps:$4 sm:$0xff]  }
 0x157   : > { %7067 = vmatpush1.bf16.msra.mxu1 %v10030_v35  ;;  %v10122_v35 = vld [vmem:[%s11754_s27 + $0x3e4] ss:$8 sps:$4 sm:$0xff]  }
 0x158   : > { %7723 = vmatpush1.bf16.msra.mxu0 %v10033_v36  ;;  %7077 = vmatprep.subr.bf16.mxu1 %v10038_v18  ;;  %v10125_v36 = vld [vmem:[%s11754_s27 + $0x13e4] ss:$8 sps:$4 sm:$0xff]   ;;  %v10120_v18 = vld [vmem:[%s11754_s27 + $0x3e0] ss:$8 sps:$4 sm:$0xff]  }
 0x159   : > { %7733 = vmatprep.subr.bf16.mxu0 %v10041_v38  ;;  %v10123_v38 = vld [vmem:[%s11754_s27 + $0x13e0] ss:$8 sps:$4 sm:$0xff]  }
 0x15a   : > { %7069 = vmatmul.mubr.bf16.vlgmr.msra.gmra.mrb[0].mxu1 %v12032_v39 }
 0x15b   : > { %7725 = vmatmul.mubr.bf16.vlgmr.msra.gmra.mrb[0].mxu0 %v12036_v40  ;;  %7078 = vmatpush1.bf16.msra.mxu1 %v10036_v41  ;;  %v12103_v41 = vld.sshfl [vmem:[%s11775_s8 + $0x8] sm:$0xff pattern:$0x75316420] }
 0x15c   : > { %7734 = vmatpush1.bf16.msra.mxu0 %v10039_v42  ;;  %7079 = vmatprep.subr.bf16.mxu1 %v10044_v43  ;;  %v12106_v42 = vld.sshfl [vmem:[%s11775_s8 + $0x28] sm:$0xff pattern:$0x75316420]  ;;  %v10128_v43 = vld [vmem:[%s11754_s27 + $0x3f4] ss:$8 sps:$4 sm:$0xff]  }
 0x15d   : > { %7735 = vmatprep.subr.bf16.mxu0 %v10047_v45  ;;  %7109 = vmatprep.mubr.bf16.mxu1 %v1426_v25  ;;  %v10131_v45 = vld [vmem:[%s11754_s27 + $0x13f4] ss:$8 sps:$4 sm:$0xff]   ;;  %v10126_v25 = vld [vmem:[%s11754_s27 + $0x3f0] ss:$8 sps:$4 sm:$0xff]  }
 0x15e   : > { %7765 = vmatprep.mubr.bf16.mxu0 %v1622_v46  ;;  %v10129_v46 = vld [vmem:[%s11754_s27 + $0x13f0] ss:$8 sps:$4 sm:$0xff]  }
 0x15f   : > { %7080 = vmatpush1.bf16.msra.mxu1 %v10042_v26  ;;  %v10134_v26 = vld [vmem:[%s11754_s27 + $0x404] ss:$8 sps:$4 sm:$0xff]  }
 0x160   : > { %7736 = vmatpush1.bf16.msra.mxu0 %v10045_v47  ;;  %7081 = vmatprep.subr.bf16.mxu1 %v10050_v37  ;;  %v10137_v47 = vld [vmem:[%s11754_s27 + $0x1404] ss:$8 sps:$4 sm:$0xff]   ;;  %v1442_v37 = vcombine.high %v12103_v41, %v12103_v41 }
 0x161   : > { %7737 = vmatprep.subr.bf16.mxu0 %v10053_v48  ;;  %v1638_v48 = vcombine.high %v12106_v42, %v12106_v42 }
 0x163   : > { %7082 = vmatpush1.bf16.msra.mxu1 %v10048_v17  ;;  %v10132_v17 = vld [vmem:[%s11754_s27 + $0x400] ss:$8 sps:$4 sm:$0xff]  }
 0x164   : > { %7738 = vmatpush1.bf16.msra.mxu0 %v10051_v49  ;;  %7083 = vmatprep.subr.bf16.mxu1 %v10056_v51  ;;  %v10135_v49 = vld [vmem:[%s11754_s27 + $0x1400] ss:$8 sps:$4 sm:$0xff]   ;;  %v1424_v51 = vcombine.high %v12032_v39, %v12032_v39  ;;  %v10138_v39 = vld [vmem:[%s11754_s27 + $0x410] ss:$8 sps:$4 sm:$0xff]  }
 0x165   : > { %7739 = vmatprep.subr.bf16.mxu0 %v10059_v52  ;;  %v1620_v52 = vcombine.high %v12036_v40, %v12036_v40  ;;  %v10141_v40 = vld [vmem:[%s11754_s27 + $0x1410] ss:$8 sps:$4 sm:$0xff]  }
 0x167   : > { %7084 = vmatpush1.bf16.msra.mxu1 %v10054_v54  ;;  %v10140_v54 = vld [vmem:[%s11754_s27 + $0x414] ss:$8 sps:$4 sm:$0xff]  }
 0x168   : > { %7740 = vmatpush1.bf16.msra.mxu0 %v10057_v55  ;;  %7085 = vmatprep.subr.bf16.mxu1 %v10062_v56  ;;  %v10143_v55 = vld [vmem:[%s11754_s27 + $0x1414] ss:$8 sps:$4 sm:$0xff]   ;;  %v12127_v56 = vrot.slane %v1442_v37, %v11832_v50  ;;  %v10218_v37 = vld [vmem:[%s11754_s27 + $0x4e4] ss:$8 sps:$4 sm:$0xff]  }
 0x169   : > { %7741 = vmatprep.subr.bf16.mxu0 %v10065_v58  ;;  %v12130_v58 = vrot.slane %v1638_v48, %v11832_v50  ;;  %v10221_v48 = vld [vmem:[%s11754_s27 + $0x14e4] ss:$8 sps:$4 sm:$0xff]  }
 0x16b   : > { %7086 = vmatpush1.bf16.msra.mxu1 %v10060_v59  ;;  %v10146_v59 = vld [vmem:[%s11754_s27 + $0x424] ss:$8 sps:$4 sm:$0xff]  }
 0x16c   : > { %7742 = vmatpush1.bf16.msra.mxu0 %v10063_v60  ;;  %7087 = vmatprep.subr.bf16.mxu1 %v10068_v61  ;;  %v10149_v60 = vld [vmem:[%s11754_s27 + $0x1424] ss:$8 sps:$4 sm:$0xff]   ;;  %v10144_v61 = vld [vmem:[%s11754_s27 + $0x420] ss:$8 sps:$4 sm:$0xff]  }
 0x16d   : > { %7743 = vmatprep.subr.bf16.mxu0 %v10071_v62  ;;  %v10147_v62 = vld [vmem:[%s11754_s27 + $0x1420] ss:$8 sps:$4 sm:$0xff]  }
 0x16f   : > { %7088 = vmatpush1.bf16.msra.mxu1 %v10066_v63  ;;  %v10152_v63 = vld [vmem:[%s11754_s27 + $0x434] ss:$8 sps:$4 sm:$0xff]  }
 0x170   : > { %7744 = vmatpush1.bf16.msra.mxu0 %v10069_v0  ;;  %7089 = vmatprep.subr.bf16.mxu1 %v10074_v1  ;;  %v10155_v0 = vld [vmem:[%s11754_s27 + $0x1434] ss:$8 sps:$4 sm:$0xff]   ;;  %v10150_v1 = vld [vmem:[%s11754_s27 + $0x430] ss:$8 sps:$4 sm:$0xff]  }
 0x171   : > { %7745 = vmatprep.subr.bf16.mxu0 %v10077_v2  ;;  %v10153_v2 = vld [vmem:[%s11754_s27 + $0x1430] ss:$8 sps:$4 sm:$0xff]  }
 0x173   : > { %7090 = vmatpush1.bf16.msra.mxu1 %v10072_v3  ;;  %v10158_v3 = vld [vmem:[%s11754_s27 + $0x444] ss:$8 sps:$4 sm:$0xff]  }
 0x174   : > { %7746 = vmatpush1.bf16.msra.mxu0 %v10075_v4  ;;  %7091 = vmatprep.subr.bf16.mxu1 %v10080_v5  ;;  %v10161_v4 = vld [vmem:[%s11754_s27 + $0x1444] ss:$8 sps:$4 sm:$0xff]   ;;  %v10156_v5 = vld [vmem:[%s11754_s27 + $0x440] ss:$8 sps:$4 sm:$0xff]  }
 0x175   : > { %7747 = vmatprep.subr.bf16.mxu0 %v10083_v6  ;;  %v10159_v6 = vld [vmem:[%s11754_s27 + $0x1440] ss:$8 sps:$4 sm:$0xff]  }
 0x177   : > { %7092 = vmatpush1.bf16.msra.mxu1 %v10078_v7  ;;  %v10164_v7 = vld [vmem:[%s11754_s27 + $0x454] ss:$8 sps:$4 sm:$0xff]  }
 0x178   : > { %7748 = vmatpush1.bf16.msra.mxu0 %v10081_v8  ;;  %7093 = vmatprep.subr.bf16.mxu1 %v10086_v9  ;;  %v10167_v8 = vld [vmem:[%s11754_s27 + $0x1454] ss:$8 sps:$4 sm:$0xff]   ;;  %v10162_v9 = vld [vmem:[%s11754_s27 + $0x450] ss:$8 sps:$4 sm:$0xff]  }
 0x179   : > { %7749 = vmatprep.subr.bf16.mxu0 %v10089_v10  ;;  %v10165_v10 = vld [vmem:[%s11754_s27 + $0x1450] ss:$8 sps:$4 sm:$0xff]  }
 0x17b   : > { %7094 = vmatpush1.bf16.msra.mxu1 %v10084_v11  ;;  %v10170_v11 = vld [vmem:[%s11754_s27 + $0x464] ss:$8 sps:$4 sm:$0xff]  }
 0x17c   : > { %7750 = vmatpush1.bf16.msra.mxu0 %v10087_v12  ;;  %7095 = vmatprep.subr.bf16.mxu1 %v10092_v13  ;;  %v10173_v12 = vld [vmem:[%s11754_s27 + $0x1464] ss:$8 sps:$4 sm:$0xff]   ;;  %v10168_v13 = vld [vmem:[%s11754_s27 + $0x460] ss:$8 sps:$4 sm:$0xff]  }
 0x17d   : > { %7751 = vmatprep.subr.bf16.mxu0 %v10095_v14  ;;  %v10171_v14 = vld [vmem:[%s11754_s27 + $0x1460] ss:$8 sps:$4 sm:$0xff]  }
 0x17f   : > { %7096 = vmatpush1.bf16.msra.mxu1 %v10090_v15  ;;  %v10176_v15 = vld [vmem:[%s11754_s27 + $0x474] ss:$8 sps:$4 sm:$0xff]  }
 0x180   : > { %7752 = vmatpush1.bf16.msra.mxu0 %v10093_v16  ;;  %7097 = vmatprep.subr.bf16.mxu1 %v10098_v19  ;;  %v10179_v16 = vld [vmem:[%s11754_s27 + $0x1474] ss:$8 sps:$4 sm:$0xff]   ;;  %v10174_v19 = vld [vmem:[%s11754_s27 + $0x470] ss:$8 sps:$4 sm:$0xff]  }
 0x181   : > { %7753 = vmatprep.subr.bf16.mxu0 %v10101_v20  ;;  %v10177_v20 = vld [vmem:[%s11754_s27 + $0x1470] ss:$8 sps:$4 sm:$0xff]  }
 0x183   : > { %7098 = vmatpush1.bf16.msra.mxu1 %v10096_v21  ;;  %v10182_v21 = vld [vmem:[%s11754_s27 + $0x484] ss:$8 sps:$4 sm:$0xff]  }
 0x184   : > { %7754 = vmatpush1.bf16.msra.mxu0 %v10099_v22  ;;  %7099 = vmatprep.subr.bf16.mxu1 %v10104_v23  ;;  %v10185_v22 = vld [vmem:[%s11754_s27 + $0x1484] ss:$8 sps:$4 sm:$0xff]   ;;  %v10180_v23 = vld [vmem:[%s11754_s27 + $0x480] ss:$8 sps:$4 sm:$0xff]  }
 0x185   : > { %7755 = vmatprep.subr.bf16.mxu0 %v10107_v24  ;;  %v10183_v24 = vld [vmem:[%s11754_s27 + $0x1480] ss:$8 sps:$4 sm:$0xff]  }
 0x187   : > { %7100 = vmatpush1.bf16.msra.mxu1 %v10102_v53  ;;  %v10188_v53 = vld [vmem:[%s11754_s27 + $0x494] ss:$8 sps:$4 sm:$0xff]  }
 0x188   : > { %7756 = vmatpush1.bf16.msra.mxu0 %v10105_v57  ;;  %7101 = vmatprep.subr.bf16.mxu1 %v10110_v27  ;;  %v10191_v57 = vld [vmem:[%s11754_s27 + $0x1494] ss:$8 sps:$4 sm:$0xff]   ;;  %v10186_v27 = vld [vmem:[%s11754_s27 + $0x490] ss:$8 sps:$4 sm:$0xff]  }
 0x189   : > { %7757 = vmatprep.subr.bf16.mxu0 %v10113_v28  ;;  %v10189_v28 = vld [vmem:[%s11754_s27 + $0x1490] ss:$8 sps:$4 sm:$0xff]  }
 0x18b   : > { %7102 = vmatpush1.bf16.msra.mxu1 %v10108_v29  ;;  %v10194_v29 = vld [vmem:[%s11754_s27 + $0x4a4] ss:$8 sps:$4 sm:$0xff]  }
 0x18c   : > { %7758 = vmatpush1.bf16.msra.mxu0 %v10111_v30  ;;  %7103 = vmatprep.subr.bf16.mxu1 %v10116_v31  ;;  %v10197_v30 = vld [vmem:[%s11754_s27 + $0x14a4] ss:$8 sps:$4 sm:$0xff]   ;;  %v10192_v31 = vld [vmem:[%s11754_s27 + $0x4a0] ss:$8 sps:$4 sm:$0xff]  }
 0x18d   : > { %7759 = vmatprep.subr.bf16.mxu0 %v10119_v32  ;;  %v10195_v32 = vld [vmem:[%s11754_s27 + $0x14a0] ss:$8 sps:$4 sm:$0xff]  }
 0x18f   : > { %7104 = vmatpush1.bf16.msra.mxu1 %v10114_v33  ;;  %v10200_v33 = vld [vmem:[%s11754_s27 + $0x4b4] ss:$8 sps:$4 sm:$0xff]  }
 0x190   : > { %7760 = vmatpush1.bf16.msra.mxu0 %v10117_v34  ;;  %7105 = vmatprep.subr.bf16.mxu1 %v10122_v35  ;;  %v10203_v34 = vld [vmem:[%s11754_s27 + $0x14b4] ss:$8 sps:$4 sm:$0xff]   ;;  %v10198_v35 = vld [vmem:[%s11754_s27 + $0x4b0] ss:$8 sps:$4 sm:$0xff]  }
 0x191   : > { %7761 = vmatprep.subr.bf16.mxu0 %v10125_v36  ;;  %v10201_v36 = vld [vmem:[%s11754_s27 + $0x14b0] ss:$8 sps:$4 sm:$0xff]  }
 0x193   : > { %7106 = vmatpush1.bf16.msra.mxu1 %v10120_v18  ;;  %v10206_v18 = vld [vmem:[%s11754_s27 + $0x4c4] ss:$8 sps:$4 sm:$0xff]  }
 0x194   : > { %7762 = vmatpush1.bf16.msra.mxu0 %v10123_v38  ;;  %7107 = vmatprep.subr.bf16.mxu1 %v10128_v43  ;;  %v10209_v38 = vld [vmem:[%s11754_s27 + $0x14c4] ss:$8 sps:$4 sm:$0xff]   ;;  %v10204_v43 = vld [vmem:[%s11754_s27 + $0x4c0] ss:$8 sps:$4 sm:$0xff]  }
 0x195   : > { %7763 = vmatprep.subr.bf16.mxu0 %v10131_v45  ;;  %v10207_v45 = vld [vmem:[%s11754_s27 + $0x14c0] ss:$8 sps:$4 sm:$0xff]  }
 0x197   : > { %7108 = vmatpush1.bf16.msra.mxu1 %v10126_v25  ;;  %v10212_v25 = vld [vmem:[%s11754_s27 + $0x4d4] ss:$8 sps:$4 sm:$0xff]  }
 0x198   : > { %7764 = vmatpush1.bf16.msra.mxu0 %v10129_v46  ;;  %7118 = vmatprep.subr.bf16.mxu1 %v10134_v26  ;;  %v10215_v46 = vld [vmem:[%s11754_s27 + $0x14d4] ss:$8 sps:$4 sm:$0xff]   ;;  %v10210_v26 = vld [vmem:[%s11754_s27 + $0x4d0] ss:$8 sps:$4 sm:$0xff]  }
 0x199   : > { %7774 = vmatprep.subr.bf16.mxu0 %v10137_v47  ;;  %v10213_v47 = vld [vmem:[%s11754_s27 + $0x14d0] ss:$8 sps:$4 sm:$0xff]  }
 0x19a   : > { %7110 = vmatmul.mubr.bf16.vlgmr.msra.gmra.mrb[0].mxu1 %v1424_v51  ;;  %v10224_v51 = vld [vmem:[%s11754_s27 + $0x4f4] ss:$8 sps:$4 sm:$0xff]  }
 0x19b   : > { %7766 = vmatmul.mubr.bf16.vlgmr.msra.gmra.mrb[0].mxu0 %v1620_v52  ;;  %7119 = vmatpush1.bf16.msra.mxu1 %v10132_v17  ;;  %v10216_v17 = vld [vmem:[%s11754_s27 + $0x4e0] ss:$8 sps:$4 sm:$0xff]   ;;  %v10227_v52 = vld [vmem:[%s11754_s27 + $0x14f4] ss:$8 sps:$4 sm:$0xff]  }
 0x19c   : > { %7775 = vmatpush1.bf16.msra.mxu0 %v10135_v49  ;;  %7120 = vmatprep.subr.bf16.mxu1 %v10140_v54  ;;  %v10219_v49 = vld [vmem:[%s11754_s27 + $0x14e0] ss:$8 sps:$4 sm:$0xff]   ;;  %v10222_v54 = vld [vmem:[%s11754_s27 + $0x4f0] ss:$8 sps:$4 sm:$0xff]  }
 0x19d   : > { %7776 = vmatprep.subr.bf16.mxu0 %v10143_v55  ;;  %7150 = vmatprep.mubr.bf16.mxu1 %v12127_v56  ;;  %v10225_v55 = vld [vmem:[%s11754_s27 + $0x14f0] ss:$8 sps:$4 sm:$0xff]  }
 0x19e   : > { %7806 = vmatprep.mubr.bf16.mxu0 %v12130_v58 }
 0x19f   : > { %7121 = vmatpush1.bf16.msra.mxu1 %v10138_v39  ;;  %v10230_v39 = vld [vmem:[%s11754_s27 + $0x504] ss:$8 sps:$4 sm:$0xff]  }
 0x1a0   : > { %7777 = vmatpush1.bf16.msra.mxu0 %v10141_v40  ;;  %7122 = vmatprep.subr.bf16.mxu1 %v10146_v59  ;;  %v10233_v40 = vld [vmem:[%s11754_s27 + $0x1504] ss:$8 sps:$4 sm:$0xff]   ;;  %v12196_v59 = vrot.slane %v12103_v41, %v11832_v50  ;;  %v1474_v41 = vcombine.high %v12127_v56, %v12127_v56 }
 0x1a1   : > { %7778 = vmatprep.subr.bf16.mxu0 %v10149_v60  ;;  %v12200_v60 = vrot.slane %v12106_v42, %v11832_v50  ;;  %v10234_v42 = vld [vmem:[%s11754_s27 + $0x510] ss:$8 sps:$4 sm:$0xff]   ;;  %v10242_v56 = vld [vmem:[%s11754_s27 + $0x524] ss:$8 sps:$4 sm:$0xff]  }
 0x1a3   : > { %7123 = vmatpush1.bf16.msra.mxu1 %v10144_v61  ;;  %v10228_v61 = vld [vmem:[%s11754_s27 + $0x500] ss:$8 sps:$4 sm:$0xff]  }
 0x1a4   : > { %7779 = vmatpush1.bf16.msra.mxu0 %v10147_v62  ;;  %7124 = vmatprep.subr.bf16.mxu1 %v10152_v63  ;;  %v10231_v62 = vld [vmem:[%s11754_s27 + $0x1500] ss:$8 sps:$4 sm:$0xff]   ;;  %v10236_v63 = vld [vmem:[%s11754_s27 + $0x514] ss:$8 sps:$4 sm:$0xff]  }
 0x1a5   : > { %7780 = vmatprep.subr.bf16.mxu0 %v10155_v0  ;;  %v10239_v0 = vld [vmem:[%s11754_s27 + $0x1514] ss:$8 sps:$4 sm:$0xff]  }
 0x1a7   : > { %7125 = vmatpush1.bf16.msra.mxu1 %v10150_v1  ;;  %v1670_v1 = vcombine.high %v12130_v58, %v12130_v58  ;;  %v10240_v58 = vld [vmem:[%s11754_s27 + $0x520] ss:$8 sps:$4 sm:$0xff]  }
 0x1a8   : > { %7781 = vmatpush1.bf16.msra.mxu0 %v10153_v2  ;;  %7126 = vmatprep.subr.bf16.mxu1 %v10158_v3  ;;  %v10237_v2 = vld [vmem:[%s11754_s27 + $0x1510] ss:$8 sps:$4 sm:$0xff]   ;;  %v10245_v3 = vld [vmem:[%s11754_s27 + $0x1524] ss:$8 sps:$4 sm:$0xff]  }
 0x1a9   : > { %7782 = vmatprep.subr.bf16.mxu0 %v10161_v4  ;;  %v10243_v4 = vld [vmem:[%s11754_s27 + $0x1520] ss:$8 sps:$4 sm:$0xff]  }
 0x1ab   : > { %7127 = vmatpush1.bf16.msra.mxu1 %v10156_v5  ;;  %v10248_v5 = vld [vmem:[%s11754_s27 + $0x534] ss:$8 sps:$4 sm:$0xff]  }
 0x1ac   : > { %7783 = vmatpush1.bf16.msra.mxu0 %v10159_v6  ;;  %7128 = vmatprep.subr.bf16.mxu1 %v10164_v7  ;;  %v10251_v6 = vld [vmem:[%s11754_s27 + $0x1534] ss:$8 sps:$4 sm:$0xff]   ;;  %v10246_v7 = vld [vmem:[%s11754_s27 + $0x530] ss:$8 sps:$4 sm:$0xff]  }
 0x1ad   : > { %7784 = vmatprep.subr.bf16.mxu0 %v10167_v8  ;;  %v10249_v8 = vld [vmem:[%s11754_s27 + $0x1530] ss:$8 sps:$4 sm:$0xff]  }
 0x1af   : > { %7129 = vmatpush1.bf16.msra.mxu1 %v10162_v9  ;;  %v10254_v9 = vld [vmem:[%s11754_s27 + $0x544] ss:$8 sps:$4 sm:$0xff]  }
 0x1b0   : > { %7785 = vmatpush1.bf16.msra.mxu0 %v10165_v10  ;;  %7130 = vmatprep.subr.bf16.mxu1 %v10170_v11  ;;  %v10257_v10 = vld [vmem:[%s11754_s27 + $0x1544] ss:$8 sps:$4 sm:$0xff]   ;;  %v10252_v11 = vld [vmem:[%s11754_s27 + $0x540] ss:$8 sps:$4 sm:$0xff]  }
 0x1b1   : > { %7786 = vmatprep.subr.bf16.mxu0 %v10173_v12  ;;  %v10255_v12 = vld [vmem:[%s11754_s27 + $0x1540] ss:$8 sps:$4 sm:$0xff]  }
 0x1b3   : > { %7131 = vmatpush1.bf16.msra.mxu1 %v10168_v13  ;;  %v10260_v13 = vld [vmem:[%s11754_s27 + $0x554] ss:$8 sps:$4 sm:$0xff]  }
 0x1b4   : > { %7787 = vmatpush1.bf16.msra.mxu0 %v10171_v14  ;;  %7132 = vmatprep.subr.bf16.mxu1 %v10176_v15  ;;  %v10263_v14 = vld [vmem:[%s11754_s27 + $0x1554] ss:$8 sps:$4 sm:$0xff]   ;;  %v10258_v15 = vld [vmem:[%s11754_s27 + $0x550] ss:$8 sps:$4 sm:$0xff]  }
 0x1b5   : > { %7788 = vmatprep.subr.bf16.mxu0 %v10179_v16  ;;  %v10261_v16 = vld [vmem:[%s11754_s27 + $0x1550] ss:$8 sps:$4 sm:$0xff]  }
 0x1b7   : > { %7133 = vmatpush1.bf16.msra.mxu1 %v10174_v19  ;;  %v10266_v19 = vld [vmem:[%s11754_s27 + $0x564] ss:$8 sps:$4 sm:$0xff]  }
 0x1b8   : > { %7789 = vmatpush1.bf16.msra.mxu0 %v10177_v20  ;;  %7134 = vmatprep.subr.bf16.mxu1 %v10182_v21  ;;  %v10269_v20 = vld [vmem:[%s11754_s27 + $0x1564] ss:$8 sps:$4 sm:$0xff]   ;;  %v10264_v21 = vld [vmem:[%s11754_s27 + $0x560] ss:$8 sps:$4 sm:$0xff]  }
 0x1b9   : > { %7790 = vmatprep.subr.bf16.mxu0 %v10185_v22  ;;  %v10267_v22 = vld [vmem:[%s11754_s27 + $0x1560] ss:$8 sps:$4 sm:$0xff]  }
 0x1bb   : > { %7135 = vmatpush1.bf16.msra.mxu1 %v10180_v23  ;;  %v10272_v23 = vld [vmem:[%s11754_s27 + $0x574] ss:$8 sps:$4 sm:$0xff]  }
 0x1bc   : > { %7791 = vmatpush1.bf16.msra.mxu0 %v10183_v24  ;;  %7136 = vmatprep.subr.bf16.mxu1 %v10188_v53  ;;  %v10275_v24 = vld [vmem:[%s11754_s27 + $0x1574] ss:$8 sps:$4 sm:$0xff]   ;;  %v10270_v53 = vld [vmem:[%s11754_s27 + $0x570] ss:$8 sps:$4 sm:$0xff]  }
 0x1bd   : > { %7792 = vmatprep.subr.bf16.mxu0 %v10191_v57  ;;  %v10273_v57 = vld [vmem:[%s11754_s27 + $0x1570] ss:$8 sps:$4 sm:$0xff]  }
 0x1bf   : > { %7137 = vmatpush1.bf16.msra.mxu1 %v10186_v27  ;;  %v10278_v27 = vld [vmem:[%s11754_s27 + $0x584] ss:$8 sps:$4 sm:$0xff]  }
 0x1c0   : > { %7793 = vmatpush1.bf16.msra.mxu0 %v10189_v28  ;;  %7138 = vmatprep.subr.bf16.mxu1 %v10194_v29  ;;  %v10281_v28 = vld [vmem:[%s11754_s27 + $0x1584] ss:$8 sps:$4 sm:$0xff]   ;;  %v10276_v29 = vld [vmem:[%s11754_s27 + $0x580] ss:$8 sps:$4 sm:$0xff]  }
 0x1c1   : > { %7794 = vmatprep.subr.bf16.mxu0 %v10197_v30  ;;  %v10279_v30 = vld [vmem:[%s11754_s27 + $0x1580] ss:$8 sps:$4 sm:$0xff]  }
 0x1c3   : > { %7139 = vmatpush1.bf16.msra.mxu1 %v10192_v31  ;;  %v10284_v31 = vld [vmem:[%s11754_s27 + $0x594] ss:$8 sps:$4 sm:$0xff]  }
 0x1c4   : > { %7795 = vmatpush1.bf16.msra.mxu0 %v10195_v32  ;;  %7140 = vmatprep.subr.bf16.mxu1 %v10200_v33  ;;  %v10287_v32 = vld [vmem:[%s11754_s27 + $0x1594] ss:$8 sps:$4 sm:$0xff]   ;;  %v10282_v33 = vld [vmem:[%s11754_s27 + $0x590] ss:$8 sps:$4 sm:$0xff]  }
 0x1c5   : > { %7796 = vmatprep.subr.bf16.mxu0 %v10203_v34  ;;  %v10285_v34 = vld [vmem:[%s11754_s27 + $0x1590] ss:$8 sps:$4 sm:$0xff]  }
 0x1c7   : > { %7141 = vmatpush1.bf16.msra.mxu1 %v10198_v35  ;;  %v10290_v35 = vld [vmem:[%s11754_s27 + $0x5a4] ss:$8 sps:$4 sm:$0xff]  }
 0x1c8   : > { %7797 = vmatpush1.bf16.msra.mxu0 %v10201_v36  ;;  %7142 = vmatprep.subr.bf16.mxu1 %v10206_v18  ;;  %v10293_v36 = vld [vmem:[%s11754_s27 + $0x15a4] ss:$8 sps:$4 sm:$0xff]   ;;  %v10288_v18 = vld [vmem:[%s11754_s27 + $0x5a0] ss:$8 sps:$4 sm:$0xff]  }
 0x1c9   : > { %7798 = vmatprep.subr.bf16.mxu0 %v10209_v38  ;;  %v10291_v38 = vld [vmem:[%s11754_s27 + $0x15a0] ss:$8 sps:$4 sm:$0xff]  }
 0x1cb   : > { %7143 = vmatpush1.bf16.msra.mxu1 %v10204_v43  ;;  %v10296_v43 = vld [vmem:[%s11754_s27 + $0x5b4] ss:$8 sps:$4 sm:$0xff]  }
 0x1cc   : > { %7799 = vmatpush1.bf16.msra.mxu0 %v10207_v45  ;;  %7144 = vmatprep.subr.bf16.mxu1 %v10212_v25  ;;  %v10299_v45 = vld [vmem:[%s11754_s27 + $0x15b4] ss:$8 sps:$4 sm:$0xff]   ;;  %v10294_v25 = vld [vmem:[%s11754_s27 + $0x5b0] ss:$8 sps:$4 sm:$0xff]  }
 0x1cd   : > { %7800 = vmatprep.subr.bf16.mxu0 %v10215_v46  ;;  %v10297_v46 = vld [vmem:[%s11754_s27 + $0x15b0] ss:$8 sps:$4 sm:$0xff]  }
 0x1cf   : > { %7145 = vmatpush1.bf16.msra.mxu1 %v10210_v26  ;;  %v10302_v26 = vld [vmem:[%s11754_s27 + $0x5c4] ss:$8 sps:$4 sm:$0xff]  }
 0x1d0   : > { %7801 = vmatpush1.bf16.msra.mxu0 %v10213_v47  ;;  %7146 = vmatprep.subr.bf16.mxu1 %v10218_v37  ;;  %v10305_v47 = vld [vmem:[%s11754_s27 + $0x15c4] ss:$8 sps:$4 sm:$0xff]   ;;  %v10300_v37 = vld [vmem:[%s11754_s27 + $0x5c0] ss:$8 sps:$4 sm:$0xff]  }
 0x1d1   : > { %7802 = vmatprep.subr.bf16.mxu0 %v10221_v48  ;;  %v10303_v48 = vld [vmem:[%s11754_s27 + $0x15c0] ss:$8 sps:$4 sm:$0xff]  }
 0x1d3   : > { %7147 = vmatpush1.bf16.msra.mxu1 %v10216_v17  ;;  %v10308_v17 = vld [vmem:[%s11754_s27 + $0x5d4] ss:$8 sps:$4 sm:$0xff]  }
 0x1d4   : > { %7803 = vmatpush1.bf16.msra.mxu0 %v10219_v49  ;;  %7148 = vmatprep.subr.bf16.mxu1 %v10224_v51  ;;  %v10311_v49 = vld [vmem:[%s11754_s27 + $0x15d4] ss:$8 sps:$4 sm:$0xff]   ;;  %v10306_v51 = vld [vmem:[%s11754_s27 + $0x5d0] ss:$8 sps:$4 sm:$0xff]  }
 0x1d5   : > { %7804 = vmatprep.subr.bf16.mxu0 %v10227_v52  ;;  %v10309_v52 = vld [vmem:[%s11754_s27 + $0x15d0] ss:$8 sps:$4 sm:$0xff]  }
 0x1d7   : > { %7149 = vmatpush1.bf16.msra.mxu1 %v10222_v54  ;;  %v10314_v54 = vld [vmem:[%s11754_s27 + $0x5e4] ss:$8 sps:$4 sm:$0xff]  }
 0x1d8   : > { %7805 = vmatpush1.bf16.msra.mxu0 %v10225_v55  ;;  %7159 = vmatprep.subr.bf16.mxu1 %v10230_v39  ;;  %v10317_v55 = vld [vmem:[%s11754_s27 + $0x15e4] ss:$8 sps:$4 sm:$0xff]  }
 0x1d9   : > { %7815 = vmatprep.subr.bf16.mxu0 %v10233_v40  ;;  %v11290_v39 = vld [vmem:[%s11775_s8 + $0x8] sm:$0xff] }
 0x1da   : > { %7151 = vmatmul.mubr.bf16.vlgmr.msra.gmra.mrb[0].mxu1 %v12196_v59  ;;  %v1427_v40 = vcombine.high %v11290_v39, %v11290_v39  ;;  %v10392_v39 = vld [vmem:[%s11754_s27 + $0x6b4] ss:$8 sps:$4 sm:$0xff]  }
 0x1db   : > { %7807 = vmatmul.mubr.bf16.vlgmr.msra.gmra.mrb[0].mxu0 %v12200_v60  ;;  %7160 = vmatpush1.bf16.msra.mxu1 %v10228_v61  ;;  %v11291_v61 = vld [vmem:[%s11775_s8 + $0x28] sm:$0xff] }
 0x1dc   : > { %7816 = vmatpush1.bf16.msra.mxu0 %v10231_v62  ;;  %7161 = vmatprep.subr.bf16.mxu1 %v10236_v63  ;;  %v1623_v62 = vcombine.high %v11291_v61, %v11291_v61  ;;  %v10312_v63 = vld [vmem:[%s11754_s27 + $0x5e0] ss:$8 sps:$4 sm:$0xff]   ;;  %v10390_v61 = vld [vmem:[%s11754_s27 + $0x6b0] ss:$8 sps:$4 sm:$0xff]  }
 0x1dd   : > { %7817 = vmatprep.subr.bf16.mxu0 %v10239_v0  ;;  %7191 = vmatprep.mubr.bf16.mxu1 %v1474_v41  ;;  %v10315_v0 = vld [vmem:[%s11754_s27 + $0x15e0] ss:$8 sps:$4 sm:$0xff]   ;;  %v10320_v41 = vld [vmem:[%s11754_s27 + $0x5f4] ss:$8 sps:$4 sm:$0xff]  }
 0x1de   : > { %7847 = vmatprep.mubr.bf16.mxu0 %v1670_v1  ;;  %v10323_v1 = vld [vmem:[%s11754_s27 + $0x15f4] ss:$8 sps:$4 sm:$0xff]  }
 0x1df   : > { %7162 = vmatpush1.bf16.msra.mxu1 %v10234_v42  ;;  %v12271_v42 = vrot.slane %v1427_v40, %v11832_v50  ;;  %v10395_v40 = vld [vmem:[%s11754_s27 + $0x16b4] ss:$8 sps:$4 sm:$0xff]  }
 0x1e0   : > { %7818 = vmatpush1.bf16.msra.mxu0 %v10237_v2  ;;  %7163 = vmatprep.subr.bf16.mxu1 %v10242_v56  ;;  %v12274_v2 = vrot.slane %v1623_v62, %v11832_v50  ;;  %v10318_v56 = vld [vmem:[%s11754_s27 + $0x5f0] ss:$8 sps:$4 sm:$0xff]  }
 0x1e1   : > { %7819 = vmatprep.subr.bf16.mxu0 %v10245_v3  ;;  %v10321_v3 = vld [vmem:[%s11754_s27 + $0x15f0] ss:$8 sps:$4 sm:$0xff]  }
 0x1e2   : > { %v10393_v62 = vld [vmem:[%s11754_s27 + $0x16b0] ss:$8 sps:$4 sm:$0xff]  }
 0x1e3   : > { %7164 = vmatpush1.bf16.msra.mxu1 %v10240_v58  ;;  %v10326_v58 = vld [vmem:[%s11754_s27 + $0x604] ss:$8 sps:$4 sm:$0xff]  }
 0x1e4   : > { %7820 = vmatpush1.bf16.msra.mxu0 %v10243_v4  ;;  %7165 = vmatprep.subr.bf16.mxu1 %v10248_v5  ;;  %v10329_v4 = vld [vmem:[%s11754_s27 + $0x1604] ss:$8 sps:$4 sm:$0xff]   ;;  %v1443_v5 = vcombine.high %v12271_v42, %v12271_v42 }
 0x1e5   : > { %7821 = vmatprep.subr.bf16.mxu0 %v10251_v6  ;;  %v1639_v6 = vcombine.high %v12274_v2, %v12274_v2 }
 0x1e7   : > { %7166 = vmatpush1.bf16.msra.mxu1 %v10246_v7  ;;  %v1472_v7 = vcombine.high %v12196_v59, %v12196_v59  ;;  %v12296_v59 = vrot.slane %v1639_v6, %v11832_v50  ;;  %v10413_v6 = vld [vmem:[%s11754_s27 + $0x16e4] ss:$8 sps:$4 sm:$0xff]  }
 0x1e8   : > { %7822 = vmatpush1.bf16.msra.mxu0 %v10249_v8  ;;  %7167 = vmatprep.subr.bf16.mxu1 %v10254_v9  ;;  %v1668_v8 = vcombine.high %v12200_v60, %v12200_v60  ;;  %v10324_v9 = vld [vmem:[%s11754_s27 + $0x600] ss:$8 sps:$4 sm:$0xff]   ;;  %v10330_v60 = vld [vmem:[%s11754_s27 + $0x610] ss:$8 sps:$4 sm:$0xff]  }
 0x1e9   : > { %7823 = vmatprep.subr.bf16.mxu0 %v10257_v10  ;;  %v10327_v10 = vld [vmem:[%s11754_s27 + $0x1600] ss:$8 sps:$4 sm:$0xff]  }
 0x1eb   : > { %7168 = vmatpush1.bf16.msra.mxu1 %v10252_v11  ;;  %v10332_v11 = vld [vmem:[%s11754_s27 + $0x614] ss:$8 sps:$4 sm:$0xff]  }
 0x1ec   : > { %7824 = vmatpush1.bf16.msra.mxu0 %v10255_v12  ;;  %7169 = vmatprep.subr.bf16.mxu1 %v10260_v13  ;;  %v10335_v12 = vld [vmem:[%s11754_s27 + $0x1614] ss:$8 sps:$4 sm:$0xff]   ;;  %v12293_v13 = vrot.slane %v1443_v5, %v11832_v50  ;;  %v10410_v5 = vld [vmem:[%s11754_s27 + $0x6e4] ss:$8 sps:$4 sm:$0xff]  }
 0x1ed   : > { %7825 = vmatprep.subr.bf16.mxu0 %v10263_v14  ;;  %v10333_v14 = vld [vmem:[%s11754_s27 + $0x1610] ss:$8 sps:$4 sm:$0xff]  }
 0x1ef   : > { %7170 = vmatpush1.bf16.msra.mxu1 %v10258_v15  ;;  %v10338_v15 = vld [vmem:[%s11754_s27 + $0x624] ss:$8 sps:$4 sm:$0xff]  }
 0x1f0   : > { %7826 = vmatpush1.bf16.msra.mxu0 %v10261_v16  ;;  %7171 = vmatprep.subr.bf16.mxu1 %v10266_v19  ;;  %v10341_v16 = vld [vmem:[%s11754_s27 + $0x1624] ss:$8 sps:$4 sm:$0xff]   ;;  %v10336_v19 = vld [vmem:[%s11754_s27 + $0x620] ss:$8 sps:$4 sm:$0xff]  }
 0x1f1   : > { %7827 = vmatprep.subr.bf16.mxu0 %v10269_v20  ;;  %v10339_v20 = vld [vmem:[%s11754_s27 + $0x1620] ss:$8 sps:$4 sm:$0xff]  }
 0x1f3   : > { %7172 = vmatpush1.bf16.msra.mxu1 %v10264_v21  ;;  %v10344_v21 = vld [vmem:[%s11754_s27 + $0x634] ss:$8 sps:$4 sm:$0xff]  }
 0x1f4   : > { %7828 = vmatpush1.bf16.msra.mxu0 %v10267_v22  ;;  %7173 = vmatprep.subr.bf16.mxu1 %v10272_v23  ;;  %v10347_v22 = vld [vmem:[%s11754_s27 + $0x1634] ss:$8 sps:$4 sm:$0xff]   ;;  %v10342_v23 = vld [vmem:[%s11754_s27 + $0x630] ss:$8 sps:$4 sm:$0xff]  }
 0x1f5   : > { %7829 = vmatprep.subr.bf16.mxu0 %v10275_v24  ;;  %v10345_v24 = vld [vmem:[%s11754_s27 + $0x1630] ss:$8 sps:$4 sm:$0xff]  }
 0x1f7   : > { %7174 = vmatpush1.bf16.msra.mxu1 %v10270_v53  ;;  %v10350_v53 = vld [vmem:[%s11754_s27 + $0x644] ss:$8 sps:$4 sm:$0xff]  }
 0x1f8   : > { %7830 = vmatpush1.bf16.msra.mxu0 %v10273_v57  ;;  %7175 = vmatprep.subr.bf16.mxu1 %v10278_v27  ;;  %v10353_v57 = vld [vmem:[%s11754_s27 + $0x1644] ss:$8 sps:$4 sm:$0xff]   ;;  %v10348_v27 = vld [vmem:[%s11754_s27 + $0x640] ss:$8 sps:$4 sm:$0xff]  }
 0x1f9   : > { %7831 = vmatprep.subr.bf16.mxu0 %v10281_v28  ;;  %v10351_v28 = vld [vmem:[%s11754_s27 + $0x1640] ss:$8 sps:$4 sm:$0xff]  }
 0x1fb   : > { %7176 = vmatpush1.bf16.msra.mxu1 %v10276_v29  ;;  %v10356_v29 = vld [vmem:[%s11754_s27 + $0x654] ss:$8 sps:$4 sm:$0xff]  }
 0x1fc   : > { %7832 = vmatpush1.bf16.msra.mxu0 %v10279_v30  ;;  %7177 = vmatprep.subr.bf16.mxu1 %v10284_v31  ;;  %v10359_v30 = vld [vmem:[%s11754_s27 + $0x1654] ss:$8 sps:$4 sm:$0xff]   ;;  %v10354_v31 = vld [vmem:[%s11754_s27 + $0x650] ss:$8 sps:$4 sm:$0xff]  }
 0x1fd   : > { %7833 = vmatprep.subr.bf16.mxu0 %v10287_v32  ;;  %v10357_v32 = vld [vmem:[%s11754_s27 + $0x1650] ss:$8 sps:$4 sm:$0xff]  }
 0x1ff   : > { %7178 = vmatpush1.bf16.msra.mxu1 %v10282_v33  ;;  %v10362_v33 = vld [vmem:[%s11754_s27 + $0x664] ss:$8 sps:$4 sm:$0xff]  }
 0x200   : > { %7834 = vmatpush1.bf16.msra.mxu0 %v10285_v34  ;;  %7179 = vmatprep.subr.bf16.mxu1 %v10290_v35  ;;  %v10365_v34 = vld [vmem:[%s11754_s27 + $0x1664] ss:$8 sps:$4 sm:$0xff]   ;;  %v10360_v35 = vld [vmem:[%s11754_s27 + $0x660] ss:$8 sps:$4 sm:$0xff]  }
 0x201   : > { %7835 = vmatprep.subr.bf16.mxu0 %v10293_v36  ;;  %v10363_v36 = vld [vmem:[%s11754_s27 + $0x1660] ss:$8 sps:$4 sm:$0xff]  }
 0x203   : > { %7180 = vmatpush1.bf16.msra.mxu1 %v10288_v18  ;;  %v10368_v18 = vld [vmem:[%s11754_s27 + $0x674] ss:$8 sps:$4 sm:$0xff]  }
 0x204   : > { %7836 = vmatpush1.bf16.msra.mxu0 %v10291_v38  ;;  %7181 = vmatprep.subr.bf16.mxu1 %v10296_v43  ;;  %v10371_v38 = vld [vmem:[%s11754_s27 + $0x1674] ss:$8 sps:$4 sm:$0xff]   ;;  %v10366_v43 = vld [vmem:[%s11754_s27 + $0x670] ss:$8 sps:$4 sm:$0xff]  }
 0x205   : > { %7837 = vmatprep.subr.bf16.mxu0 %v10299_v45  ;;  %v10369_v45 = vld [vmem:[%s11754_s27 + $0x1670] ss:$8 sps:$4 sm:$0xff]  }
 0x207   : > { %7182 = vmatpush1.bf16.msra.mxu1 %v10294_v25  ;;  %v10374_v25 = vld [vmem:[%s11754_s27 + $0x684] ss:$8 sps:$4 sm:$0xff]  }
 0x208   : > { %7838 = vmatpush1.bf16.msra.mxu0 %v10297_v46  ;;  %7183 = vmatprep.subr.bf16.mxu1 %v10302_v26  ;;  %v10377_v46 = vld [vmem:[%s11754_s27 + $0x1684] ss:$8 sps:$4 sm:$0xff]   ;;  %v10372_v26 = vld [vmem:[%s11754_s27 + $0x680] ss:$8 sps:$4 sm:$0xff]  }
 0x209   : > { %7839 = vmatprep.subr.bf16.mxu0 %v10305_v47  ;;  %v10375_v47 = vld [vmem:[%s11754_s27 + $0x1680] ss:$8 sps:$4 sm:$0xff]  }
 0x20b   : > { %7184 = vmatpush1.bf16.msra.mxu1 %v10300_v37  ;;  %v10380_v37 = vld [vmem:[%s11754_s27 + $0x694] ss:$8 sps:$4 sm:$0xff]  }
 0x20c   : > { %7840 = vmatpush1.bf16.msra.mxu0 %v10303_v48  ;;  %7185 = vmatprep.subr.bf16.mxu1 %v10308_v17  ;;  %v10383_v48 = vld [vmem:[%s11754_s27 + $0x1694] ss:$8 sps:$4 sm:$0xff]   ;;  %v10378_v17 = vld [vmem:[%s11754_s27 + $0x690] ss:$8 sps:$4 sm:$0xff]  }
 0x20d   : > { %7841 = vmatprep.subr.bf16.mxu0 %v10311_v49  ;;  %v10381_v49 = vld [vmem:[%s11754_s27 + $0x1690] ss:$8 sps:$4 sm:$0xff]  }
 0x20f   : > { %7186 = vmatpush1.bf16.msra.mxu1 %v10306_v51  ;;  %v10386_v51 = vld [vmem:[%s11754_s27 + $0x6a4] ss:$8 sps:$4 sm:$0xff]  }
 0x210   : > { %7842 = vmatpush1.bf16.msra.mxu0 %v10309_v52  ;;  %7187 = vmatprep.subr.bf16.mxu1 %v10314_v54  ;;  %v10389_v52 = vld [vmem:[%s11754_s27 + $0x16a4] ss:$8 sps:$4 sm:$0xff]   ;;  %v10384_v54 = vld [vmem:[%s11754_s27 + $0x6a0] ss:$8 sps:$4 sm:$0xff]  }
 0x211   : > { %7843 = vmatprep.subr.bf16.mxu0 %v10317_v55  ;;  %v10387_v55 = vld [vmem:[%s11754_s27 + $0x16a0] ss:$8 sps:$4 sm:$0xff]  }
 0x213   : > { %7188 = vmatpush1.bf16.msra.mxu1 %v10312_v63  ;;  %v10398_v63 = vld [vmem:[%s11754_s27 + $0x6c4] ss:$8 sps:$4 sm:$0xff]  }
 0x214   : > { %7844 = vmatpush1.bf16.msra.mxu0 %v10315_v0  ;;  %7189 = vmatprep.subr.bf16.mxu1 %v10320_v41  ;;  %v10401_v0 = vld [vmem:[%s11754_s27 + $0x16c4] ss:$8 sps:$4 sm:$0xff]   ;;  %v10396_v41 = vld [vmem:[%s11754_s27 + $0x6c0] ss:$8 sps:$4 sm:$0xff]  }
 0x215   : > { %7845 = vmatprep.subr.bf16.mxu0 %v10323_v1  ;;  %v10399_v1 = vld [vmem:[%s11754_s27 + $0x16c0] ss:$8 sps:$4 sm:$0xff]  }
 0x217   : > { %7190 = vmatpush1.bf16.msra.mxu1 %v10318_v56  ;;  %v10404_v56 = vld [vmem:[%s11754_s27 + $0x6d4] ss:$8 sps:$4 sm:$0xff]  }
 0x218   : > { %7846 = vmatpush1.bf16.msra.mxu0 %v10321_v3  ;;  %7200 = vmatprep.subr.bf16.mxu1 %v10326_v58  ;;  %v10407_v3 = vld [vmem:[%s11754_s27 + $0x16d4] ss:$8 sps:$4 sm:$0xff]   ;;  %v10402_v58 = vld [vmem:[%s11754_s27 + $0x6d0] ss:$8 sps:$4 sm:$0xff]  }
 0x219   : > { %7856 = vmatprep.subr.bf16.mxu0 %v10329_v4  ;;  %v10405_v4 = vld [vmem:[%s11754_s27 + $0x16d0] ss:$8 sps:$4 sm:$0xff]  }
 0x21a   : > { %7192 = vmatmul.mubr.bf16.vlgmr.msra.gmra.mrb[0].mxu1 %v1472_v7  ;;  %v10408_v7 = vld [vmem:[%s11754_s27 + $0x6e0] ss:$8 sps:$4 sm:$0xff]  }
 0x21b   : > { %7848 = vmatmul.mubr.bf16.vlgmr.msra.gmra.mrb[0].mxu0 %v1668_v8  ;;  %7201 = vmatpush1.bf16.msra.mxu1 %v10324_v9  ;;  %v10411_v8 = vld [vmem:[%s11754_s27 + $0x16e0] ss:$8 sps:$4 sm:$0xff]   ;;  %v10416_v9 = vld [vmem:[%s11754_s27 + $0x6f4] ss:$8 sps:$4 sm:$0xff]  }
 0x21c   : > { %7857 = vmatpush1.bf16.msra.mxu0 %v10327_v10  ;;  %7202 = vmatprep.subr.bf16.mxu1 %v10332_v11  ;;  %v10419_v10 = vld [vmem:[%s11754_s27 + $0x16f4] ss:$8 sps:$4 sm:$0xff]   ;;  %v10414_v11 = vld [vmem:[%s11754_s27 + $0x6f0] ss:$8 sps:$4 sm:$0xff]  }
 0x21d   : > { %7858 = vmatprep.subr.bf16.mxu0 %v10335_v12  ;;  %7232 = vmatprep.mubr.bf16.mxu1 %v12293_v13  ;;  %v10417_v12 = vld [vmem:[%s11754_s27 + $0x16f0] ss:$8 sps:$4 sm:$0xff]  }
 0x21e   : > { %7888 = vmatprep.mubr.bf16.mxu0 %v12296_v59 }
 0x21f   : > { %7203 = vmatpush1.bf16.msra.mxu1 %v10330_v60  ;;  %v10423_v60 = vld [vmem:[%s11754_s27 + $0x704] ss:$8 sps:$4 sm:$0xff]  }
 0x220   : > { %7859 = vmatpush1.bf16.msra.mxu0 %v10333_v14  ;;  %7204 = vmatprep.subr.bf16.mxu1 %v10338_v15  ;;  %v10427_v14 = vld [vmem:[%s11754_s27 + $0x1704] ss:$8 sps:$4 sm:$0xff]   ;;  %v12362_v15 = vrot.slane %v12271_v42, %v11832_v50  ;;  %v1475_v42 = vcombine.high %v12293_v13, %v12293_v13 }
 0x221   : > { %7860 = vmatprep.subr.bf16.mxu0 %v10341_v16  ;;  %v12366_v16 = vrot.slane %v12274_v2, %v11832_v50  ;;  %v10428_v2 = vld [vmem:[%s11754_s27 + $0x710] ss:$8 sps:$4 sm:$0xff]   ;;  %v10436_v13 = vld [vmem:[%s11754_s27 + $0x724] ss:$8 sps:$4 sm:$0xff]  }
 0x223   : > { %7205 = vmatpush1.bf16.msra.mxu1 %v10336_v19  ;;  %v10421_v19 = vld [vmem:[%s11754_s27 + $0x700] ss:$8 sps:$4 sm:$0xff]  }
 0x224   : > { %7861 = vmatpush1.bf16.msra.mxu0 %v10339_v20  ;;  %7206 = vmatprep.subr.bf16.mxu1 %v10344_v21  ;;  %v10425_v20 = vld [vmem:[%s11754_s27 + $0x1700] ss:$8 sps:$4 sm:$0xff]   ;;  %v10430_v21 = vld [vmem:[%s11754_s27 + $0x714] ss:$8 sps:$4 sm:$0xff]  }
 0x225   : > { %7862 = vmatprep.subr.bf16.mxu0 %v10347_v22  ;;  %v10433_v22 = vld [vmem:[%s11754_s27 + $0x1714] ss:$8 sps:$4 sm:$0xff]  }
 0x227   : > { %7207 = vmatpush1.bf16.msra.mxu1 %v10342_v23  ;;  %v1671_v23 = vcombine.high %v12296_v59, %v12296_v59  ;;  %v10434_v59 = vld [vmem:[%s11754_s27 + $0x720] ss:$8 sps:$4 sm:$0xff]  }
 0x228   : > { %7863 = vmatpush1.bf16.msra.mxu0 %v10345_v24  ;;  %7208 = vmatprep.subr.bf16.mxu1 %v10350_v53  ;;  %v10431_v24 = vld [vmem:[%s11754_s27 + $0x1710] ss:$8 sps:$4 sm:$0xff]   ;;  %v10439_v53 = vld [vmem:[%s11754_s27 + $0x1724] ss:$8 sps:$4 sm:$0xff]  }
 0x229   : > { %7864 = vmatprep.subr.bf16.mxu0 %v10353_v57  ;;  %v10437_v57 = vld [vmem:[%s11754_s27 + $0x1720] ss:$8 sps:$4 sm:$0xff]  }
 0x22b   : > { %7209 = vmatpush1.bf16.msra.mxu1 %v10348_v27  ;;  %v10442_v27 = vld [vmem:[%s11754_s27 + $0x734] ss:$8 sps:$4 sm:$0xff]  }
 0x22c   : > { %7865 = vmatpush1.bf16.msra.mxu0 %v10351_v28  ;;  %7210 = vmatprep.subr.bf16.mxu1 %v10356_v29  ;;  %v10445_v28 = vld [vmem:[%s11754_s27 + $0x1734] ss:$8 sps:$4 sm:$0xff]   ;;  %v10440_v29 = vld [vmem:[%s11754_s27 + $0x730] ss:$8 sps:$4 sm:$0xff]  }
 0x22d   : > { %7866 = vmatprep.subr.bf16.mxu0 %v10359_v30  ;;  %v10443_v30 = vld [vmem:[%s11754_s27 + $0x1730] ss:$8 sps:$4 sm:$0xff]  }
 0x22f   : > { %7211 = vmatpush1.bf16.msra.mxu1 %v10354_v31  ;;  %v10448_v31 = vld [vmem:[%s11754_s27 + $0x744] ss:$8 sps:$4 sm:$0xff]  }
 0x230   : > { %7867 = vmatpush1.bf16.msra.mxu0 %v10357_v32  ;;  %7212 = vmatprep.subr.bf16.mxu1 %v10362_v33  ;;  %v10451_v32 = vld [vmem:[%s11754_s27 + $0x1744] ss:$8 sps:$4 sm:$0xff]   ;;  %v10446_v33 = vld [vmem:[%s11754_s27 + $0x740] ss:$8 sps:$4 sm:$0xff]  }
 0x231   : > { %7868 = vmatprep.subr.bf16.mxu0 %v10365_v34  ;;  %v10449_v34 = vld [vmem:[%s11754_s27 + $0x1740] ss:$8 sps:$4 sm:$0xff]  }
 0x233   : > { %7213 = vmatpush1.bf16.msra.mxu1 %v10360_v35  ;;  %v10454_v35 = vld [vmem:[%s11754_s27 + $0x754] ss:$8 sps:$4 sm:$0xff]  }
 0x234   : > { %7869 = vmatpush1.bf16.msra.mxu0 %v10363_v36  ;;  %7214 = vmatprep.subr.bf16.mxu1 %v10368_v18  ;;  %v10457_v36 = vld [vmem:[%s11754_s27 + $0x1754] ss:$8 sps:$4 sm:$0xff]   ;;  %v10452_v18 = vld [vmem:[%s11754_s27 + $0x750] ss:$8 sps:$4 sm:$0xff]  }
 0x235   : > { %7870 = vmatprep.subr.bf16.mxu0 %v10371_v38  ;;  %v10455_v38 = vld [vmem:[%s11754_s27 + $0x1750] ss:$8 sps:$4 sm:$0xff]  }
 0x237   : > { %7215 = vmatpush1.bf16.msra.mxu1 %v10366_v43  ;;  %v10460_v43 = vld [vmem:[%s11754_s27 + $0x764] ss:$8 sps:$4 sm:$0xff]  }
 0x238   : > { %7871 = vmatpush1.bf16.msra.mxu0 %v10369_v45  ;;  %7216 = vmatprep.subr.bf16.mxu1 %v10374_v25  ;;  %v10463_v45 = vld [vmem:[%s11754_s27 + $0x1764] ss:$8 sps:$4 sm:$0xff]   ;;  %v10458_v25 = vld [vmem:[%s11754_s27 + $0x760] ss:$8 sps:$4 sm:$0xff]  }
 0x239   : > { %7872 = vmatprep.subr.bf16.mxu0 %v10377_v46  ;;  %v10461_v46 = vld [vmem:[%s11754_s27 + $0x1760] ss:$8 sps:$4 sm:$0xff]  }
 0x23b   : > { %7217 = vmatpush1.bf16.msra.mxu1 %v10372_v26  ;;  %v10466_v26 = vld [vmem:[%s11754_s27 + $0x774] ss:$8 sps:$4 sm:$0xff]  }
 0x23c   : > { %7873 = vmatpush1.bf16.msra.mxu0 %v10375_v47  ;;  %7218 = vmatprep.subr.bf16.mxu1 %v10380_v37  ;;  %v10469_v47 = vld [vmem:[%s11754_s27 + $0x1774] ss:$8 sps:$4 sm:$0xff]   ;;  %v10464_v37 = vld [vmem:[%s11754_s27 + $0x770] ss:$8 sps:$4 sm:$0xff]  }
 0x23d   : > { %7874 = vmatprep.subr.bf16.mxu0 %v10383_v48  ;;  %v10467_v48 = vld [vmem:[%s11754_s27 + $0x1770] ss:$8 sps:$4 sm:$0xff]  }
 0x23f   : > { %7219 = vmatpush1.bf16.msra.mxu1 %v10378_v17  ;;  %v10472_v17 = vld [vmem:[%s11754_s27 + $0x784] ss:$8 sps:$4 sm:$0xff]  }
 0x240   : > { %7875 = vmatpush1.bf16.msra.mxu0 %v10381_v49  ;;  %7220 = vmatprep.subr.bf16.mxu1 %v10386_v51  ;;  %v10475_v49 = vld [vmem:[%s11754_s27 + $0x1784] ss:$8 sps:$4 sm:$0xff]   ;;  %v10470_v51 = vld [vmem:[%s11754_s27 + $0x780] ss:$8 sps:$4 sm:$0xff]  }
 0x241   : > { %7876 = vmatprep.subr.bf16.mxu0 %v10389_v52  ;;  %v10473_v52 = vld [vmem:[%s11754_s27 + $0x1780] ss:$8 sps:$4 sm:$0xff]  }
 0x243   : > { %7221 = vmatpush1.bf16.msra.mxu1 %v10384_v54  ;;  %v10478_v54 = vld [vmem:[%s11754_s27 + $0x794] ss:$8 sps:$4 sm:$0xff]  }
 0x244   : > { %7877 = vmatpush1.bf16.msra.mxu0 %v10387_v55  ;;  %7222 = vmatprep.subr.bf16.mxu1 %v10392_v39  ;;  %v10481_v55 = vld [vmem:[%s11754_s27 + $0x1794] ss:$8 sps:$4 sm:$0xff]   ;;  %v10476_v39 = vld [vmem:[%s11754_s27 + $0x790] ss:$8 sps:$4 sm:$0xff]  }
 0x245   : > { %7878 = vmatprep.subr.bf16.mxu0 %v10395_v40  ;;  %v10479_v40 = vld [vmem:[%s11754_s27 + $0x1790] ss:$8 sps:$4 sm:$0xff]  }
 0x247   : > { %7223 = vmatpush1.bf16.msra.mxu1 %v10390_v61  ;;  %v10484_v61 = vld [vmem:[%s11754_s27 + $0x7a4] ss:$8 sps:$4 sm:$0xff]  }
 0x248   : > { %7879 = vmatpush1.bf16.msra.mxu0 %v10393_v62  ;;  %7224 = vmatprep.subr.bf16.mxu1 %v10398_v63  ;;  %v10487_v62 = vld [vmem:[%s11754_s27 + $0x17a4] ss:$8 sps:$4 sm:$0xff]   ;;  %v10482_v63 = vld [vmem:[%s11754_s27 + $0x7a0] ss:$8 sps:$4 sm:$0xff]  }
 0x249   : > { %7880 = vmatprep.subr.bf16.mxu0 %v10401_v0  ;;  %v10485_v0 = vld [vmem:[%s11754_s27 + $0x17a0] ss:$8 sps:$4 sm:$0xff]  }
 0x24b   : > { %7225 = vmatpush1.bf16.msra.mxu1 %v10396_v41  ;;  %v10490_v41 = vld [vmem:[%s11754_s27 + $0x7b4] ss:$8 sps:$4 sm:$0xff]  }
 0x24c   : > { %7881 = vmatpush1.bf16.msra.mxu0 %v10399_v1  ;;  %7226 = vmatprep.subr.bf16.mxu1 %v10404_v56  ;;  %v10493_v1 = vld [vmem:[%s11754_s27 + $0x17b4] ss:$8 sps:$4 sm:$0xff]   ;;  %v10488_v56 = vld [vmem:[%s11754_s27 + $0x7b0] ss:$8 sps:$4 sm:$0xff]  }
 0x24d   : > { %7882 = vmatprep.subr.bf16.mxu0 %v10407_v3  ;;  %v10491_v3 = vld [vmem:[%s11754_s27 + $0x17b0] ss:$8 sps:$4 sm:$0xff]  }
 0x24f   : > { %7227 = vmatpush1.bf16.msra.mxu1 %v10402_v58  ;;  %v10496_v58 = vld [vmem:[%s11754_s27 + $0x7c4] ss:$8 sps:$4 sm:$0xff]  }
 0x250   : > { %7883 = vmatpush1.bf16.msra.mxu0 %v10405_v4  ;;  %7228 = vmatprep.subr.bf16.mxu1 %v10410_v5  ;;  %v10499_v4 = vld [vmem:[%s11754_s27 + $0x17c4] ss:$8 sps:$4 sm:$0xff]   ;;  %v10494_v5 = vld [vmem:[%s11754_s27 + $0x7c0] ss:$8 sps:$4 sm:$0xff]  }
 0x251   : > { %7884 = vmatprep.subr.bf16.mxu0 %v10413_v6  ;;  %v10497_v6 = vld [vmem:[%s11754_s27 + $0x17c0] ss:$8 sps:$4 sm:$0xff]  }
 0x253   : > { %7229 = vmatpush1.bf16.msra.mxu1 %v10408_v7  ;;  %v10502_v7 = vld [vmem:[%s11754_s27 + $0x7d4] ss:$8 sps:$4 sm:$0xff]  }
 0x254   : > { %7885 = vmatpush1.bf16.msra.mxu0 %v10411_v8  ;;  %7230 = vmatprep.subr.bf16.mxu1 %v10416_v9  ;;  %v10505_v8 = vld [vmem:[%s11754_s27 + $0x17d4] ss:$8 sps:$4 sm:$0xff]   ;;  %v10500_v9 = vld [vmem:[%s11754_s27 + $0x7d0] ss:$8 sps:$4 sm:$0xff]  }
 0x255   : > { %7886 = vmatprep.subr.bf16.mxu0 %v10419_v10  ;;  %v10503_v10 = vld [vmem:[%s11754_s27 + $0x17d0] ss:$8 sps:$4 sm:$0xff]  }
 0x257   : > { %7231 = vmatpush1.bf16.msra.mxu1 %v10414_v11  ;;  %v10508_v11 = vld [vmem:[%s11754_s27 + $0x7e4] ss:$8 sps:$4 sm:$0xff]  }
 0x258   : > { %7887 = vmatpush1.bf16.msra.mxu0 %v10417_v12  ;;  %7241 = vmatprep.subr.bf16.mxu1 %v10423_v60  ;;  %v10511_v12 = vld [vmem:[%s11754_s27 + $0x17e4] ss:$8 sps:$4 sm:$0xff]   ;;  %v12431_v60 = vld [vmem:[%s11775_s8 + $0x10] sm:$0xff] }
 0x259   : > { %7897 = vmatprep.subr.bf16.mxu0 %v10427_v14  ;;  %v12434_v14 = vld [vmem:[%s11775_s8 + $0x30] sm:$0xff] }
 0x25a   : > { %7233 = vmatmul.mubr.bf16.vlgmr.msra.gmra.mrb[0].mxu1 %v12362_v15 }
 0x25b   : > { %7889 = vmatmul.mubr.bf16.vlgmr.msra.gmra.mrb[0].mxu0 %v12366_v16  ;;  %7242 = vmatpush1.bf16.msra.mxu1 %v10421_v19  ;;  %v10506_v19 = vld [vmem:[%s11754_s27 + $0x7e0] ss:$8 sps:$4 sm:$0xff]  }
 0x25c   : > { %7898 = vmatpush1.bf16.msra.mxu0 %v10425_v20  ;;  %7243 = vmatprep.subr.bf16.mxu1 %v10430_v21  ;;  %v10509_v20 = vld [vmem:[%s11754_s27 + $0x17e0] ss:$8 sps:$4 sm:$0xff]   ;;  %v10514_v21 = vld [vmem:[%s11754_s27 + $0x7f4] ss:$8 sps:$4 sm:$0xff]  }
 0x25d   : > { %7899 = vmatprep.subr.bf16.mxu0 %v10433_v22  ;;  %7273 = vmatprep.mubr.bf16.mxu1 %v1475_v42  ;;  %v10517_v22 = vld [vmem:[%s11754_s27 + $0x17f4] ss:$8 sps:$4 sm:$0xff]   ;;  %v12442_v42 = vrot.slane %v12431_v60, %v11832_v50 }
 0x25e   : > { %7929 = vmatprep.mubr.bf16.mxu0 %v1671_v23  ;;  %v12446_v23 = vrot.slane %v12434_v14, %v11832_v50 }
 0x25f   : > { %7244 = vmatpush1.bf16.msra.mxu1 %v10428_v2  ;;  %v10512_v2 = vld [vmem:[%s11754_s27 + $0x7f0] ss:$8 sps:$4 sm:$0xff]  }
 0x260   : > { %7900 = vmatpush1.bf16.msra.mxu0 %v10431_v24  ;;  %7245 = vmatprep.subr.bf16.mxu1 %v10436_v13  ;;  %v10515_v24 = vld [vmem:[%s11754_s27 + $0x17f0] ss:$8 sps:$4 sm:$0xff]   ;;  %v10520_v13 = vld [vmem:[%s11754_s27 + $0x804] ss:$8 sps:$4 sm:$0xff]  }
 0x261   : > { %7901 = vmatprep.subr.bf16.mxu0 %v10439_v53  ;;  %v10523_v53 = vld [vmem:[%s11754_s27 + $0x1804] ss:$8 sps:$4 sm:$0xff]  }
 0x263   : > { %7246 = vmatpush1.bf16.msra.mxu1 %v10434_v59  ;;  %v1491_v59 = vcombine.high %v12442_v42, %v12442_v42 }
 0x264   : > { %7902 = vmatpush1.bf16.msra.mxu0 %v10437_v57  ;;  %7247 = vmatprep.subr.bf16.mxu1 %v10442_v27  ;;  %v1687_v57 = vcombine.high %v12446_v23, %v12446_v23  ;;  %v1473_v27 = vcombine.high %v12362_v15, %v12362_v15 }
 0x265   : > { %7903 = vmatprep.subr.bf16.mxu0 %v10445_v28  ;;  %v1669_v28 = vcombine.high %v12366_v16, %v12366_v16  ;;  %v10524_v16 = vld [vmem:[%s11754_s27 + $0x810] ss:$8 sps:$4 sm:$0xff]  }
 0x266   : > { %v12468_v15 = vrot.slane %v1687_v57, %v11832_v50  ;;  %v10599_v57 = vld [vmem:[%s11754_s27 + $0x18d0] ss:$8 sps:$4 sm:$0xff]  }
 0x267   : > { %7248 = vmatpush1.bf16.msra.mxu1 %v10440_v29  ;;  %v10518_v29 = vld [vmem:[%s11754_s27 + $0x800] ss:$8 sps:$4 sm:$0xff]  }
 0x268   : > { %7904 = vmatpush1.bf16.msra.mxu0 %v10443_v30  ;;  %7249 = vmatprep.subr.bf16.mxu1 %v10448_v31  ;;  %v10521_v30 = vld [vmem:[%s11754_s27 + $0x1800] ss:$8 sps:$4 sm:$0xff]   ;;  %v10526_v31 = vld [vmem:[%s11754_s27 + $0x814] ss:$8 sps:$4 sm:$0xff]  }
 0x269   : > { %7905 = vmatprep.subr.bf16.mxu0 %v10451_v32  ;;  %v10529_v32 = vld [vmem:[%s11754_s27 + $0x1814] ss:$8 sps:$4 sm:$0xff]  }
 0x26b   : > { %7250 = vmatpush1.bf16.msra.mxu1 %v10446_v33  ;;  %v12465_v33 = vrot.slane %v1491_v59, %v11832_v50  ;;  %v10596_v59 = vld [vmem:[%s11754_s27 + $0x8d0] ss:$8 sps:$4 sm:$0xff]  }
 0x26c   : > { %7906 = vmatpush1.bf16.msra.mxu0 %v10449_v34  ;;  %7251 = vmatprep.subr.bf16.mxu1 %v10454_v35  ;;  %v10527_v34 = vld [vmem:[%s11754_s27 + $0x1810] ss:$8 sps:$4 sm:$0xff]   ;;  %v10532_v35 = vld [vmem:[%s11754_s27 + $0x824] ss:$8 sps:$4 sm:$0xff]  }
 0x26d   : > { %7907 = vmatprep.subr.bf16.mxu0 %v10457_v36  ;;  %v10535_v36 = vld [vmem:[%s11754_s27 + $0x1824] ss:$8 sps:$4 sm:$0xff]  }
 0x26f   : > { %7252 = vmatpush1.bf16.msra.mxu1 %v10452_v18  ;;  %v10530_v18 = vld [vmem:[%s11754_s27 + $0x820] ss:$8 sps:$4 sm:$0xff]  }
 0x270   : > { %7908 = vmatpush1.bf16.msra.mxu0 %v10455_v38  ;;  %7253 = vmatprep.subr.bf16.mxu1 %v10460_v43  ;;  %v10533_v38 = vld [vmem:[%s11754_s27 + $0x1820] ss:$8 sps:$4 sm:$0xff]   ;;  %v10538_v43 = vld [vmem:[%s11754_s27 + $0x834] ss:$8 sps:$4 sm:$0xff]  }
 0x271   : > { %7909 = vmatprep.subr.bf16.mxu0 %v10463_v45  ;;  %v10541_v45 = vld [vmem:[%s11754_s27 + $0x1834] ss:$8 sps:$4 sm:$0xff]  }
 0x273   : > { %7254 = vmatpush1.bf16.msra.mxu1 %v10458_v25  ;;  %v10536_v25 = vld [vmem:[%s11754_s27 + $0x830] ss:$8 sps:$4 sm:$0xff]  }
 0x274   : > { %7910 = vmatpush1.bf16.msra.mxu0 %v10461_v46  ;;  %7255 = vmatprep.subr.bf16.mxu1 %v10466_v26  ;;  %v10539_v46 = vld [vmem:[%s11754_s27 + $0x1830] ss:$8 sps:$4 sm:$0xff]   ;;  %v10544_v26 = vld [vmem:[%s11754_s27 + $0x844] ss:$8 sps:$4 sm:$0xff]  }
 0x275   : > { %7911 = vmatprep.subr.bf16.mxu0 %v10469_v47  ;;  %v10547_v47 = vld [vmem:[%s11754_s27 + $0x1844] ss:$8 sps:$4 sm:$0xff]  }
 0x277   : > { %7256 = vmatpush1.bf16.msra.mxu1 %v10464_v37  ;;  %v10542_v37 = vld [vmem:[%s11754_s27 + $0x840] ss:$8 sps:$4 sm:$0xff]  }
 0x278   : > { %7912 = vmatpush1.bf16.msra.mxu0 %v10467_v48  ;;  %7257 = vmatprep.subr.bf16.mxu1 %v10472_v17  ;;  %v10545_v48 = vld [vmem:[%s11754_s27 + $0x1840] ss:$8 sps:$4 sm:$0xff]   ;;  %v10550_v17 = vld [vmem:[%s11754_s27 + $0x854] ss:$8 sps:$4 sm:$0xff]  }
 0x279   : > { %7913 = vmatprep.subr.bf16.mxu0 %v10475_v49  ;;  %v10553_v49 = vld [vmem:[%s11754_s27 + $0x1854] ss:$8 sps:$4 sm:$0xff]  }
 0x27b   : > { %7258 = vmatpush1.bf16.msra.mxu1 %v10470_v51  ;;  %v10548_v51 = vld [vmem:[%s11754_s27 + $0x850] ss:$8 sps:$4 sm:$0xff]  }
 0x27c   : > { %7914 = vmatpush1.bf16.msra.mxu0 %v10473_v52  ;;  %7259 = vmatprep.subr.bf16.mxu1 %v10478_v54  ;;  %v10551_v52 = vld [vmem:[%s11754_s27 + $0x1850] ss:$8 sps:$4 sm:$0xff]   ;;  %v10556_v54 = vld [vmem:[%s11754_s27 + $0x864] ss:$8 sps:$4 sm:$0xff]  }
 0x27d   : > { %7915 = vmatprep.subr.bf16.mxu0 %v10481_v55  ;;  %v10559_v55 = vld [vmem:[%s11754_s27 + $0x1864] ss:$8 sps:$4 sm:$0xff]  }
 0x27f   : > { %7260 = vmatpush1.bf16.msra.mxu1 %v10476_v39  ;;  %v10554_v39 = vld [vmem:[%s11754_s27 + $0x860] ss:$8 sps:$4 sm:$0xff]  }
 0x280   : > { %7916 = vmatpush1.bf16.msra.mxu0 %v10479_v40  ;;  %7261 = vmatprep.subr.bf16.mxu1 %v10484_v61  ;;  %v10557_v40 = vld [vmem:[%s11754_s27 + $0x1860] ss:$8 sps:$4 sm:$0xff]   ;;  %v10562_v61 = vld [vmem:[%s11754_s27 + $0x874] ss:$8 sps:$4 sm:$0xff]  }
 0x281   : > { %7917 = vmatprep.subr.bf16.mxu0 %v10487_v62  ;;  %v10565_v62 = vld [vmem:[%s11754_s27 + $0x1874] ss:$8 sps:$4 sm:$0xff]  }
 0x283   : > { %7262 = vmatpush1.bf16.msra.mxu1 %v10482_v63  ;;  %v10560_v63 = vld [vmem:[%s11754_s27 + $0x870] ss:$8 sps:$4 sm:$0xff]  }
 0x284   : > { %7918 = vmatpush1.bf16.msra.mxu0 %v10485_v0  ;;  %7263 = vmatprep.subr.bf16.mxu1 %v10490_v41  ;;  %v10563_v0 = vld [vmem:[%s11754_s27 + $0x1870] ss:$8 sps:$4 sm:$0xff]   ;;  %v10568_v41 = vld [vmem:[%s11754_s27 + $0x884] ss:$8 sps:$4 sm:$0xff]  }
 0x285   : > { %7919 = vmatprep.subr.bf16.mxu0 %v10493_v1  ;;  %v10571_v1 = vld [vmem:[%s11754_s27 + $0x1884] ss:$8 sps:$4 sm:$0xff]  }
 0x287   : > { %7264 = vmatpush1.bf16.msra.mxu1 %v10488_v56  ;;  %v10566_v56 = vld [vmem:[%s11754_s27 + $0x880] ss:$8 sps:$4 sm:$0xff]  }
 0x288   : > { %7920 = vmatpush1.bf16.msra.mxu0 %v10491_v3  ;;  %7265 = vmatprep.subr.bf16.mxu1 %v10496_v58  ;;  %v10569_v3 = vld [vmem:[%s11754_s27 + $0x1880] ss:$8 sps:$4 sm:$0xff]   ;;  %v10574_v58 = vld [vmem:[%s11754_s27 + $0x894] ss:$8 sps:$4 sm:$0xff]  }
 0x289   : > { %7921 = vmatprep.subr.bf16.mxu0 %v10499_v4  ;;  %v10577_v4 = vld [vmem:[%s11754_s27 + $0x1894] ss:$8 sps:$4 sm:$0xff]  }
 0x28b   : > { %7266 = vmatpush1.bf16.msra.mxu1 %v10494_v5  ;;  %v10572_v5 = vld [vmem:[%s11754_s27 + $0x890] ss:$8 sps:$4 sm:$0xff]  }
 0x28c   : > { %7922 = vmatpush1.bf16.msra.mxu0 %v10497_v6  ;;  %7267 = vmatprep.subr.bf16.mxu1 %v10502_v7  ;;  %v10575_v6 = vld [vmem:[%s11754_s27 + $0x1890] ss:$8 sps:$4 sm:$0xff]   ;;  %v10580_v7 = vld [vmem:[%s11754_s27 + $0x8a4] ss:$8 sps:$4 sm:$0xff]  }
 0x28d   : > { %7923 = vmatprep.subr.bf16.mxu0 %v10505_v8  ;;  %v10583_v8 = vld [vmem:[%s11754_s27 + $0x18a4] ss:$8 sps:$4 sm:$0xff]  }
 0x28f   : > { %7268 = vmatpush1.bf16.msra.mxu1 %v10500_v9  ;;  %v10578_v9 = vld [vmem:[%s11754_s27 + $0x8a0] ss:$8 sps:$4 sm:$0xff]  }
 0x290   : > { %7924 = vmatpush1.bf16.msra.mxu0 %v10503_v10  ;;  %7269 = vmatprep.subr.bf16.mxu1 %v10508_v11  ;;  %v10581_v10 = vld [vmem:[%s11754_s27 + $0x18a0] ss:$8 sps:$4 sm:$0xff]   ;;  %v10586_v11 = vld [vmem:[%s11754_s27 + $0x8b4] ss:$8 sps:$4 sm:$0xff]  }
 0x291   : > { %7925 = vmatprep.subr.bf16.mxu0 %v10511_v12  ;;  %v10589_v12 = vld [vmem:[%s11754_s27 + $0x18b4] ss:$8 sps:$4 sm:$0xff]  }
 0x293   : > { %7270 = vmatpush1.bf16.msra.mxu1 %v10506_v19  ;;  %v10584_v19 = vld [vmem:[%s11754_s27 + $0x8b0] ss:$8 sps:$4 sm:$0xff]  }
 0x294   : > { %7926 = vmatpush1.bf16.msra.mxu0 %v10509_v20  ;;  %7271 = vmatprep.subr.bf16.mxu1 %v10514_v21  ;;  %v10587_v20 = vld [vmem:[%s11754_s27 + $0x18b0] ss:$8 sps:$4 sm:$0xff]   ;;  %v10592_v21 = vld [vmem:[%s11754_s27 + $0x8c4] ss:$8 sps:$4 sm:$0xff]  }
 0x295   : > { %7927 = vmatprep.subr.bf16.mxu0 %v10517_v22  ;;  %v10595_v22 = vld [vmem:[%s11754_s27 + $0x18c4] ss:$8 sps:$4 sm:$0xff]  }
 0x297   : > { %7272 = vmatpush1.bf16.msra.mxu1 %v10512_v2  ;;  %v10590_v2 = vld [vmem:[%s11754_s27 + $0x8c0] ss:$8 sps:$4 sm:$0xff]  }
 0x298   : > { %7928 = vmatpush1.bf16.msra.mxu0 %v10515_v24  ;;  %7282 = vmatprep.subr.bf16.mxu1 %v10520_v13  ;;  %v10593_v24 = vld [vmem:[%s11754_s27 + $0x18c0] ss:$8 sps:$4 sm:$0xff]   ;;  %v10598_v13 = vld [vmem:[%s11754_s27 + $0x8d4] ss:$8 sps:$4 sm:$0xff]  }
 0x299   : > { %7938 = vmatprep.subr.bf16.mxu0 %v10523_v53  ;;  %v10601_v53 = vld [vmem:[%s11754_s27 + $0x18d4] ss:$8 sps:$4 sm:$0xff]  }
 0x29a   : > { %7274 = vmatmul.mubr.bf16.vlgmr.msra.gmra.mrb[0].mxu1 %v1473_v27  ;;  %v10604_v27 = vld [vmem:[%s11754_s27 + $0x8e4] ss:$8 sps:$4 sm:$0xff]  }
 0x29b   : > { %7930 = vmatmul.mubr.bf16.vlgmr.msra.gmra.mrb[0].mxu0 %v1669_v28  ;;  %7283 = vmatpush1.bf16.msra.mxu1 %v10518_v29  ;;  %v10607_v28 = vld [vmem:[%s11754_s27 + $0x18e4] ss:$8 sps:$4 sm:$0xff]   ;;  %v10602_v29 = vld [vmem:[%s11754_s27 + $0x8e0] ss:$8 sps:$4 sm:$0xff]  }
 0x29c   : > { %7939 = vmatpush1.bf16.msra.mxu0 %v10521_v30  ;;  %7284 = vmatprep.subr.bf16.mxu1 %v10526_v31  ;;  %v10605_v30 = vld [vmem:[%s11754_s27 + $0x18e0] ss:$8 sps:$4 sm:$0xff]   ;;  %v10610_v31 = vld [vmem:[%s11754_s27 + $0x8f4] ss:$8 sps:$4 sm:$0xff]  }
 0x29d   : > { %7940 = vmatprep.subr.bf16.mxu0 %v10529_v32  ;;  %7314 = vmatprep.mubr.bf16.mxu1 %v12465_v33  ;;  %v10613_v32 = vld [vmem:[%s11754_s27 + $0x18f4] ss:$8 sps:$4 sm:$0xff]  }
 0x29e   : > { %7970 = vmatprep.mubr.bf16.mxu0 %v12468_v15 }
 0x29f   : > { %7285 = vmatpush1.bf16.msra.mxu1 %v10524_v16  ;;  %v10608_v16 = vld [vmem:[%s11754_s27 + $0x8f0] ss:$8 sps:$4 sm:$0xff]  }
 0x2a0   : > { %7941 = vmatpush1.bf16.msra.mxu0 %v10527_v34  ;;  %7286 = vmatprep.subr.bf16.mxu1 %v10532_v35  ;;  %v10611_v34 = vld [vmem:[%s11754_s27 + $0x18f0] ss:$8 sps:$4 sm:$0xff]   ;;  %v10616_v35 = vld [vmem:[%s11754_s27 + $0x904] ss:$8 sps:$4 sm:$0xff]  }
 0x2a1   : > { %7942 = vmatprep.subr.bf16.mxu0 %v10535_v36  ;;  %v10619_v36 = vld [vmem:[%s11754_s27 + $0x1904] ss:$8 sps:$4 sm:$0xff]  }
 0x2a3   : > { %7287 = vmatpush1.bf16.msra.mxu1 %v10530_v18  ;;  %v12534_v18 = vrot.slane %v12442_v42, %v11832_v50  ;;  %v1523_v42 = vcombine.high %v12465_v33, %v12465_v33  ;;  %v10628_v33 = vld [vmem:[%s11754_s27 + $0x924] ss:$8 sps:$4 sm:$0xff]  }
 0x2a4   : > { %7943 = vmatpush1.bf16.msra.mxu0 %v10533_v38  ;;  %7288 = vmatprep.subr.bf16.mxu1 %v10538_v43  ;;  %v12538_v38 = vrot.slane %v12446_v23, %v11832_v50  ;;  %v10614_v43 = vld [vmem:[%s11754_s27 + $0x900] ss:$8 sps:$4 sm:$0xff]   ;;  %v10620_v23 = vld [vmem:[%s11754_s27 + $0x910] ss:$8 sps:$4 sm:$0xff]  }
 0x2a5   : > { %7944 = vmatprep.subr.bf16.mxu0 %v10541_v45  ;;  %v10617_v45 = vld [vmem:[%s11754_s27 + $0x1900] ss:$8 sps:$4 sm:$0xff]  }
 0x2a7   : > { %7289 = vmatpush1.bf16.msra.mxu1 %v10536_v25  ;;  %v10622_v25 = vld [vmem:[%s11754_s27 + $0x914] ss:$8 sps:$4 sm:$0xff]  }
 0x2a8   : > { %7945 = vmatpush1.bf16.msra.mxu0 %v10539_v46  ;;  %7290 = vmatprep.subr.bf16.mxu1 %v10544_v26  ;;  %v10625_v46 = vld [vmem:[%s11754_s27 + $0x1914] ss:$8 sps:$4 sm:$0xff]   ;;  %v1719_v26 = vcombine.high %v12468_v15, %v12468_v15  ;;  %v10626_v15 = vld [vmem:[%s11754_s27 + $0x920] ss:$8 sps:$4 sm:$0xff]  }
 0x2a9   : > { %7946 = vmatprep.subr.bf16.mxu0 %v10547_v47  ;;  %v10623_v47 = vld [vmem:[%s11754_s27 + $0x1910] ss:$8 sps:$4 sm:$0xff]  }
 0x2ab   : > { %7291 = vmatpush1.bf16.msra.mxu1 %v10542_v37  ;;  %v10631_v37 = vld [vmem:[%s11754_s27 + $0x1924] ss:$8 sps:$4 sm:$0xff]  }
 0x2ac   : > { %7947 = vmatpush1.bf16.msra.mxu0 %v10545_v48  ;;  %7292 = vmatprep.subr.bf16.mxu1 %v10550_v17  ;;  %v10629_v48 = vld [vmem:[%s11754_s27 + $0x1920] ss:$8 sps:$4 sm:$0xff]   ;;  %v10634_v17 = vld [vmem:[%s11754_s27 + $0x934] ss:$8 sps:$4 sm:$0xff]  }
 0x2ad   : > { %7948 = vmatprep.subr.bf16.mxu0 %v10553_v49  ;;  %v10637_v49 = vld [vmem:[%s11754_s27 + $0x1934] ss:$8 sps:$4 sm:$0xff]  }
 0x2af   : > { %7293 = vmatpush1.bf16.msra.mxu1 %v10548_v51  ;;  %v10632_v51 = vld [vmem:[%s11754_s27 + $0x930] ss:$8 sps:$4 sm:$0xff]  }
 0x2b0   : > { %7949 = vmatpush1.bf16.msra.mxu0 %v10551_v52  ;;  %7294 = vmatprep.subr.bf16.mxu1 %v10556_v54  ;;  %v10635_v52 = vld [vmem:[%s11754_s27 + $0x1930] ss:$8 sps:$4 sm:$0xff]   ;;  %v10640_v54 = vld [vmem:[%s11754_s27 + $0x944] ss:$8 sps:$4 sm:$0xff]  }
 0x2b1   : > { %7950 = vmatprep.subr.bf16.mxu0 %v10559_v55  ;;  %v10643_v55 = vld [vmem:[%s11754_s27 + $0x1944] ss:$8 sps:$4 sm:$0xff]  }
 0x2b3   : > { %7295 = vmatpush1.bf16.msra.mxu1 %v10554_v39  ;;  %v10638_v39 = vld [vmem:[%s11754_s27 + $0x940] ss:$8 sps:$4 sm:$0xff]  }
 0x2b4   : > { %7951 = vmatpush1.bf16.msra.mxu0 %v10557_v40  ;;  %7296 = vmatprep.subr.bf16.mxu1 %v10562_v61  ;;  %v10641_v40 = vld [vmem:[%s11754_s27 + $0x1940] ss:$8 sps:$4 sm:$0xff]   ;;  %v10646_v61 = vld [vmem:[%s11754_s27 + $0x954] ss:$8 sps:$4 sm:$0xff]  }
 0x2b5   : > { %7952 = vmatprep.subr.bf16.mxu0 %v10565_v62  ;;  %v10649_v62 = vld [vmem:[%s11754_s27 + $0x1954] ss:$8 sps:$4 sm:$0xff]  }
 0x2b7   : > { %7297 = vmatpush1.bf16.msra.mxu1 %v10560_v63  ;;  %v10644_v63 = vld [vmem:[%s11754_s27 + $0x950] ss:$8 sps:$4 sm:$0xff]  }
 0x2b8   : > { %7953 = vmatpush1.bf16.msra.mxu0 %v10563_v0  ;;  %7298 = vmatprep.subr.bf16.mxu1 %v10568_v41  ;;  %v10647_v0 = vld [vmem:[%s11754_s27 + $0x1950] ss:$8 sps:$4 sm:$0xff]   ;;  %v10652_v41 = vld [vmem:[%s11754_s27 + $0x964] ss:$8 sps:$4 sm:$0xff]  }
 0x2b9   : > { %7954 = vmatprep.subr.bf16.mxu0 %v10571_v1  ;;  %v10655_v1 = vld [vmem:[%s11754_s27 + $0x1964] ss:$8 sps:$4 sm:$0xff]  }
 0x2bb   : > { %7299 = vmatpush1.bf16.msra.mxu1 %v10566_v56  ;;  %v10650_v56 = vld [vmem:[%s11754_s27 + $0x960] ss:$8 sps:$4 sm:$0xff]  }
 0x2bc   : > { %7955 = vmatpush1.bf16.msra.mxu0 %v10569_v3  ;;  %7300 = vmatprep.subr.bf16.mxu1 %v10574_v58  ;;  %v10653_v3 = vld [vmem:[%s11754_s27 + $0x1960] ss:$8 sps:$4 sm:$0xff]   ;;  %v10658_v58 = vld [vmem:[%s11754_s27 + $0x974] ss:$8 sps:$4 sm:$0xff]  }
 0x2bd   : > { %7956 = vmatprep.subr.bf16.mxu0 %v10577_v4  ;;  %v10661_v4 = vld [vmem:[%s11754_s27 + $0x1974] ss:$8 sps:$4 sm:$0xff]  }
 0x2bf   : > { %7301 = vmatpush1.bf16.msra.mxu1 %v10572_v5  ;;  %v10656_v5 = vld [vmem:[%s11754_s27 + $0x970] ss:$8 sps:$4 sm:$0xff]  }
 0x2c0   : > { %7957 = vmatpush1.bf16.msra.mxu0 %v10575_v6  ;;  %7302 = vmatprep.subr.bf16.mxu1 %v10580_v7  ;;  %v10659_v6 = vld [vmem:[%s11754_s27 + $0x1970] ss:$8 sps:$4 sm:$0xff]   ;;  %v10664_v7 = vld [vmem:[%s11754_s27 + $0x984] ss:$8 sps:$4 sm:$0xff]  }
 0x2c1   : > { %7958 = vmatprep.subr.bf16.mxu0 %v10583_v8  ;;  %v10667_v8 = vld [vmem:[%s11754_s27 + $0x1984] ss:$8 sps:$4 sm:$0xff]  }
 0x2c3   : > { %7303 = vmatpush1.bf16.msra.mxu1 %v10578_v9  ;;  %v10662_v9 = vld [vmem:[%s11754_s27 + $0x980] ss:$8 sps:$4 sm:$0xff]  }
 0x2c4   : > { %7959 = vmatpush1.bf16.msra.mxu0 %v10581_v10  ;;  %7304 = vmatprep.subr.bf16.mxu1 %v10586_v11  ;;  %v10665_v10 = vld [vmem:[%s11754_s27 + $0x1980] ss:$8 sps:$4 sm:$0xff]   ;;  %v10670_v11 = vld [vmem:[%s11754_s27 + $0x994] ss:$8 sps:$4 sm:$0xff]  }
 0x2c5   : > { %7960 = vmatprep.subr.bf16.mxu0 %v10589_v12  ;;  %v10673_v12 = vld [vmem:[%s11754_s27 + $0x1994] ss:$8 sps:$4 sm:$0xff]  }
 0x2c7   : > { %7305 = vmatpush1.bf16.msra.mxu1 %v10584_v19  ;;  %v10668_v19 = vld [vmem:[%s11754_s27 + $0x990] ss:$8 sps:$4 sm:$0xff]  }
 0x2c8   : > { %7961 = vmatpush1.bf16.msra.mxu0 %v10587_v20  ;;  %7306 = vmatprep.subr.bf16.mxu1 %v10592_v21  ;;  %v10671_v20 = vld [vmem:[%s11754_s27 + $0x1990] ss:$8 sps:$4 sm:$0xff]   ;;  %v10676_v21 = vld [vmem:[%s11754_s27 + $0x9a4] ss:$8 sps:$4 sm:$0xff]  }
 0x2c9   : > { %7962 = vmatprep.subr.bf16.mxu0 %v10595_v22  ;;  %v10679_v22 = vld [vmem:[%s11754_s27 + $0x19a4] ss:$8 sps:$4 sm:$0xff]  }
 0x2cb   : > { %7307 = vmatpush1.bf16.msra.mxu1 %v10590_v2  ;;  %v10674_v2 = vld [vmem:[%s11754_s27 + $0x9a0] ss:$8 sps:$4 sm:$0xff]  }
 0x2cc   : > { %7963 = vmatpush1.bf16.msra.mxu0 %v10593_v24  ;;  %7308 = vmatprep.subr.bf16.mxu1 %v10598_v13  ;;  %v10677_v24 = vld [vmem:[%s11754_s27 + $0x19a0] ss:$8 sps:$4 sm:$0xff]   ;;  %v10682_v13 = vld [vmem:[%s11754_s27 + $0x9b4] ss:$8 sps:$4 sm:$0xff]  }
 0x2cd   : > { %7964 = vmatprep.subr.bf16.mxu0 %v10601_v53  ;;  %v10685_v53 = vld [vmem:[%s11754_s27 + $0x19b4] ss:$8 sps:$4 sm:$0xff]  }
 0x2cf   : > { %7309 = vmatpush1.bf16.msra.mxu1 %v10596_v59  ;;  %v10680_v59 = vld [vmem:[%s11754_s27 + $0x9b0] ss:$8 sps:$4 sm:$0xff]  }
 0x2d0   : > { %7965 = vmatpush1.bf16.msra.mxu0 %v10599_v57  ;;  %7310 = vmatprep.subr.bf16.mxu1 %v10604_v27  ;;  %v10683_v57 = vld [vmem:[%s11754_s27 + $0x19b0] ss:$8 sps:$4 sm:$0xff]   ;;  %v10688_v27 = vld [vmem:[%s11754_s27 + $0x9c4] ss:$8 sps:$4 sm:$0xff]  }
 0x2d1   : > { %7966 = vmatprep.subr.bf16.mxu0 %v10607_v28  ;;  %v10691_v28 = vld [vmem:[%s11754_s27 + $0x19c4] ss:$8 sps:$4 sm:$0xff]  }
 0x2d3   : > { %7311 = vmatpush1.bf16.msra.mxu1 %v10602_v29  ;;  %v10686_v29 = vld [vmem:[%s11754_s27 + $0x9c0] ss:$8 sps:$4 sm:$0xff]  }
 0x2d4   : > { %7967 = vmatpush1.bf16.msra.mxu0 %v10605_v30  ;;  %7312 = vmatprep.subr.bf16.mxu1 %v10610_v31  ;;  %v10689_v30 = vld [vmem:[%s11754_s27 + $0x19c0] ss:$8 sps:$4 sm:$0xff]   ;;  %v10694_v31 = vld [vmem:[%s11754_s27 + $0x9d4] ss:$8 sps:$4 sm:$0xff]  }
 0x2d5   : > { %7968 = vmatprep.subr.bf16.mxu0 %v10613_v32  ;;  %v10697_v32 = vld [vmem:[%s11754_s27 + $0x19d4] ss:$8 sps:$4 sm:$0xff]  }
 0x2d7   : > { %7313 = vmatpush1.bf16.msra.mxu1 %v10608_v16  ;;  %v10692_v16 = vld [vmem:[%s11754_s27 + $0x9d0] ss:$8 sps:$4 sm:$0xff]  }
 0x2d8   : > { %7969 = vmatpush1.bf16.msra.mxu0 %v10611_v34  ;;  %7323 = vmatprep.subr.bf16.mxu1 %v10616_v35  ;;  %v10695_v34 = vld [vmem:[%s11754_s27 + $0x19d0] ss:$8 sps:$4 sm:$0xff]   ;;  %v10700_v35 = vld [vmem:[%s11754_s27 + $0x9e4] ss:$8 sps:$4 sm:$0xff]  }
 0x2d9   : > { %7979 = vmatprep.subr.bf16.mxu0 %v10619_v36  ;;  %v10703_v36 = vld [vmem:[%s11754_s27 + $0x19e4] ss:$8 sps:$4 sm:$0xff]  }
 0x2da   : > { %7315 = vmatmul.mubr.bf16.vlgmr.msra.gmra.mrb[0].mxu1 %v12534_v18 }
 0x2db   : > { %7971 = vmatmul.mubr.bf16.vlgmr.msra.gmra.mrb[0].mxu0 %v12538_v38  ;;  %7324 = vmatpush1.bf16.msra.mxu1 %v10614_v43  ;;  %v1476_v43 = vcombine.high %v12431_v60, %v12431_v60  ;;  %v10704_v60 = vld [vmem:[%s11754_s27 + $0x9f0] ss:$8 sps:$4 sm:$0xff]  }
 0x2dc   : > { %7980 = vmatpush1.bf16.msra.mxu0 %v10617_v45  ;;  %7325 = vmatprep.subr.bf16.mxu1 %v10622_v25  ;;  %v1672_v45 = vcombine.high %v12434_v14, %v12434_v14  ;;  %v10698_v25 = vld [vmem:[%s11754_s27 + $0x9e0] ss:$8 sps:$4 sm:$0xff]   ;;  %v10707_v14 = vld [vmem:[%s11754_s27 + $0x19f0] ss:$8 sps:$4 sm:$0xff]  }
 0x2dd   : > { %7981 = vmatprep.subr.bf16.mxu0 %v10625_v46  ;;  %7355 = vmatprep.mubr.bf16.mxu1 %v1523_v42  ;;  %v10701_v46 = vld [vmem:[%s11754_s27 + $0x19e0] ss:$8 sps:$4 sm:$0xff]   ;;  %v10706_v42 = vld [vmem:[%s11754_s27 + $0x9f4] ss:$8 sps:$4 sm:$0xff]  }
 0x2de   : > { %8011 = vmatprep.mubr.bf16.mxu0 %v1719_v26  ;;  %v10709_v26 = vld [vmem:[%s11754_s27 + $0x19f4] ss:$8 sps:$4 sm:$0xff]  }
 0x2df   : > { %7326 = vmatpush1.bf16.msra.mxu1 %v10620_v23  ;;  %v12611_v23 = vrot.slane %v1476_v43, %v11832_v50  ;;  %v10776_v43 = vld [vmem:[%s11754_s27 + $0xab0] ss:$8 sps:$4 sm:$0xff]  }
 0x2e0   : > { %7982 = vmatpush1.bf16.msra.mxu0 %v10623_v47  ;;  %7327 = vmatprep.subr.bf16.mxu1 %v10628_v33  ;;  %v12614_v47 = vrot.slane %v1672_v45, %v11832_v50  ;;  %v10712_v33 = vld [vmem:[%s11754_s27 + $0xa04] ss:$8 sps:$4 sm:$0xff]   ;;  %v10779_v45 = vld [vmem:[%s11754_s27 + $0x1ab0] ss:$8 sps:$4 sm:$0xff]  }
 0x2e1   : > { %7983 = vmatprep.subr.bf16.mxu0 %v10631_v37  ;;  %v10715_v37 = vld [vmem:[%s11754_s27 + $0x1a04] ss:$8 sps:$4 sm:$0xff]  }
 0x2e3   : > { %7328 = vmatpush1.bf16.msra.mxu1 %v10626_v15  ;;  %v1492_v15 = vcombine.high %v12611_v23, %v12611_v23 }
 0x2e4   : > { %7984 = vmatpush1.bf16.msra.mxu0 %v10629_v48  ;;  %7329 = vmatprep.subr.bf16.mxu1 %v10634_v17  ;;  %v1688_v48 = vcombine.high %v12614_v47, %v12614_v47  ;;  %v1521_v17 = vcombine.high %v12534_v18, %v12534_v18 }
 0x2e5   : > { %7985 = vmatprep.subr.bf16.mxu0 %v10637_v49  ;;  %v1717_v49 = vcombine.high %v12538_v38, %v12538_v38  ;;  %v10716_v38 = vld [vmem:[%s11754_s27 + $0xa10] ss:$8 sps:$4 sm:$0xff]  }
 0x2e6   : > { %v12636_v18 = vrot.slane %v1688_v48, %v11832_v50  ;;  %v10799_v48 = vld [vmem:[%s11754_s27 + $0x1ae4] ss:$8 sps:$4 sm:$0xff]  }
 0x2e7   : > { %7330 = vmatpush1.bf16.msra.mxu1 %v10632_v51  ;;  %v10710_v51 = vld [vmem:[%s11754_s27 + $0xa00] ss:$8 sps:$4 sm:$0xff]  }
 0x2e8   : > { %7986 = vmatpush1.bf16.msra.mxu0 %v10635_v52  ;;  %7331 = vmatprep.subr.bf16.mxu1 %v10640_v54  ;;  %v10713_v52 = vld [vmem:[%s11754_s27 + $0x1a00] ss:$8 sps:$4 sm:$0xff]   ;;  %v10718_v54 = vld [vmem:[%s11754_s27 + $0xa14] ss:$8 sps:$4 sm:$0xff]  }
 0x2e9   : > { %7987 = vmatprep.subr.bf16.mxu0 %v10643_v55  ;;  %v10721_v55 = vld [vmem:[%s11754_s27 + $0x1a14] ss:$8 sps:$4 sm:$0xff]  }
 0x2eb   : > { %7332 = vmatpush1.bf16.msra.mxu1 %v10638_v39  ;;  %v12633_v39 = vrot.slane %v1492_v15, %v11832_v50  ;;  %v10796_v15 = vld [vmem:[%s11754_s27 + $0xae4] ss:$8 sps:$4 sm:$0xff]  }
 0x2ec   : > { %7988 = vmatpush1.bf16.msra.mxu0 %v10641_v40  ;;  %7333 = vmatprep.subr.bf16.mxu1 %v10646_v61  ;;  %v10719_v40 = vld [vmem:[%s11754_s27 + $0x1a10] ss:$8 sps:$4 sm:$0xff]   ;;  %v10724_v61 = vld [vmem:[%s11754_s27 + $0xa24] ss:$8 sps:$4 sm:$0xff]  }
 0x2ed   : > { %7989 = vmatprep.subr.bf16.mxu0 %v10649_v62  ;;  %v10727_v62 = vld [vmem:[%s11754_s27 + $0x1a24] ss:$8 sps:$4 sm:$0xff]  }
 0x2ef   : > { %7334 = vmatpush1.bf16.msra.mxu1 %v10644_v63  ;;  %v10722_v63 = vld [vmem:[%s11754_s27 + $0xa20] ss:$8 sps:$4 sm:$0xff]  }
 0x2f0   : > { %7990 = vmatpush1.bf16.msra.mxu0 %v10647_v0  ;;  %7335 = vmatprep.subr.bf16.mxu1 %v10652_v41  ;;  %v10725_v0 = vld [vmem:[%s11754_s27 + $0x1a20] ss:$8 sps:$4 sm:$0xff]   ;;  %v10730_v41 = vld [vmem:[%s11754_s27 + $0xa34] ss:$8 sps:$4 sm:$0xff]  }
 0x2f1   : > { %7991 = vmatprep.subr.bf16.mxu0 %v10655_v1  ;;  %v10733_v1 = vld [vmem:[%s11754_s27 + $0x1a34] ss:$8 sps:$4 sm:$0xff]  }
 0x2f3   : > { %7336 = vmatpush1.bf16.msra.mxu1 %v10650_v56  ;;  %v10728_v56 = vld [vmem:[%s11754_s27 + $0xa30] ss:$8 sps:$4 sm:$0xff]  }
 0x2f4   : > { %7992 = vmatpush1.bf16.msra.mxu0 %v10653_v3  ;;  %7337 = vmatprep.subr.bf16.mxu1 %v10658_v58  ;;  %v10731_v3 = vld [vmem:[%s11754_s27 + $0x1a30] ss:$8 sps:$4 sm:$0xff]   ;;  %v10736_v58 = vld [vmem:[%s11754_s27 + $0xa44] ss:$8 sps:$4 sm:$0xff]  }
 0x2f5   : > { %7993 = vmatprep.subr.bf16.mxu0 %v10661_v4  ;;  %v10739_v4 = vld [vmem:[%s11754_s27 + $0x1a44] ss:$8 sps:$4 sm:$0xff]  }
 0x2f7   : > { %7338 = vmatpush1.bf16.msra.mxu1 %v10656_v5  ;;  %v10734_v5 = vld [vmem:[%s11754_s27 + $0xa40] ss:$8 sps:$4 sm:$0xff]  }
 0x2f8   : > { %7994 = vmatpush1.bf16.msra.mxu0 %v10659_v6  ;;  %7339 = vmatprep.subr.bf16.mxu1 %v10664_v7  ;;  %v10737_v6 = vld [vmem:[%s11754_s27 + $0x1a40] ss:$8 sps:$4 sm:$0xff]   ;;  %v10742_v7 = vld [vmem:[%s11754_s27 + $0xa54] ss:$8 sps:$4 sm:$0xff]  }
 0x2f9   : > { %7995 = vmatprep.subr.bf16.mxu0 %v10667_v8  ;;  %v10745_v8 = vld [vmem:[%s11754_s27 + $0x1a54] ss:$8 sps:$4 sm:$0xff]  }
 0x2fb   : > { %7340 = vmatpush1.bf16.msra.mxu1 %v10662_v9  ;;  %v10740_v9 = vld [vmem:[%s11754_s27 + $0xa50] ss:$8 sps:$4 sm:$0xff]  }
 0x2fc   : > { %7996 = vmatpush1.bf16.msra.mxu0 %v10665_v10  ;;  %7341 = vmatprep.subr.bf16.mxu1 %v10670_v11  ;;  %v10743_v10 = vld [vmem:[%s11754_s27 + $0x1a50] ss:$8 sps:$4 sm:$0xff]   ;;  %v10748_v11 = vld [vmem:[%s11754_s27 + $0xa64] ss:$8 sps:$4 sm:$0xff]  }
 0x2fd   : > { %7997 = vmatprep.subr.bf16.mxu0 %v10673_v12  ;;  %v10751_v12 = vld [vmem:[%s11754_s27 + $0x1a64] ss:$8 sps:$4 sm:$0xff]  }
 0x2ff   : > { %7342 = vmatpush1.bf16.msra.mxu1 %v10668_v19  ;;  %v10746_v19 = vld [vmem:[%s11754_s27 + $0xa60] ss:$8 sps:$4 sm:$0xff]  }
 0x300   : > { %7998 = vmatpush1.bf16.msra.mxu0 %v10671_v20  ;;  %7343 = vmatprep.subr.bf16.mxu1 %v10676_v21  ;;  %v10749_v20 = vld [vmem:[%s11754_s27 + $0x1a60] ss:$8 sps:$4 sm:$0xff]   ;;  %v10754_v21 = vld [vmem:[%s11754_s27 + $0xa74] ss:$8 sps:$4 sm:$0xff]  }
 0x301   : > { %7999 = vmatprep.subr.bf16.mxu0 %v10679_v22  ;;  %v10757_v22 = vld [vmem:[%s11754_s27 + $0x1a74] ss:$8 sps:$4 sm:$0xff]  }
 0x303   : > { %7344 = vmatpush1.bf16.msra.mxu1 %v10674_v2  ;;  %v10752_v2 = vld [vmem:[%s11754_s27 + $0xa70] ss:$8 sps:$4 sm:$0xff]  }
 0x304   : > { %8000 = vmatpush1.bf16.msra.mxu0 %v10677_v24  ;;  %7345 = vmatprep.subr.bf16.mxu1 %v10682_v13  ;;  %v10755_v24 = vld [vmem:[%s11754_s27 + $0x1a70] ss:$8 sps:$4 sm:$0xff]   ;;  %v10760_v13 = vld [vmem:[%s11754_s27 + $0xa84] ss:$8 sps:$4 sm:$0xff]  }
 0x305   : > { %8001 = vmatprep.subr.bf16.mxu0 %v10685_v53  ;;  %v10763_v53 = vld [vmem:[%s11754_s27 + $0x1a84] ss:$8 sps:$4 sm:$0xff]  }
 0x307   : > { %7346 = vmatpush1.bf16.msra.mxu1 %v10680_v59  ;;  %v10758_v59 = vld [vmem:[%s11754_s27 + $0xa80] ss:$8 sps:$4 sm:$0xff]  }
 0x308   : > { %8002 = vmatpush1.bf16.msra.mxu0 %v10683_v57  ;;  %7347 = vmatprep.subr.bf16.mxu1 %v10688_v27  ;;  %v10761_v57 = vld [vmem:[%s11754_s27 + $0x1a80] ss:$8 sps:$4 sm:$0xff]   ;;  %v10766_v27 = vld [vmem:[%s11754_s27 + $0xa94] ss:$8 sps:$4 sm:$0xff]  }
 0x309   : > { %8003 = vmatprep.subr.bf16.mxu0 %v10691_v28  ;;  %v10769_v28 = vld [vmem:[%s11754_s27 + $0x1a94] ss:$8 sps:$4 sm:$0xff]  }
 0x30b   : > { %7348 = vmatpush1.bf16.msra.mxu1 %v10686_v29  ;;  %v10764_v29 = vld [vmem:[%s11754_s27 + $0xa90] ss:$8 sps:$4 sm:$0xff]  }
 0x30c   : > { %8004 = vmatpush1.bf16.msra.mxu0 %v10689_v30  ;;  %7349 = vmatprep.subr.bf16.mxu1 %v10694_v31  ;;  %v10767_v30 = vld [vmem:[%s11754_s27 + $0x1a90] ss:$8 sps:$4 sm:$0xff]   ;;  %v10772_v31 = vld [vmem:[%s11754_s27 + $0xaa4] ss:$8 sps:$4 sm:$0xff]  }
 0x30d   : > { %8005 = vmatprep.subr.bf16.mxu0 %v10697_v32  ;;  %v10775_v32 = vld [vmem:[%s11754_s27 + $0x1aa4] ss:$8 sps:$4 sm:$0xff]  }
 0x30f   : > { %7350 = vmatpush1.bf16.msra.mxu1 %v10692_v16  ;;  %v10770_v16 = vld [vmem:[%s11754_s27 + $0xaa0] ss:$8 sps:$4 sm:$0xff]  }
 0x310   : > { %8006 = vmatpush1.bf16.msra.mxu0 %v10695_v34  ;;  %7351 = vmatprep.subr.bf16.mxu1 %v10700_v35  ;;  %v10773_v34 = vld [vmem:[%s11754_s27 + $0x1aa0] ss:$8 sps:$4 sm:$0xff]   ;;  %v10778_v35 = vld [vmem:[%s11754_s27 + $0xab4] ss:$8 sps:$4 sm:$0xff]  }
 0x311   : > { %8007 = vmatprep.subr.bf16.mxu0 %v10703_v36  ;;  %v10781_v36 = vld [vmem:[%s11754_s27 + $0x1ab4] ss:$8 sps:$4 sm:$0xff]  }
 0x313   : > { %7352 = vmatpush1.bf16.msra.mxu1 %v10698_v25  ;;  %v10784_v25 = vld [vmem:[%s11754_s27 + $0xac4] ss:$8 sps:$4 sm:$0xff]  }
 0x314   : > { %8008 = vmatpush1.bf16.msra.mxu0 %v10701_v46  ;;  %7353 = vmatprep.subr.bf16.mxu1 %v10706_v42  ;;  %v10787_v46 = vld [vmem:[%s11754_s27 + $0x1ac4] ss:$8 sps:$4 sm:$0xff]   ;;  %v10782_v42 = vld [vmem:[%s11754_s27 + $0xac0] ss:$8 sps:$4 sm:$0xff]  }
 0x315   : > { %8009 = vmatprep.subr.bf16.mxu0 %v10709_v26  ;;  %v10785_v26 = vld [vmem:[%s11754_s27 + $0x1ac0] ss:$8 sps:$4 sm:$0xff]  }
 0x317   : > { %7354 = vmatpush1.bf16.msra.mxu1 %v10704_v60  ;;  %v10790_v60 = vld [vmem:[%s11754_s27 + $0xad4] ss:$8 sps:$4 sm:$0xff]  }
 0x318   : > { %8010 = vmatpush1.bf16.msra.mxu0 %v10707_v14  ;;  %7364 = vmatprep.subr.bf16.mxu1 %v10712_v33  ;;  %v10793_v14 = vld [vmem:[%s11754_s27 + $0x1ad4] ss:$8 sps:$4 sm:$0xff]   ;;  %v10788_v33 = vld [vmem:[%s11754_s27 + $0xad0] ss:$8 sps:$4 sm:$0xff]  }
 0x319   : > { %8020 = vmatprep.subr.bf16.mxu0 %v10715_v37  ;;  %v10791_v37 = vld [vmem:[%s11754_s27 + $0x1ad0] ss:$8 sps:$4 sm:$0xff]  }
 0x31a   : > { %7356 = vmatmul.mubr.bf16.vlgmr.msra.gmra.mrb[0].mxu1 %v1521_v17  ;;  %v10794_v17 = vld [vmem:[%s11754_s27 + $0xae0] ss:$8 sps:$4 sm:$0xff]  }
 0x31b   : > { %8012 = vmatmul.mubr.bf16.vlgmr.msra.gmra.mrb[0].mxu0 %v1717_v49  ;;  %7365 = vmatpush1.bf16.msra.mxu1 %v10710_v51  ;;  %v10797_v49 = vld [vmem:[%s11754_s27 + $0x1ae0] ss:$8 sps:$4 sm:$0xff]   ;;  %v10802_v51 = vld [vmem:[%s11754_s27 + $0xaf4] ss:$8 sps:$4 sm:$0xff]  }
 0x31c   : > { %8021 = vmatpush1.bf16.msra.mxu0 %v10713_v52  ;;  %7366 = vmatprep.subr.bf16.mxu1 %v10718_v54  ;;  %v10805_v52 = vld [vmem:[%s11754_s27 + $0x1af4] ss:$8 sps:$4 sm:$0xff]   ;;  %v10800_v54 = vld [vmem:[%s11754_s27 + $0xaf0] ss:$8 sps:$4 sm:$0xff]  }
 0x31d   : > { %8022 = vmatprep.subr.bf16.mxu0 %v10721_v55  ;;  %7396 = vmatprep.mubr.bf16.mxu1 %v12633_v39  ;;  %v10803_v55 = vld [vmem:[%s11754_s27 + $0x1af0] ss:$8 sps:$4 sm:$0xff]  }
 0x31e   : > { %8052 = vmatprep.mubr.bf16.mxu0 %v12636_v18 }
 0x31f   : > { %7367 = vmatpush1.bf16.msra.mxu1 %v10716_v38  ;;  %v10809_v38 = vld [vmem:[%s11754_s27 + $0xb04] ss:$8 sps:$4 sm:$0xff]  }
 0x320   : > { %8023 = vmatpush1.bf16.msra.mxu0 %v10719_v40  ;;  %7368 = vmatprep.subr.bf16.mxu1 %v10724_v61  ;;  %v10813_v40 = vld [vmem:[%s11754_s27 + $0x1b04] ss:$8 sps:$4 sm:$0xff]   ;;  %v12702_v61 = vrot.slane %v12611_v23, %v11832_v50  ;;  %v1524_v23 = vcombine.high %v12633_v39, %v12633_v39 }
 0x321   : > { %8024 = vmatprep.subr.bf16.mxu0 %v10727_v62  ;;  %v12706_v62 = vrot.slane %v12614_v47, %v11832_v50  ;;  %v10814_v47 = vld [vmem:[%s11754_s27 + $0xb10] ss:$8 sps:$4 sm:$0xff]   ;;  %v10822_v39 = vld [vmem:[%s11754_s27 + $0xb24] ss:$8 sps:$4 sm:$0xff]  }
 0x323   : > { %7369 = vmatpush1.bf16.msra.mxu1 %v10722_v63  ;;  %v10807_v63 = vld [vmem:[%s11754_s27 + $0xb00] ss:$8 sps:$4 sm:$0xff]  }
 0x324   : > { %8025 = vmatpush1.bf16.msra.mxu0 %v10725_v0  ;;  %7370 = vmatprep.subr.bf16.mxu1 %v10730_v41  ;;  %v10811_v0 = vld [vmem:[%s11754_s27 + $0x1b00] ss:$8 sps:$4 sm:$0xff]   ;;  %v10816_v41 = vld [vmem:[%s11754_s27 + $0xb14] ss:$8 sps:$4 sm:$0xff]  }
 0x325   : > { %8026 = vmatprep.subr.bf16.mxu0 %v10733_v1  ;;  %v10819_v1 = vld [vmem:[%s11754_s27 + $0x1b14] ss:$8 sps:$4 sm:$0xff]  }
 0x327   : > { %7371 = vmatpush1.bf16.msra.mxu1 %v10728_v56  ;;  %v1720_v56 = vcombine.high %v12636_v18, %v12636_v18  ;;  %v10820_v18 = vld [vmem:[%s11754_s27 + $0xb20] ss:$8 sps:$4 sm:$0xff]  }
 0x328   : > { %8027 = vmatpush1.bf16.msra.mxu0 %v10731_v3  ;;  %7372 = vmatprep.subr.bf16.mxu1 %v10736_v58  ;;  %v10817_v3 = vld [vmem:[%s11754_s27 + $0x1b10] ss:$8 sps:$4 sm:$0xff]   ;;  %v10825_v58 = vld [vmem:[%s11754_s27 + $0x1b24] ss:$8 sps:$4 sm:$0xff]  }
 0x329   : > { %8028 = vmatprep.subr.bf16.mxu0 %v10739_v4  ;;  %v10823_v4 = vld [vmem:[%s11754_s27 + $0x1b20] ss:$8 sps:$4 sm:$0xff]  }
 0x32b   : > { %7373 = vmatpush1.bf16.msra.mxu1 %v10734_v5  ;;  %v10828_v5 = vld [vmem:[%s11754_s27 + $0xb34] ss:$8 sps:$4 sm:$0xff]  }
 0x32c   : > { %8029 = vmatpush1.bf16.msra.mxu0 %v10737_v6  ;;  %7374 = vmatprep.subr.bf16.mxu1 %v10742_v7  ;;  %v10831_v6 = vld [vmem:[%s11754_s27 + $0x1b34] ss:$8 sps:$4 sm:$0xff]   ;;  %v10826_v7 = vld [vmem:[%s11754_s27 + $0xb30] ss:$8 sps:$4 sm:$0xff]  }
 0x32d   : > { %8030 = vmatprep.subr.bf16.mxu0 %v10745_v8  ;;  %v10829_v8 = vld [vmem:[%s11754_s27 + $0x1b30] ss:$8 sps:$4 sm:$0xff]  }
 0x32f   : > { %7375 = vmatpush1.bf16.msra.mxu1 %v10740_v9  ;;  %v10834_v9 = vld [vmem:[%s11754_s27 + $0xb44] ss:$8 sps:$4 sm:$0xff]  }
 0x330   : > { %8031 = vmatpush1.bf16.msra.mxu0 %v10743_v10  ;;  %7376 = vmatprep.subr.bf16.mxu1 %v10748_v11  ;;  %v10837_v10 = vld [vmem:[%s11754_s27 + $0x1b44] ss:$8 sps:$4 sm:$0xff]   ;;  %v10832_v11 = vld [vmem:[%s11754_s27 + $0xb40] ss:$8 sps:$4 sm:$0xff]  }
 0x331   : > { %8032 = vmatprep.subr.bf16.mxu0 %v10751_v12  ;;  %v10835_v12 = vld [vmem:[%s11754_s27 + $0x1b40] ss:$8 sps:$4 sm:$0xff]  }
 0x333   : > { %7377 = vmatpush1.bf16.msra.mxu1 %v10746_v19  ;;  %v10840_v19 = vld [vmem:[%s11754_s27 + $0xb54] ss:$8 sps:$4 sm:$0xff]  }
 0x334   : > { %8033 = vmatpush1.bf16.msra.mxu0 %v10749_v20  ;;  %7378 = vmatprep.subr.bf16.mxu1 %v10754_v21  ;;  %v10843_v20 = vld [vmem:[%s11754_s27 + $0x1b54] ss:$8 sps:$4 sm:$0xff]   ;;  %v10838_v21 = vld [vmem:[%s11754_s27 + $0xb50] ss:$8 sps:$4 sm:$0xff]  }
 0x335   : > { %8034 = vmatprep.subr.bf16.mxu0 %v10757_v22  ;;  %v10841_v22 = vld [vmem:[%s11754_s27 + $0x1b50] ss:$8 sps:$4 sm:$0xff]  }
 0x337   : > { %7379 = vmatpush1.bf16.msra.mxu1 %v10752_v2  ;;  %v10846_v2 = vld [vmem:[%s11754_s27 + $0xb64] ss:$8 sps:$4 sm:$0xff]  }
 0x338   : > { %8035 = vmatpush1.bf16.msra.mxu0 %v10755_v24  ;;  %7380 = vmatprep.subr.bf16.mxu1 %v10760_v13  ;;  %v10849_v24 = vld [vmem:[%s11754_s27 + $0x1b64] ss:$8 sps:$4 sm:$0xff]   ;;  %v10844_v13 = vld [vmem:[%s11754_s27 + $0xb60] ss:$8 sps:$4 sm:$0xff]  }
 0x339   : > { %8036 = vmatprep.subr.bf16.mxu0 %v10763_v53  ;;  %v10847_v53 = vld [vmem:[%s11754_s27 + $0x1b60] ss:$8 sps:$4 sm:$0xff]  }
 0x33b   : > { %7381 = vmatpush1.bf16.msra.mxu1 %v10758_v59  ;;  %v10852_v59 = vld [vmem:[%s11754_s27 + $0xb74] ss:$8 sps:$4 sm:$0xff]  }
 0x33c   : > { %8037 = vmatpush1.bf16.msra.mxu0 %v10761_v57  ;;  %7382 = vmatprep.subr.bf16.mxu1 %v10766_v27  ;;  %v10855_v57 = vld [vmem:[%s11754_s27 + $0x1b74] ss:$8 sps:$4 sm:$0xff]   ;;  %v10850_v27 = vld [vmem:[%s11754_s27 + $0xb70] ss:$8 sps:$4 sm:$0xff]  }
 0x33d   : > { %8038 = vmatprep.subr.bf16.mxu0 %v10769_v28  ;;  %v10853_v28 = vld [vmem:[%s11754_s27 + $0x1b70] ss:$8 sps:$4 sm:$0xff]  }
 0x33f   : > { %7383 = vmatpush1.bf16.msra.mxu1 %v10764_v29  ;;  %v10858_v29 = vld [vmem:[%s11754_s27 + $0xb84] ss:$8 sps:$4 sm:$0xff]  }
 0x340   : > { %8039 = vmatpush1.bf16.msra.mxu0 %v10767_v30  ;;  %7384 = vmatprep.subr.bf16.mxu1 %v10772_v31  ;;  %v10861_v30 = vld [vmem:[%s11754_s27 + $0x1b84] ss:$8 sps:$4 sm:$0xff]   ;;  %v10856_v31 = vld [vmem:[%s11754_s27 + $0xb80] ss:$8 sps:$4 sm:$0xff]  }
 0x341   : > { %8040 = vmatprep.subr.bf16.mxu0 %v10775_v32  ;;  %v10859_v32 = vld [vmem:[%s11754_s27 + $0x1b80] ss:$8 sps:$4 sm:$0xff]  }
 0x343   : > { %7385 = vmatpush1.bf16.msra.mxu1 %v10770_v16  ;;  %v10864_v16 = vld [vmem:[%s11754_s27 + $0xb94] ss:$8 sps:$4 sm:$0xff]  }
 0x344   : > { %8041 = vmatpush1.bf16.msra.mxu0 %v10773_v34  ;;  %7386 = vmatprep.subr.bf16.mxu1 %v10778_v35  ;;  %v10867_v34 = vld [vmem:[%s11754_s27 + $0x1b94] ss:$8 sps:$4 sm:$0xff]   ;;  %v10862_v35 = vld [vmem:[%s11754_s27 + $0xb90] ss:$8 sps:$4 sm:$0xff]  }
 0x345   : > { %8042 = vmatprep.subr.bf16.mxu0 %v10781_v36  ;;  %v10865_v36 = vld [vmem:[%s11754_s27 + $0x1b90] ss:$8 sps:$4 sm:$0xff]  }
 0x347   : > { %7387 = vmatpush1.bf16.msra.mxu1 %v10776_v43  ;;  %v10870_v43 = vld [vmem:[%s11754_s27 + $0xba4] ss:$8 sps:$4 sm:$0xff]  }
 0x348   : > { %8043 = vmatpush1.bf16.msra.mxu0 %v10779_v45  ;;  %7388 = vmatprep.subr.bf16.mxu1 %v10784_v25  ;;  %v10873_v45 = vld [vmem:[%s11754_s27 + $0x1ba4] ss:$8 sps:$4 sm:$0xff]   ;;  %v10868_v25 = vld [vmem:[%s11754_s27 + $0xba0] ss:$8 sps:$4 sm:$0xff]  }
 0x349   : > { %8044 = vmatprep.subr.bf16.mxu0 %v10787_v46  ;;  %v10871_v46 = vld [vmem:[%s11754_s27 + $0x1ba0] ss:$8 sps:$4 sm:$0xff]  }
 0x34b   : > { %7389 = vmatpush1.bf16.msra.mxu1 %v10782_v42  ;;  %v10876_v42 = vld [vmem:[%s11754_s27 + $0xbb4] ss:$8 sps:$4 sm:$0xff]  }
 0x34c   : > { %8045 = vmatpush1.bf16.msra.mxu0 %v10785_v26  ;;  %7390 = vmatprep.subr.bf16.mxu1 %v10790_v60  ;;  %v10879_v26 = vld [vmem:[%s11754_s27 + $0x1bb4] ss:$8 sps:$4 sm:$0xff]   ;;  %v10874_v60 = vld [vmem:[%s11754_s27 + $0xbb0] ss:$8 sps:$4 sm:$0xff]  }
 0x34d   : > { %8046 = vmatprep.subr.bf16.mxu0 %v10793_v14  ;;  %v10877_v14 = vld [vmem:[%s11754_s27 + $0x1bb0] ss:$8 sps:$4 sm:$0xff]  }
 0x34f   : > { %7391 = vmatpush1.bf16.msra.mxu1 %v10788_v33  ;;  %v10882_v33 = vld [vmem:[%s11754_s27 + $0xbc4] ss:$8 sps:$4 sm:$0xff]  }
 0x350   : > { %8047 = vmatpush1.bf16.msra.mxu0 %v10791_v37  ;;  %7392 = vmatprep.subr.bf16.mxu1 %v10796_v15  ;;  %v10885_v37 = vld [vmem:[%s11754_s27 + $0x1bc4] ss:$8 sps:$4 sm:$0xff]   ;;  %v10880_v15 = vld [vmem:[%s11754_s27 + $0xbc0] ss:$8 sps:$4 sm:$0xff]  }
 0x351   : > { %8048 = vmatprep.subr.bf16.mxu0 %v10799_v48  ;;  %v10883_v48 = vld [vmem:[%s11754_s27 + $0x1bc0] ss:$8 sps:$4 sm:$0xff]  }
 0x353   : > { %7393 = vmatpush1.bf16.msra.mxu1 %v10794_v17  ;;  %v10888_v17 = vld [vmem:[%s11754_s27 + $0xbd4] ss:$8 sps:$4 sm:$0xff]  }
 0x354   : > { %8049 = vmatpush1.bf16.msra.mxu0 %v10797_v49  ;;  %7394 = vmatprep.subr.bf16.mxu1 %v10802_v51  ;;  %v10891_v49 = vld [vmem:[%s11754_s27 + $0x1bd4] ss:$8 sps:$4 sm:$0xff]   ;;  %v10886_v51 = vld [vmem:[%s11754_s27 + $0xbd0] ss:$8 sps:$4 sm:$0xff]  }
 0x355   : > { %8050 = vmatprep.subr.bf16.mxu0 %v10805_v52  ;;  %v10889_v52 = vld [vmem:[%s11754_s27 + $0x1bd0] ss:$8 sps:$4 sm:$0xff]  }
 0x357   : > { %7395 = vmatpush1.bf16.msra.mxu1 %v10800_v54  ;;  %v10894_v54 = vld [vmem:[%s11754_s27 + $0xbe4] ss:$8 sps:$4 sm:$0xff]  }
 0x358   : > { %8051 = vmatpush1.bf16.msra.mxu0 %v10803_v55  ;;  %7405 = vmatprep.subr.bf16.mxu1 %v10809_v38  ;;  %v10897_v55 = vld [vmem:[%s11754_s27 + $0x1be4] ss:$8 sps:$4 sm:$0xff]   ;;  %v12771_v38 = vld [vmem:[%s11775_s8 + $0x18] sm:$0xff] }
 0x359   : > { %8061 = vmatprep.subr.bf16.mxu0 %v10813_v40  ;;  %v12774_v40 = vld [vmem:[%s11775_s8 + $0x38] sm:$0xff] }
 0x35a   : > { %7397 = vmatmul.mubr.bf16.vlgmr.msra.gmra.mrb[0].mxu1 %v12702_v61 }
 0x35b   : > { %8053 = vmatmul.mubr.bf16.vlgmr.msra.gmra.mrb[0].mxu0 %v12706_v62  ;;  %7406 = vmatpush1.bf16.msra.mxu1 %v10807_v63  ;;  %v10892_v63 = vld [vmem:[%s11754_s27 + $0xbe0] ss:$8 sps:$4 sm:$0xff]  }
 0x35c   : > { %8062 = vmatpush1.bf16.msra.mxu0 %v10811_v0  ;;  %7407 = vmatprep.subr.bf16.mxu1 %v10816_v41  ;;  %v10895_v0 = vld [vmem:[%s11754_s27 + $0x1be0] ss:$8 sps:$4 sm:$0xff]   ;;  %v10900_v41 = vld [vmem:[%s11754_s27 + $0xbf4] ss:$8 sps:$4 sm:$0xff]  }
 0x35d   : > { %8063 = vmatprep.subr.bf16.mxu0 %v10819_v1  ;;  %7437 = vmatprep.mubr.bf16.mxu1 %v1524_v23  ;;  %v10903_v1 = vld [vmem:[%s11754_s27 + $0x1bf4] ss:$8 sps:$4 sm:$0xff]   ;;  %v12782_v23 = vrot.slane %v12771_v38, %v11832_v50 }
 0x35e   : > { %8093 = vmatprep.mubr.bf16.mxu0 %v1720_v56  ;;  %v12786_v56 = vrot.slane %v12774_v40, %v11832_v50 }
 0x35f   : > { %7408 = vmatpush1.bf16.msra.mxu1 %v10814_v47  ;;  %v10898_v47 = vld [vmem:[%s11754_s27 + $0xbf0] ss:$8 sps:$4 sm:$0xff]  }
 0x360   : > { %8064 = vmatpush1.bf16.msra.mxu0 %v10817_v3  ;;  %7409 = vmatprep.subr.bf16.mxu1 %v10822_v39  ;;  %v10901_v3 = vld [vmem:[%s11754_s27 + $0x1bf0] ss:$8 sps:$4 sm:$0xff]   ;;  %v10906_v39 = vld [vmem:[%s11754_s27 + $0xc04] ss:$8 sps:$4 sm:$0xff]  }
 0x361   : > { %8065 = vmatprep.subr.bf16.mxu0 %v10825_v58  ;;  %v10909_v58 = vld [vmem:[%s11754_s27 + $0x1c04] ss:$8 sps:$4 sm:$0xff]  }
 0x363   : > { %7410 = vmatpush1.bf16.msra.mxu1 %v10820_v18  ;;  %v1540_v18 = vcombine.high %v12782_v23, %v12782_v23 }
 0x364   : > { %8066 = vmatpush1.bf16.msra.mxu0 %v10823_v4  ;;  %7411 = vmatprep.subr.bf16.mxu1 %v10828_v5  ;;  %v1736_v4 = vcombine.high %v12786_v56, %v12786_v56  ;;  %v1522_v5 = vcombine.high %v12702_v61, %v12702_v61 }
 0x365   : > { %8067 = vmatprep.subr.bf16.mxu0 %v10831_v6  ;;  %v1718_v6 = vcombine.high %v12706_v62, %v12706_v62  ;;  %v10910_v62 = vld [vmem:[%s11754_s27 + $0xc10] ss:$8 sps:$4 sm:$0xff]  }
 0x366   : > { %v12808_v61 = vrot.slane %v1736_v4, %v11832_v50  ;;  %v10985_v4 = vld [vmem:[%s11754_s27 + $0x1cd0] ss:$8 sps:$4 sm:$0xff]  }
 0x367   : > { %7412 = vmatpush1.bf16.msra.mxu1 %v10826_v7  ;;  %v10904_v7 = vld [vmem:[%s11754_s27 + $0xc00] ss:$8 sps:$4 sm:$0xff]  }
 0x368   : > { %8068 = vmatpush1.bf16.msra.mxu0 %v10829_v8  ;;  %7413 = vmatprep.subr.bf16.mxu1 %v10834_v9  ;;  %v10907_v8 = vld [vmem:[%s11754_s27 + $0x1c00] ss:$8 sps:$4 sm:$0xff]   ;;  %v10912_v9 = vld [vmem:[%s11754_s27 + $0xc14] ss:$8 sps:$4 sm:$0xff]  }
 0x369   : > { %8069 = vmatprep.subr.bf16.mxu0 %v10837_v10  ;;  %v10915_v10 = vld [vmem:[%s11754_s27 + $0x1c14] ss:$8 sps:$4 sm:$0xff]  }
 0x36b   : > { %7414 = vmatpush1.bf16.msra.mxu1 %v10832_v11  ;;  %v12805_v11 = vrot.slane %v1540_v18, %v11832_v50  ;;  %v10982_v18 = vld [vmem:[%s11754_s27 + $0xcd0] ss:$8 sps:$4 sm:$0xff]  }
 0x36c   : > { %8070 = vmatpush1.bf16.msra.mxu0 %v10835_v12  ;;  %7415 = vmatprep.subr.bf16.mxu1 %v10840_v19  ;;  %v10913_v12 = vld [vmem:[%s11754_s27 + $0x1c10] ss:$8 sps:$4 sm:$0xff]   ;;  %v10918_v19 = vld [vmem:[%s11754_s27 + $0xc24] ss:$8 sps:$4 sm:$0xff]  }
 0x36d   : > { %8071 = vmatprep.subr.bf16.mxu0 %v10843_v20  ;;  %v10921_v20 = vld [vmem:[%s11754_s27 + $0x1c24] ss:$8 sps:$4 sm:$0xff]  }
 0x36f   : > { %7416 = vmatpush1.bf16.msra.mxu1 %v10838_v21  ;;  %v10916_v21 = vld [vmem:[%s11754_s27 + $0xc20] ss:$8 sps:$4 sm:$0xff]  }
 0x370   : > { %8072 = vmatpush1.bf16.msra.mxu0 %v10841_v22  ;;  %7417 = vmatprep.subr.bf16.mxu1 %v10846_v2  ;;  %v10919_v22 = vld [vmem:[%s11754_s27 + $0x1c20] ss:$8 sps:$4 sm:$0xff]   ;;  %v10924_v2 = vld [vmem:[%s11754_s27 + $0xc34] ss:$8 sps:$4 sm:$0xff]  }
 0x371   : > { %8073 = vmatprep.subr.bf16.mxu0 %v10849_v24  ;;  %v10927_v24 = vld [vmem:[%s11754_s27 + $0x1c34] ss:$8 sps:$4 sm:$0xff]  }
 0x373   : > { %7418 = vmatpush1.bf16.msra.mxu1 %v10844_v13  ;;  %v10922_v13 = vld [vmem:[%s11754_s27 + $0xc30] ss:$8 sps:$4 sm:$0xff]  }
 0x374   : > { %8074 = vmatpush1.bf16.msra.mxu0 %v10847_v53  ;;  %7419 = vmatprep.subr.bf16.mxu1 %v10852_v59  ;;  %v10925_v53 = vld [vmem:[%s11754_s27 + $0x1c30] ss:$8 sps:$4 sm:$0xff]   ;;  %v10930_v59 = vld [vmem:[%s11754_s27 + $0xc44] ss:$8 sps:$4 sm:$0xff]  }
 0x375   : > { %8075 = vmatprep.subr.bf16.mxu0 %v10855_v57  ;;  %v10933_v57 = vld [vmem:[%s11754_s27 + $0x1c44] ss:$8 sps:$4 sm:$0xff]  }
 0x377   : > { %7420 = vmatpush1.bf16.msra.mxu1 %v10850_v27  ;;  %v10928_v27 = vld [vmem:[%s11754_s27 + $0xc40] ss:$8 sps:$4 sm:$0xff]  }
 0x378   : > { %8076 = vmatpush1.bf16.msra.mxu0 %v10853_v28  ;;  %7421 = vmatprep.subr.bf16.mxu1 %v10858_v29  ;;  %v10931_v28 = vld [vmem:[%s11754_s27 + $0x1c40] ss:$8 sps:$4 sm:$0xff]   ;;  %v10936_v29 = vld [vmem:[%s11754_s27 + $0xc54] ss:$8 sps:$4 sm:$0xff]  }
 0x379   : > { %8077 = vmatprep.subr.bf16.mxu0 %v10861_v30  ;;  %v10939_v30 = vld [vmem:[%s11754_s27 + $0x1c54] ss:$8 sps:$4 sm:$0xff]  }
 0x37b   : > { %7422 = vmatpush1.bf16.msra.mxu1 %v10856_v31  ;;  %v10934_v31 = vld [vmem:[%s11754_s27 + $0xc50] ss:$8 sps:$4 sm:$0xff]  }
 0x37c   : > { %8078 = vmatpush1.bf16.msra.mxu0 %v10859_v32  ;;  %7423 = vmatprep.subr.bf16.mxu1 %v10864_v16  ;;  %v10937_v32 = vld [vmem:[%s11754_s27 + $0x1c50] ss:$8 sps:$4 sm:$0xff]   ;;  %v10942_v16 = vld [vmem:[%s11754_s27 + $0xc64] ss:$8 sps:$4 sm:$0xff]  }
 0x37d   : > { %8079 = vmatprep.subr.bf16.mxu0 %v10867_v34  ;;  %v10945_v34 = vld [vmem:[%s11754_s27 + $0x1c64] ss:$8 sps:$4 sm:$0xff]  }
 0x37f   : > { %7424 = vmatpush1.bf16.msra.mxu1 %v10862_v35  ;;  %v10940_v35 = vld [vmem:[%s11754_s27 + $0xc60] ss:$8 sps:$4 sm:$0xff]  }
 0x380   : > { %8080 = vmatpush1.bf16.msra.mxu0 %v10865_v36  ;;  %7425 = vmatprep.subr.bf16.mxu1 %v10870_v43  ;;  %v10943_v36 = vld [vmem:[%s11754_s27 + $0x1c60] ss:$8 sps:$4 sm:$0xff]   ;;  %v10948_v43 = vld [vmem:[%s11754_s27 + $0xc74] ss:$8 sps:$4 sm:$0xff]  }
 0x381   : > { %8081 = vmatprep.subr.bf16.mxu0 %v10873_v45  ;;  %v10951_v45 = vld [vmem:[%s11754_s27 + $0x1c74] ss:$8 sps:$4 sm:$0xff]  }
 0x383   : > { %7426 = vmatpush1.bf16.msra.mxu1 %v10868_v25  ;;  %v10946_v25 = vld [vmem:[%s11754_s27 + $0xc70] ss:$8 sps:$4 sm:$0xff]  }
 0x384   : > { %8082 = vmatpush1.bf16.msra.mxu0 %v10871_v46  ;;  %7427 = vmatprep.subr.bf16.mxu1 %v10876_v42  ;;  %v10949_v46 = vld [vmem:[%s11754_s27 + $0x1c70] ss:$8 sps:$4 sm:$0xff]   ;;  %v10954_v42 = vld [vmem:[%s11754_s27 + $0xc84] ss:$8 sps:$4 sm:$0xff]  }
 0x385   : > { %8083 = vmatprep.subr.bf16.mxu0 %v10879_v26  ;;  %v10957_v26 = vld [vmem:[%s11754_s27 + $0x1c84] ss:$8 sps:$4 sm:$0xff]  }
 0x387   : > { %7428 = vmatpush1.bf16.msra.mxu1 %v10874_v60  ;;  %v10952_v60 = vld [vmem:[%s11754_s27 + $0xc80] ss:$8 sps:$4 sm:$0xff]  }
 0x388   : > { %8084 = vmatpush1.bf16.msra.mxu0 %v10877_v14  ;;  %7429 = vmatprep.subr.bf16.mxu1 %v10882_v33  ;;  %v10955_v14 = vld [vmem:[%s11754_s27 + $0x1c80] ss:$8 sps:$4 sm:$0xff]   ;;  %v10960_v33 = vld [vmem:[%s11754_s27 + $0xc94] ss:$8 sps:$4 sm:$0xff]  }
 0x389   : > { %8085 = vmatprep.subr.bf16.mxu0 %v10885_v37  ;;  %v10963_v37 = vld [vmem:[%s11754_s27 + $0x1c94] ss:$8 sps:$4 sm:$0xff]  }
 0x38b   : > { %7430 = vmatpush1.bf16.msra.mxu1 %v10880_v15  ;;  %v10958_v15 = vld [vmem:[%s11754_s27 + $0xc90] ss:$8 sps:$4 sm:$0xff]  }
 0x38c   : > { %8086 = vmatpush1.bf16.msra.mxu0 %v10883_v48  ;;  %7431 = vmatprep.subr.bf16.mxu1 %v10888_v17  ;;  %v10961_v48 = vld [vmem:[%s11754_s27 + $0x1c90] ss:$8 sps:$4 sm:$0xff]   ;;  %v10966_v17 = vld [vmem:[%s11754_s27 + $0xca4] ss:$8 sps:$4 sm:$0xff]  }
 0x38d   : > { %8087 = vmatprep.subr.bf16.mxu0 %v10891_v49  ;;  %v10969_v49 = vld [vmem:[%s11754_s27 + $0x1ca4] ss:$8 sps:$4 sm:$0xff]  }
 0x38f   : > { %7432 = vmatpush1.bf16.msra.mxu1 %v10886_v51  ;;  %v10964_v51 = vld [vmem:[%s11754_s27 + $0xca0] ss:$8 sps:$4 sm:$0xff]  }
 0x390   : > { %8088 = vmatpush1.bf16.msra.mxu0 %v10889_v52  ;;  %7433 = vmatprep.subr.bf16.mxu1 %v10894_v54  ;;  %v10967_v52 = vld [vmem:[%s11754_s27 + $0x1ca0] ss:$8 sps:$4 sm:$0xff]   ;;  %v10972_v54 = vld [vmem:[%s11754_s27 + $0xcb4] ss:$8 sps:$4 sm:$0xff]  }
 0x391   : > { %8089 = vmatprep.subr.bf16.mxu0 %v10897_v55  ;;  %v10975_v55 = vld [vmem:[%s11754_s27 + $0x1cb4] ss:$8 sps:$4 sm:$0xff]  }
 0x393   : > { %7434 = vmatpush1.bf16.msra.mxu1 %v10892_v63  ;;  %v10970_v63 = vld [vmem:[%s11754_s27 + $0xcb0] ss:$8 sps:$4 sm:$0xff]  }
 0x394   : > { %8090 = vmatpush1.bf16.msra.mxu0 %v10895_v0  ;;  %7435 = vmatprep.subr.bf16.mxu1 %v10900_v41  ;;  %v10973_v0 = vld [vmem:[%s11754_s27 + $0x1cb0] ss:$8 sps:$4 sm:$0xff]   ;;  %v10978_v41 = vld [vmem:[%s11754_s27 + $0xcc4] ss:$8 sps:$4 sm:$0xff]  }
 0x395   : > { %8091 = vmatprep.subr.bf16.mxu0 %v10903_v1  ;;  %v10981_v1 = vld [vmem:[%s11754_s27 + $0x1cc4] ss:$8 sps:$4 sm:$0xff]  }
 0x397   : > { %7436 = vmatpush1.bf16.msra.mxu1 %v10898_v47  ;;  %v10976_v47 = vld [vmem:[%s11754_s27 + $0xcc0] ss:$8 sps:$4 sm:$0xff]  }
 0x398   : > { %8092 = vmatpush1.bf16.msra.mxu0 %v10901_v3  ;;  %7446 = vmatprep.subr.bf16.mxu1 %v10906_v39  ;;  %v10979_v3 = vld [vmem:[%s11754_s27 + $0x1cc0] ss:$8 sps:$4 sm:$0xff]   ;;  %v10984_v39 = vld [vmem:[%s11754_s27 + $0xcd4] ss:$8 sps:$4 sm:$0xff]  }
 0x399   : > { %8102 = vmatprep.subr.bf16.mxu0 %v10909_v58  ;;  %v10987_v58 = vld [vmem:[%s11754_s27 + $0x1cd4] ss:$8 sps:$4 sm:$0xff]  }
 0x39a   : > { %7438 = vmatmul.mubr.bf16.vlgmr.msra.gmra.mrb[0].mxu1 %v1522_v5  ;;  %v10990_v5 = vld [vmem:[%s11754_s27 + $0xce4] ss:$8 sps:$4 sm:$0xff]  }
 0x39b   : > { %8094 = vmatmul.mubr.bf16.vlgmr.msra.gmra.mrb[0].mxu0 %v1718_v6  ;;  %7447 = vmatpush1.bf16.msra.mxu1 %v10904_v7  ;;  %v10993_v6 = vld [vmem:[%s11754_s27 + $0x1ce4] ss:$8 sps:$4 sm:$0xff]   ;;  %v10988_v7 = vld [vmem:[%s11754_s27 + $0xce0] ss:$8 sps:$4 sm:$0xff]  }
 0x39c   : > { %8103 = vmatpush1.bf16.msra.mxu0 %v10907_v8  ;;  %7448 = vmatprep.subr.bf16.mxu1 %v10912_v9  ;;  %v10991_v8 = vld [vmem:[%s11754_s27 + $0x1ce0] ss:$8 sps:$4 sm:$0xff]   ;;  %v10996_v9 = vld [vmem:[%s11754_s27 + $0xcf4] ss:$8 sps:$4 sm:$0xff]  }
 0x39d   : > { %8104 = vmatprep.subr.bf16.mxu0 %v10915_v10  ;;  %7478 = vmatprep.mubr.bf16.mxu1 %v12805_v11  ;;  %v10999_v10 = vld [vmem:[%s11754_s27 + $0x1cf4] ss:$8 sps:$4 sm:$0xff]  }
 0x39e   : > { %8134 = vmatprep.mubr.bf16.mxu0 %v12808_v61 }
 0x39f   : > { %7449 = vmatpush1.bf16.msra.mxu1 %v10910_v62  ;;  %v10994_v62 = vld [vmem:[%s11754_s27 + $0xcf0] ss:$8 sps:$4 sm:$0xff]  }
 0x3a0   : > { %8105 = vmatpush1.bf16.msra.mxu0 %v10913_v12  ;;  %7450 = vmatprep.subr.bf16.mxu1 %v10918_v19  ;;  %v10997_v12 = vld [vmem:[%s11754_s27 + $0x1cf0] ss:$8 sps:$4 sm:$0xff]   ;;  %v11002_v19 = vld [vmem:[%s11754_s27 + $0xd04] ss:$8 sps:$4 sm:$0xff]  }
 0x3a1   : > { %8106 = vmatprep.subr.bf16.mxu0 %v10921_v20  ;;  %v11005_v20 = vld [vmem:[%s11754_s27 + $0x1d04] ss:$8 sps:$4 sm:$0xff]  }
 0x3a3   : > { %7451 = vmatpush1.bf16.msra.mxu1 %v10916_v21  ;;  %v12874_v21 = vrot.slane %v12782_v23, %v11832_v50  ;;  %v1572_v23 = vcombine.high %v12805_v11, %v12805_v11  ;;  %v11014_v11 = vld [vmem:[%s11754_s27 + $0xd24] ss:$8 sps:$4 sm:$0xff]  }
 0x3a4   : > { %8107 = vmatpush1.bf16.msra.mxu0 %v10919_v22  ;;  %7452 = vmatprep.subr.bf16.mxu1 %v10924_v2  ;;  %v12878_v22 = vrot.slane %v12786_v56, %v11832_v50  ;;  %v11000_v2 = vld [vmem:[%s11754_s27 + $0xd00] ss:$8 sps:$4 sm:$0xff]   ;;  %v11006_v56 = vld [vmem:[%s11754_s27 + $0xd10] ss:$8 sps:$4 sm:$0xff]  }
 0x3a5   : > { %8108 = vmatprep.subr.bf16.mxu0 %v10927_v24  ;;  %v11003_v24 = vld [vmem:[%s11754_s27 + $0x1d00] ss:$8 sps:$4 sm:$0xff]  }
 0x3a7   : > { %7453 = vmatpush1.bf16.msra.mxu1 %v10922_v13  ;;  %v11008_v13 = vld [vmem:[%s11754_s27 + $0xd14] ss:$8 sps:$4 sm:$0xff]  }
 0x3a8   : > { %8109 = vmatpush1.bf16.msra.mxu0 %v10925_v53  ;;  %7454 = vmatprep.subr.bf16.mxu1 %v10930_v59  ;;  %v11011_v53 = vld [vmem:[%s11754_s27 + $0x1d14] ss:$8 sps:$4 sm:$0xff]   ;;  %v1768_v59 = vcombine.high %v12808_v61, %v12808_v61  ;;  %v11012_v61 = vld [vmem:[%s11754_s27 + $0xd20] ss:$8 sps:$4 sm:$0xff]  }
 0x3a9   : > { %8110 = vmatprep.subr.bf16.mxu0 %v10933_v57  ;;  %v11009_v57 = vld [vmem:[%s11754_s27 + $0x1d10] ss:$8 sps:$4 sm:$0xff]  }
 0x3ab   : > { %7455 = vmatpush1.bf16.msra.mxu1 %v10928_v27  ;;  %v11017_v27 = vld [vmem:[%s11754_s27 + $0x1d24] ss:$8 sps:$4 sm:$0xff]  }
 0x3ac   : > { %8111 = vmatpush1.bf16.msra.mxu0 %v10931_v28  ;;  %7456 = vmatprep.subr.bf16.mxu1 %v10936_v29  ;;  %v11015_v28 = vld [vmem:[%s11754_s27 + $0x1d20] ss:$8 sps:$4 sm:$0xff]   ;;  %v11020_v29 = vld [vmem:[%s11754_s27 + $0xd34] ss:$8 sps:$4 sm:$0xff]  }
 0x3ad   : > { %8112 = vmatprep.subr.bf16.mxu0 %v10939_v30  ;;  %v11023_v30 = vld [vmem:[%s11754_s27 + $0x1d34] ss:$8 sps:$4 sm:$0xff]  }
 0x3af   : > { %7457 = vmatpush1.bf16.msra.mxu1 %v10934_v31  ;;  %v11018_v31 = vld [vmem:[%s11754_s27 + $0xd30] ss:$8 sps:$4 sm:$0xff]  }
 0x3b0   : > { %8113 = vmatpush1.bf16.msra.mxu0 %v10937_v32  ;;  %7458 = vmatprep.subr.bf16.mxu1 %v10942_v16  ;;  %v11021_v32 = vld [vmem:[%s11754_s27 + $0x1d30] ss:$8 sps:$4 sm:$0xff]   ;;  %v11026_v16 = vld [vmem:[%s11754_s27 + $0xd44] ss:$8 sps:$4 sm:$0xff]  }
 0x3b1   : > { %8114 = vmatprep.subr.bf16.mxu0 %v10945_v34  ;;  %v11029_v34 = vld [vmem:[%s11754_s27 + $0x1d44] ss:$8 sps:$4 sm:$0xff]  }
 0x3b3   : > { %7459 = vmatpush1.bf16.msra.mxu1 %v10940_v35  ;;  %v11024_v35 = vld [vmem:[%s11754_s27 + $0xd40] ss:$8 sps:$4 sm:$0xff]  }
 0x3b4   : > { %8115 = vmatpush1.bf16.msra.mxu0 %v10943_v36  ;;  %7460 = vmatprep.subr.bf16.mxu1 %v10948_v43  ;;  %v11027_v36 = vld [vmem:[%s11754_s27 + $0x1d40] ss:$8 sps:$4 sm:$0xff]   ;;  %v11032_v43 = vld [vmem:[%s11754_s27 + $0xd54] ss:$8 sps:$4 sm:$0xff]  }
 0x3b5   : > { %8116 = vmatprep.subr.bf16.mxu0 %v10951_v45  ;;  %v11035_v45 = vld [vmem:[%s11754_s27 + $0x1d54] ss:$8 sps:$4 sm:$0xff]  }
 0x3b7   : > { %7461 = vmatpush1.bf16.msra.mxu1 %v10946_v25  ;;  %v11030_v25 = vld [vmem:[%s11754_s27 + $0xd50] ss:$8 sps:$4 sm:$0xff]  }
 0x3b8   : > { %8117 = vmatpush1.bf16.msra.mxu0 %v10949_v46  ;;  %7462 = vmatprep.subr.bf16.mxu1 %v10954_v42  ;;  %v11033_v46 = vld [vmem:[%s11754_s27 + $0x1d50] ss:$8 sps:$4 sm:$0xff]   ;;  %v11038_v42 = vld [vmem:[%s11754_s27 + $0xd64] ss:$8 sps:$4 sm:$0xff]  }
 0x3b9   : > { %8118 = vmatprep.subr.bf16.mxu0 %v10957_v26  ;;  %v11041_v26 = vld [vmem:[%s11754_s27 + $0x1d64] ss:$8 sps:$4 sm:$0xff]  }
 0x3bb   : > { %7463 = vmatpush1.bf16.msra.mxu1 %v10952_v60  ;;  %v11036_v60 = vld [vmem:[%s11754_s27 + $0xd60] ss:$8 sps:$4 sm:$0xff]  }
 0x3bc   : > { %8119 = vmatpush1.bf16.msra.mxu0 %v10955_v14  ;;  %7464 = vmatprep.subr.bf16.mxu1 %v10960_v33  ;;  %v11039_v14 = vld [vmem:[%s11754_s27 + $0x1d60] ss:$8 sps:$4 sm:$0xff]   ;;  %v11044_v33 = vld [vmem:[%s11754_s27 + $0xd74] ss:$8 sps:$4 sm:$0xff]  }
 0x3bd   : > { %8120 = vmatprep.subr.bf16.mxu0 %v10963_v37  ;;  %v11047_v37 = vld [vmem:[%s11754_s27 + $0x1d74] ss:$8 sps:$4 sm:$0xff]  }
 0x3bf   : > { %7465 = vmatpush1.bf16.msra.mxu1 %v10958_v15  ;;  %v11042_v15 = vld [vmem:[%s11754_s27 + $0xd70] ss:$8 sps:$4 sm:$0xff]  }
 0x3c0   : > { %8121 = vmatpush1.bf16.msra.mxu0 %v10961_v48  ;;  %7466 = vmatprep.subr.bf16.mxu1 %v10966_v17  ;;  %v11045_v48 = vld [vmem:[%s11754_s27 + $0x1d70] ss:$8 sps:$4 sm:$0xff]   ;;  %v11050_v17 = vld [vmem:[%s11754_s27 + $0xd84] ss:$8 sps:$4 sm:$0xff]  }
 0x3c1   : > { %8122 = vmatprep.subr.bf16.mxu0 %v10969_v49  ;;  %v11053_v49 = vld [vmem:[%s11754_s27 + $0x1d84] ss:$8 sps:$4 sm:$0xff]  }
 0x3c3   : > { %7467 = vmatpush1.bf16.msra.mxu1 %v10964_v51  ;;  %v11048_v51 = vld [vmem:[%s11754_s27 + $0xd80] ss:$8 sps:$4 sm:$0xff]  }
 0x3c4   : > { %8123 = vmatpush1.bf16.msra.mxu0 %v10967_v52  ;;  %7468 = vmatprep.subr.bf16.mxu1 %v10972_v54  ;;  %v11051_v52 = vld [vmem:[%s11754_s27 + $0x1d80] ss:$8 sps:$4 sm:$0xff]   ;;  %v11056_v54 = vld [vmem:[%s11754_s27 + $0xd94] ss:$8 sps:$4 sm:$0xff]  }
 0x3c5   : > { %8124 = vmatprep.subr.bf16.mxu0 %v10975_v55  ;;  %v11059_v55 = vld [vmem:[%s11754_s27 + $0x1d94] ss:$8 sps:$4 sm:$0xff]  }
 0x3c7   : > { %7469 = vmatpush1.bf16.msra.mxu1 %v10970_v63  ;;  %v11054_v63 = vld [vmem:[%s11754_s27 + $0xd90] ss:$8 sps:$4 sm:$0xff]  }
 0x3c8   : > { %8125 = vmatpush1.bf16.msra.mxu0 %v10973_v0  ;;  %7470 = vmatprep.subr.bf16.mxu1 %v10978_v41  ;;  %v11057_v0 = vld [vmem:[%s11754_s27 + $0x1d90] ss:$8 sps:$4 sm:$0xff]   ;;  %v11062_v41 = vld [vmem:[%s11754_s27 + $0xda4] ss:$8 sps:$4 sm:$0xff]  }
 0x3c9   : > { %8126 = vmatprep.subr.bf16.mxu0 %v10981_v1  ;;  %v11065_v1 = vld [vmem:[%s11754_s27 + $0x1da4] ss:$8 sps:$4 sm:$0xff]  }
 0x3cb   : > { %7471 = vmatpush1.bf16.msra.mxu1 %v10976_v47  ;;  %v11060_v47 = vld [vmem:[%s11754_s27 + $0xda0] ss:$8 sps:$4 sm:$0xff]  }
 0x3cc   : > { %8127 = vmatpush1.bf16.msra.mxu0 %v10979_v3  ;;  %7472 = vmatprep.subr.bf16.mxu1 %v10984_v39  ;;  %v11063_v3 = vld [vmem:[%s11754_s27 + $0x1da0] ss:$8 sps:$4 sm:$0xff]   ;;  %v11068_v39 = vld [vmem:[%s11754_s27 + $0xdb4] ss:$8 sps:$4 sm:$0xff]  }
 0x3cd   : > { %8128 = vmatprep.subr.bf16.mxu0 %v10987_v58  ;;  %v11071_v58 = vld [vmem:[%s11754_s27 + $0x1db4] ss:$8 sps:$4 sm:$0xff]  }
 0x3cf   : > { %7473 = vmatpush1.bf16.msra.mxu1 %v10982_v18  ;;  %v11066_v18 = vld [vmem:[%s11754_s27 + $0xdb0] ss:$8 sps:$4 sm:$0xff]  }
 0x3d0   : > { %8129 = vmatpush1.bf16.msra.mxu0 %v10985_v4  ;;  %7474 = vmatprep.subr.bf16.mxu1 %v10990_v5  ;;  %v11069_v4 = vld [vmem:[%s11754_s27 + $0x1db0] ss:$8 sps:$4 sm:$0xff]   ;;  %v11074_v5 = vld [vmem:[%s11754_s27 + $0xdc4] ss:$8 sps:$4 sm:$0xff]  }
 0x3d1   : > { %8130 = vmatprep.subr.bf16.mxu0 %v10993_v6  ;;  %v11077_v6 = vld [vmem:[%s11754_s27 + $0x1dc4] ss:$8 sps:$4 sm:$0xff]  }
 0x3d3   : > { %7475 = vmatpush1.bf16.msra.mxu1 %v10988_v7  ;;  %v11072_v7 = vld [vmem:[%s11754_s27 + $0xdc0] ss:$8 sps:$4 sm:$0xff]  }
 0x3d4   : > { %8131 = vmatpush1.bf16.msra.mxu0 %v10991_v8  ;;  %7476 = vmatprep.subr.bf16.mxu1 %v10996_v9  ;;  %v11075_v8 = vld [vmem:[%s11754_s27 + $0x1dc0] ss:$8 sps:$4 sm:$0xff]   ;;  %v11080_v9 = vld [vmem:[%s11754_s27 + $0xdd4] ss:$8 sps:$4 sm:$0xff]  }
 0x3d5   : > { %8132 = vmatprep.subr.bf16.mxu0 %v10999_v10  ;;  %v11083_v10 = vld [vmem:[%s11754_s27 + $0x1dd4] ss:$8 sps:$4 sm:$0xff]  }
 0x3d7   : > { %7477 = vmatpush1.bf16.msra.mxu1 %v10994_v62  ;;  %v11078_v62 = vld [vmem:[%s11754_s27 + $0xdd0] ss:$8 sps:$4 sm:$0xff]  }
 0x3d8   : > { %8133 = vmatpush1.bf16.msra.mxu0 %v10997_v12  ;;  %7487 = vmatprep.subr.bf16.mxu1 %v11002_v19  ;;  %v11081_v12 = vld [vmem:[%s11754_s27 + $0x1dd0] ss:$8 sps:$4 sm:$0xff]   ;;  %v11086_v19 = vld [vmem:[%s11754_s27 + $0xde4] ss:$8 sps:$4 sm:$0xff]  }
 0x3d9   : > { %8143 = vmatprep.subr.bf16.mxu0 %v11005_v20  ;;  %v11089_v20 = vld [vmem:[%s11754_s27 + $0x1de4] ss:$8 sps:$4 sm:$0xff]  }
 0x3da   : > { %7479 = vmatmul.mubr.bf16.vlgmr.msra.gmra.mrb[0].mxu1 %v12874_v21 }
 0x3db   : > { %8135 = vmatmul.mubr.bf16.vlgmr.msra.gmra.mrb[0].mxu0 %v12878_v22  ;;  %7488 = vmatpush1.bf16.msra.mxu1 %v11000_v2  ;;  %v1525_v2 = vcombine.high %v12771_v38, %v12771_v38  ;;  %v11090_v38 = vld [vmem:[%s11754_s27 + $0xdf0] ss:$8 sps:$4 sm:$0xff]  }
 0x3dc   : > { %8144 = vmatpush1.bf16.msra.mxu0 %v11003_v24  ;;  %7489 = vmatprep.subr.bf16.mxu1 %v11008_v13  ;;  %v1721_v24 = vcombine.high %v12774_v40, %v12774_v40  ;;  %v11084_v13 = vld [vmem:[%s11754_s27 + $0xde0] ss:$8 sps:$4 sm:$0xff]   ;;  %v11093_v40 = vld [vmem:[%s11754_s27 + $0x1df0] ss:$8 sps:$4 sm:$0xff]  }
 0x3dd   : > { %8145 = vmatprep.subr.bf16.mxu0 %v11011_v53  ;;  %7519 = vmatprep.mubr.bf16.mxu1 %v1572_v23  ;;  %v11087_v53 = vld [vmem:[%s11754_s27 + $0x1de0] ss:$8 sps:$4 sm:$0xff]   ;;  %v11092_v23 = vld [vmem:[%s11754_s27 + $0xdf4] ss:$8 sps:$4 sm:$0xff]  }
 0x3de   : > { %8175 = vmatprep.mubr.bf16.mxu0 %v1768_v59  ;;  %v11095_v59 = vld [vmem:[%s11754_s27 + $0x1df4] ss:$8 sps:$4 sm:$0xff]  }
 0x3df   : > { %7490 = vmatpush1.bf16.msra.mxu1 %v11006_v56  ;;  %v12951_v56 = vrot.slane %v1525_v2, %v11832_v50  ;;  %v11162_v2 = vld [vmem:[%s11754_s27 + $0xeb0] ss:$8 sps:$4 sm:$0xff]  }
 0x3e0   : > { %8146 = vmatpush1.bf16.msra.mxu0 %v11009_v57  ;;  %7491 = vmatprep.subr.bf16.mxu1 %v11014_v11  ;;  %v12954_v57 = vrot.slane %v1721_v24, %v11832_v50  ;;  %v11098_v11 = vld [vmem:[%s11754_s27 + $0xe04] ss:$8 sps:$4 sm:$0xff]   ;;  %v11165_v24 = vld [vmem:[%s11754_s27 + $0x1eb0] ss:$8 sps:$4 sm:$0xff]  }
 0x3e1   : > { %8147 = vmatprep.subr.bf16.mxu0 %v11017_v27  ;;  %v11101_v27 = vld [vmem:[%s11754_s27 + $0x1e04] ss:$8 sps:$4 sm:$0xff]  }
 0x3e3   : > { %7492 = vmatpush1.bf16.msra.mxu1 %v11012_v61  ;;  %v1541_v61 = vcombine.high %v12951_v56, %v12951_v56 }
 0x3e4   : > { %8148 = vmatpush1.bf16.msra.mxu0 %v11015_v28  ;;  %7493 = vmatprep.subr.bf16.mxu1 %v11020_v29  ;;  %v1737_v28 = vcombine.high %v12954_v57, %v12954_v57  ;;  %v1570_v29 = vcombine.high %v12874_v21, %v12874_v21 }
 0x3e5   : > { %8149 = vmatprep.subr.bf16.mxu0 %v11023_v30  ;;  %v1766_v30 = vcombine.high %v12878_v22, %v12878_v22  ;;  %v11102_v22 = vld [vmem:[%s11754_s27 + $0xe10] ss:$8 sps:$4 sm:$0xff]  }
 0x3e6   : > { %v12976_v21 = vrot.slane %v1737_v28, %v11832_v50  ;;  %v11185_v28 = vld [vmem:[%s11754_s27 + $0x1ee4] ss:$8 sps:$4 sm:$0xff]  }
 0x3e7   : > { %7494 = vmatpush1.bf16.msra.mxu1 %v11018_v31  ;;  %v11096_v31 = vld [vmem:[%s11754_s27 + $0xe00] ss:$8 sps:$4 sm:$0xff]  }
 0x3e8   : > { %8150 = vmatpush1.bf16.msra.mxu0 %v11021_v32  ;;  %7495 = vmatprep.subr.bf16.mxu1 %v11026_v16  ;;  %v11099_v32 = vld [vmem:[%s11754_s27 + $0x1e00] ss:$8 sps:$4 sm:$0xff]   ;;  %v11104_v16 = vld [vmem:[%s11754_s27 + $0xe14] ss:$8 sps:$4 sm:$0xff]  }
 0x3e9   : > { %8151 = vmatprep.subr.bf16.mxu0 %v11029_v34  ;;  %v11107_v34 = vld [vmem:[%s11754_s27 + $0x1e14] ss:$8 sps:$4 sm:$0xff]  }
 0x3eb   : > { %7496 = vmatpush1.bf16.msra.mxu1 %v11024_v35  ;;  %v12973_v35 = vrot.slane %v1541_v61, %v11832_v50  ;;  %v11182_v61 = vld [vmem:[%s11754_s27 + $0xee4] ss:$8 sps:$4 sm:$0xff]  }
 0x3ec   : > { %8152 = vmatpush1.bf16.msra.mxu0 %v11027_v36  ;;  %7497 = vmatprep.subr.bf16.mxu1 %v11032_v43  ;;  %v11105_v36 = vld [vmem:[%s11754_s27 + $0x1e10] ss:$8 sps:$4 sm:$0xff]   ;;  %v11110_v43 = vld [vmem:[%s11754_s27 + $0xe24] ss:$8 sps:$4 sm:$0xff]  }
 0x3ed   : > { %8153 = vmatprep.subr.bf16.mxu0 %v11035_v45  ;;  %v11113_v45 = vld [vmem:[%s11754_s27 + $0x1e24] ss:$8 sps:$4 sm:$0xff]  }
 0x3ef   : > { %7498 = vmatpush1.bf16.msra.mxu1 %v11030_v25  ;;  %v11108_v25 = vld [vmem:[%s11754_s27 + $0xe20] ss:$8 sps:$4 sm:$0xff]  }
 0x3f0   : > { %8154 = vmatpush1.bf16.msra.mxu0 %v11033_v46  ;;  %7499 = vmatprep.subr.bf16.mxu1 %v11038_v42  ;;  %v11111_v46 = vld [vmem:[%s11754_s27 + $0x1e20] ss:$8 sps:$4 sm:$0xff]   ;;  %v11116_v42 = vld [vmem:[%s11754_s27 + $0xe34] ss:$8 sps:$4 sm:$0xff]  }
 0x3f1   : > { %8155 = vmatprep.subr.bf16.mxu0 %v11041_v26  ;;  %v11119_v26 = vld [vmem:[%s11754_s27 + $0x1e34] ss:$8 sps:$4 sm:$0xff]  }
 0x3f3   : > { %7500 = vmatpush1.bf16.msra.mxu1 %v11036_v60  ;;  %v11114_v60 = vld [vmem:[%s11754_s27 + $0xe30] ss:$8 sps:$4 sm:$0xff]  }
 0x3f4   : > { %8156 = vmatpush1.bf16.msra.mxu0 %v11039_v14  ;;  %7501 = vmatprep.subr.bf16.mxu1 %v11044_v33  ;;  %v11117_v14 = vld [vmem:[%s11754_s27 + $0x1e30] ss:$8 sps:$4 sm:$0xff]   ;;  %v11122_v33 = vld [vmem:[%s11754_s27 + $0xe44] ss:$8 sps:$4 sm:$0xff]  }
 0x3f5   : > { %8157 = vmatprep.subr.bf16.mxu0 %v11047_v37  ;;  %v11125_v37 = vld [vmem:[%s11754_s27 + $0x1e44] ss:$8 sps:$4 sm:$0xff]  }
 0x3f7   : > { %7502 = vmatpush1.bf16.msra.mxu1 %v11042_v15  ;;  %v11120_v15 = vld [vmem:[%s11754_s27 + $0xe40] ss:$8 sps:$4 sm:$0xff]  }
 0x3f8   : > { %8158 = vmatpush1.bf16.msra.mxu0 %v11045_v48  ;;  %7503 = vmatprep.subr.bf16.mxu1 %v11050_v17  ;;  %v11123_v48 = vld [vmem:[%s11754_s27 + $0x1e40] ss:$8 sps:$4 sm:$0xff]   ;;  %v11128_v17 = vld [vmem:[%s11754_s27 + $0xe54] ss:$8 sps:$4 sm:$0xff]  }
 0x3f9   : > { %8159 = vmatprep.subr.bf16.mxu0 %v11053_v49  ;;  %v11131_v49 = vld [vmem:[%s11754_s27 + $0x1e54] ss:$8 sps:$4 sm:$0xff]  }
 0x3fb   : > { %7504 = vmatpush1.bf16.msra.mxu1 %v11048_v51  ;;  %v11126_v51 = vld [vmem:[%s11754_s27 + $0xe50] ss:$8 sps:$4 sm:$0xff]  }
 0x3fc   : > { %8160 = vmatpush1.bf16.msra.mxu0 %v11051_v52  ;;  %7505 = vmatprep.subr.bf16.mxu1 %v11056_v54  ;;  %v11129_v52 = vld [vmem:[%s11754_s27 + $0x1e50] ss:$8 sps:$4 sm:$0xff]   ;;  %v11134_v54 = vld [vmem:[%s11754_s27 + $0xe64] ss:$8 sps:$4 sm:$0xff]  }
 0x3fd   : > { %8161 = vmatprep.subr.bf16.mxu0 %v11059_v55  ;;  %v11137_v55 = vld [vmem:[%s11754_s27 + $0x1e64] ss:$8 sps:$4 sm:$0xff]  }
 0x3ff   : > { %7506 = vmatpush1.bf16.msra.mxu1 %v11054_v63  ;;  %v11132_v63 = vld [vmem:[%s11754_s27 + $0xe60] ss:$8 sps:$4 sm:$0xff]  }
 0x400   : > { %8162 = vmatpush1.bf16.msra.mxu0 %v11057_v0  ;;  %7507 = vmatprep.subr.bf16.mxu1 %v11062_v41  ;;  %v11135_v0 = vld [vmem:[%s11754_s27 + $0x1e60] ss:$8 sps:$4 sm:$0xff]   ;;  %v11140_v41 = vld [vmem:[%s11754_s27 + $0xe74] ss:$8 sps:$4 sm:$0xff]  }
 0x401   : > { %8163 = vmatprep.subr.bf16.mxu0 %v11065_v1  ;;  %v11143_v1 = vld [vmem:[%s11754_s27 + $0x1e74] ss:$8 sps:$4 sm:$0xff]  }
 0x403   : > { %7508 = vmatpush1.bf16.msra.mxu1 %v11060_v47  ;;  %v11138_v47 = vld [vmem:[%s11754_s27 + $0xe70] ss:$8 sps:$4 sm:$0xff]  }
 0x404   : > { %8164 = vmatpush1.bf16.msra.mxu0 %v11063_v3  ;;  %7509 = vmatprep.subr.bf16.mxu1 %v11068_v39  ;;  %v11141_v3 = vld [vmem:[%s11754_s27 + $0x1e70] ss:$8 sps:$4 sm:$0xff]   ;;  %v11146_v39 = vld [vmem:[%s11754_s27 + $0xe84] ss:$8 sps:$4 sm:$0xff]  }
 0x405   : > { %8165 = vmatprep.subr.bf16.mxu0 %v11071_v58  ;;  %v11149_v58 = vld [vmem:[%s11754_s27 + $0x1e84] ss:$8 sps:$4 sm:$0xff]  }
 0x407   : > { %7510 = vmatpush1.bf16.msra.mxu1 %v11066_v18  ;;  %v11144_v18 = vld [vmem:[%s11754_s27 + $0xe80] ss:$8 sps:$4 sm:$0xff]  }
 0x408   : > { %8166 = vmatpush1.bf16.msra.mxu0 %v11069_v4  ;;  %7511 = vmatprep.subr.bf16.mxu1 %v11074_v5  ;;  %v11147_v4 = vld [vmem:[%s11754_s27 + $0x1e80] ss:$8 sps:$4 sm:$0xff]   ;;  %v11152_v5 = vld [vmem:[%s11754_s27 + $0xe94] ss:$8 sps:$4 sm:$0xff]  }
 0x409   : > { %8167 = vmatprep.subr.bf16.mxu0 %v11077_v6  ;;  %v11155_v6 = vld [vmem:[%s11754_s27 + $0x1e94] ss:$8 sps:$4 sm:$0xff]  }
 0x40b   : > { %7512 = vmatpush1.bf16.msra.mxu1 %v11072_v7  ;;  %v11150_v7 = vld [vmem:[%s11754_s27 + $0xe90] ss:$8 sps:$4 sm:$0xff]  }
 0x40c   : > { %8168 = vmatpush1.bf16.msra.mxu0 %v11075_v8  ;;  %7513 = vmatprep.subr.bf16.mxu1 %v11080_v9  ;;  %v11153_v8 = vld [vmem:[%s11754_s27 + $0x1e90] ss:$8 sps:$4 sm:$0xff]   ;;  %v11158_v9 = vld [vmem:[%s11754_s27 + $0xea4] ss:$8 sps:$4 sm:$0xff]  }
 0x40d   : > { %8169 = vmatprep.subr.bf16.mxu0 %v11083_v10  ;;  %v11161_v10 = vld [vmem:[%s11754_s27 + $0x1ea4] ss:$8 sps:$4 sm:$0xff]  }
 0x40f   : > { %7514 = vmatpush1.bf16.msra.mxu1 %v11078_v62  ;;  %v11156_v62 = vld [vmem:[%s11754_s27 + $0xea0] ss:$8 sps:$4 sm:$0xff]  }
 0x410   : > { %8170 = vmatpush1.bf16.msra.mxu0 %v11081_v12  ;;  %7515 = vmatprep.subr.bf16.mxu1 %v11086_v19  ;;  %v11159_v12 = vld [vmem:[%s11754_s27 + $0x1ea0] ss:$8 sps:$4 sm:$0xff]   ;;  %v11164_v19 = vld [vmem:[%s11754_s27 + $0xeb4] ss:$8 sps:$4 sm:$0xff]  }
 0x411   : > { %8171 = vmatprep.subr.bf16.mxu0 %v11089_v20  ;;  %v11167_v20 = vld [vmem:[%s11754_s27 + $0x1eb4] ss:$8 sps:$4 sm:$0xff]  }
 0x413   : > { %7516 = vmatpush1.bf16.msra.mxu1 %v11084_v13  ;;  %v11170_v13 = vld [vmem:[%s11754_s27 + $0xec4] ss:$8 sps:$4 sm:$0xff]  }
 0x414   : > { %8172 = vmatpush1.bf16.msra.mxu0 %v11087_v53  ;;  %7517 = vmatprep.subr.bf16.mxu1 %v11092_v23  ;;  %v11173_v53 = vld [vmem:[%s11754_s27 + $0x1ec4] ss:$8 sps:$4 sm:$0xff]   ;;  %v11168_v23 = vld [vmem:[%s11754_s27 + $0xec0] ss:$8 sps:$4 sm:$0xff]  }
 0x415   : > { %8173 = vmatprep.subr.bf16.mxu0 %v11095_v59  ;;  %v11171_v59 = vld [vmem:[%s11754_s27 + $0x1ec0] ss:$8 sps:$4 sm:$0xff]  }
 0x417   : > { %7518 = vmatpush1.bf16.msra.mxu1 %v11090_v38  ;;  %v11176_v38 = vld [vmem:[%s11754_s27 + $0xed4] ss:$8 sps:$4 sm:$0xff]  }
 0x418   : > { %8174 = vmatpush1.bf16.msra.mxu0 %v11093_v40  ;;  %7528 = vmatprep.subr.bf16.mxu1 %v11098_v11  ;;  %v11179_v40 = vld [vmem:[%s11754_s27 + $0x1ed4] ss:$8 sps:$4 sm:$0xff]   ;;  %v11174_v11 = vld [vmem:[%s11754_s27 + $0xed0] ss:$8 sps:$4 sm:$0xff]  }
 0x419   : > { %8184 = vmatprep.subr.bf16.mxu0 %v11101_v27  ;;  %v11177_v27 = vld [vmem:[%s11754_s27 + $0x1ed0] ss:$8 sps:$4 sm:$0xff]  }
 0x41a   : > { %7520 = vmatmul.mubr.bf16.vlgmr.msra.gmra.mrb[0].mxu1 %v1570_v29  ;;  %v11180_v29 = vld [vmem:[%s11754_s27 + $0xee0] ss:$8 sps:$4 sm:$0xff]  }
 0x41b   : > { %8176 = vmatmul.mubr.bf16.vlgmr.msra.gmra.mrb[0].mxu0 %v1766_v30  ;;  %7529 = vmatpush1.bf16.msra.mxu1 %v11096_v31  ;;  %v11183_v30 = vld [vmem:[%s11754_s27 + $0x1ee0] ss:$8 sps:$4 sm:$0xff]   ;;  %v11188_v31 = vld [vmem:[%s11754_s27 + $0xef4] ss:$8 sps:$4 sm:$0xff]  }
 0x41c   : > { %8185 = vmatpush1.bf16.msra.mxu0 %v11099_v32  ;;  %7530 = vmatprep.subr.bf16.mxu1 %v11104_v16  ;;  %v11191_v32 = vld [vmem:[%s11754_s27 + $0x1ef4] ss:$8 sps:$4 sm:$0xff]   ;;  %v11186_v16 = vld [vmem:[%s11754_s27 + $0xef0] ss:$8 sps:$4 sm:$0xff]  }
 0x41d   : > { %8186 = vmatprep.subr.bf16.mxu0 %v11107_v34  ;;  %7560 = vmatprep.mubr.bf16.mxu1 %v12973_v35  ;;  %v11189_v34 = vld [vmem:[%s11754_s27 + $0x1ef0] ss:$8 sps:$4 sm:$0xff]  }
 0x41e   : > { %8216 = vmatprep.mubr.bf16.mxu0 %v12976_v21 }
 0x41f   : > { %7531 = vmatpush1.bf16.msra.mxu1 %v11102_v22  ;;  %v11195_v22 = vld [vmem:[%s11754_s27 + $0xf04] ss:$8 sps:$4 sm:$0xff]  }
 0x420   : > { %8187 = vmatpush1.bf16.msra.mxu0 %v11105_v36  ;;  %7532 = vmatprep.subr.bf16.mxu1 %v11110_v43  ;;  %v11199_v36 = vld [vmem:[%s11754_s27 + $0x1f04] ss:$8 sps:$4 sm:$0xff]   ;;  %v13042_v43 = vrot.slane %v12951_v56, %v11832_v50  ;;  %v1573_v56 = vcombine.high %v12973_v35, %v12973_v35 }
 0x421   : > { %8188 = vmatprep.subr.bf16.mxu0 %v11113_v45  ;;  %v13046_v45 = vrot.slane %v12954_v57, %v11832_v50  ;;  %v11200_v50 = vld [vmem:[%s11754_s27 + $0xf10] ss:$8 sps:$4 sm:$0xff]   ;;  %v11208_v35 = vld [vmem:[%s11754_s27 + $0xf24] ss:$8 sps:$4 sm:$0xff]  }
 0x422   : > { %v11203_v57 = vld [vmem:[%s11754_s27 + $0x1f10] ss:$8 sps:$4 sm:$0xff]  }
 0x423   : > { %7533 = vmatpush1.bf16.msra.mxu1 %v11108_v25  ;;  %v11193_v25 = vld [vmem:[%s11754_s27 + $0xf00] ss:$8 sps:$4 sm:$0xff]  }
 0x424   : > { %8189 = vmatpush1.bf16.msra.mxu0 %v11111_v46  ;;  %7534 = vmatprep.subr.bf16.mxu1 %v11116_v42  ;;  %v11197_v46 = vld [vmem:[%s11754_s27 + $0x1f00] ss:$8 sps:$4 sm:$0xff]   ;;  %v11202_v42 = vld [vmem:[%s11754_s27 + $0xf14] ss:$8 sps:$4 sm:$0xff]  }
 0x425   : > { %8190 = vmatprep.subr.bf16.mxu0 %v11119_v26  ;;  %v11205_v26 = vld [vmem:[%s11754_s27 + $0x1f14] ss:$8 sps:$4 sm:$0xff]  }
 0x427   : > { %7535 = vmatpush1.bf16.msra.mxu1 %v11114_v60  ;;  %v1769_v60 = vcombine.high %v12976_v21, %v12976_v21  ;;  %v11206_v21 = vld [vmem:[%s11754_s27 + $0xf20] ss:$8 sps:$4 sm:$0xff]  }
 0x428   : > { %8191 = vmatpush1.bf16.msra.mxu0 %v11117_v14  ;;  %7536 = vmatprep.subr.bf16.mxu1 %v11122_v33  ;;  %v11211_v14 = vld [vmem:[%s11754_s27 + $0x1f24] ss:$8 sps:$4 sm:$0xff]   ;;  %v11209_v33 = vld [vmem:[%s11754_s27 + $0x1f20] ss:$8 sps:$4 sm:$0xff]  }
 0x429   : > { %8192 = vmatprep.subr.bf16.mxu0 %v11125_v37  ;;  %v11214_v37 = vld [vmem:[%s11754_s27 + $0xf34] ss:$8 sps:$4 sm:$0xff]  }
 0x42b   : > { %7537 = vmatpush1.bf16.msra.mxu1 %v11120_v15  ;;  %v11217_v15 = vld [vmem:[%s11754_s27 + $0x1f34] ss:$8 sps:$4 sm:$0xff]  }
 0x42c   : > { %8193 = vmatpush1.bf16.msra.mxu0 %v11123_v48  ;;  %7538 = vmatprep.subr.bf16.mxu1 %v11128_v17  ;;  %v11212_v48 = vld [vmem:[%s11754_s27 + $0xf30] ss:$8 sps:$4 sm:$0xff]  }
 0x42d   : > { %8194 = vmatprep.subr.bf16.mxu0 %v11131_v49  ;;  %v11215_v17 = vld [vmem:[%s11754_s27 + $0x1f30] ss:$8 sps:$4 sm:$0xff]   ;;  %v11220_v49 = vld [vmem:[%s11754_s27 + $0xf44] ss:$8 sps:$4 sm:$0xff]  }
 0x42f   : > { %7539 = vmatpush1.bf16.msra.mxu1 %v11126_v51  ;;  %v11223_v51 = vld [vmem:[%s11754_s27 + $0x1f44] ss:$8 sps:$4 sm:$0xff]  }
 0x430   : > { %8195 = vmatpush1.bf16.msra.mxu0 %v11129_v52  ;;  %7540 = vmatprep.subr.bf16.mxu1 %v11134_v54  ;;  %v11218_v52 = vld [vmem:[%s11754_s27 + $0xf40] ss:$8 sps:$4 sm:$0xff]  }
 0x431   : > { %8196 = vmatprep.subr.bf16.mxu0 %v11137_v55  ;;  %v11221_v54 = vld [vmem:[%s11754_s27 + $0x1f40] ss:$8 sps:$4 sm:$0xff]   ;;  %v11226_v55 = vld [vmem:[%s11754_s27 + $0xf54] ss:$8 sps:$4 sm:$0xff]  }
 0x433   : > { %7541 = vmatpush1.bf16.msra.mxu1 %v11132_v63  ;;  %v11229_v63 = vld [vmem:[%s11754_s27 + $0x1f54] ss:$8 sps:$4 sm:$0xff]  }
 0x434   : > { %8197 = vmatpush1.bf16.msra.mxu0 %v11135_v0  ;;  %7542 = vmatprep.subr.bf16.mxu1 %v11140_v41  ;;  %v11224_v0 = vld [vmem:[%s11754_s27 + $0xf50] ss:$8 sps:$4 sm:$0xff]  }
 0x435   : > { %8198 = vmatprep.subr.bf16.mxu0 %v11143_v1  ;;  %v11227_v41 = vld [vmem:[%s11754_s27 + $0x1f50] ss:$8 sps:$4 sm:$0xff]   ;;  %v11232_v1 = vld [vmem:[%s11754_s27 + $0xf64] ss:$8 sps:$4 sm:$0xff]  }
 0x437   : > { %7543 = vmatpush1.bf16.msra.mxu1 %v11138_v47  ;;  %v11235_v47 = vld [vmem:[%s11754_s27 + $0x1f64] ss:$8 sps:$4 sm:$0xff]  }
 0x438   : > { %8199 = vmatpush1.bf16.msra.mxu0 %v11141_v3  ;;  %7544 = vmatprep.subr.bf16.mxu1 %v11146_v39  ;;  %v11230_v3 = vld [vmem:[%s11754_s27 + $0xf60] ss:$8 sps:$4 sm:$0xff]  }
 0x439   : > { %8200 = vmatprep.subr.bf16.mxu0 %v11149_v58  ;;  %v11233_v39 = vld [vmem:[%s11754_s27 + $0x1f60] ss:$8 sps:$4 sm:$0xff]   ;;  %v11238_v58 = vld [vmem:[%s11754_s27 + $0xf74] ss:$8 sps:$4 sm:$0xff]  }
 0x43b   : > { %7545 = vmatpush1.bf16.msra.mxu1 %v11144_v18  ;;  %v11241_v18 = vld [vmem:[%s11754_s27 + $0x1f74] ss:$8 sps:$4 sm:$0xff]  }
 0x43c   : > { %8201 = vmatpush1.bf16.msra.mxu0 %v11147_v4  ;;  %7546 = vmatprep.subr.bf16.mxu1 %v11152_v5  ;;  %v11236_v4 = vld [vmem:[%s11754_s27 + $0xf70] ss:$8 sps:$4 sm:$0xff]  }
 0x43d   : > { %8202 = vmatprep.subr.bf16.mxu0 %v11155_v6  ;;  %v11239_v5 = vld [vmem:[%s11754_s27 + $0x1f70] ss:$8 sps:$4 sm:$0xff]   ;;  %v11244_v6 = vld [vmem:[%s11754_s27 + $0xf84] ss:$8 sps:$4 sm:$0xff]  }
 0x43f   : > { %7547 = vmatpush1.bf16.msra.mxu1 %v11150_v7  ;;  %v11247_v7 = vld [vmem:[%s11754_s27 + $0x1f84] ss:$8 sps:$4 sm:$0xff]  }
 0x440   : > { %8203 = vmatpush1.bf16.msra.mxu0 %v11153_v8  ;;  %7548 = vmatprep.subr.bf16.mxu1 %v11158_v9  ;;  %v11242_v8 = vld [vmem:[%s11754_s27 + $0xf80] ss:$8 sps:$4 sm:$0xff]  }
 0x441   : > { %8204 = vmatprep.subr.bf16.mxu0 %v11161_v10  ;;  %v11245_v9 = vld [vmem:[%s11754_s27 + $0x1f80] ss:$8 sps:$4 sm:$0xff]   ;;  %v11250_v10 = vld [vmem:[%s11754_s27 + $0xf94] ss:$8 sps:$4 sm:$0xff]  }
 0x443   : > { %7549 = vmatpush1.bf16.msra.mxu1 %v11156_v62  ;;  %v11253_v62 = vld [vmem:[%s11754_s27 + $0x1f94] ss:$8 sps:$4 sm:$0xff]  }
 0x444   : > { %8205 = vmatpush1.bf16.msra.mxu0 %v11159_v12  ;;  %7550 = vmatprep.subr.bf16.mxu1 %v11164_v19  ;;  %v11248_v12 = vld [vmem:[%s11754_s27 + $0xf90] ss:$8 sps:$4 sm:$0xff]  }
 0x445   : > { %8206 = vmatprep.subr.bf16.mxu0 %v11167_v20  ;;  %v11251_v19 = vld [vmem:[%s11754_s27 + $0x1f90] ss:$8 sps:$4 sm:$0xff]   ;;  %v11256_v20 = vld [vmem:[%s11754_s27 + $0xfa4] ss:$8 sps:$4 sm:$0xff]  }
 0x447   : > { %7551 = vmatpush1.bf16.msra.mxu1 %v11162_v2  ;;  %v11259_v2 = vld [vmem:[%s11754_s27 + $0x1fa4] ss:$8 sps:$4 sm:$0xff]  }
 0x448   : > { %8207 = vmatpush1.bf16.msra.mxu0 %v11165_v24  ;;  %7552 = vmatprep.subr.bf16.mxu1 %v11170_v13  ;;  %v11254_v24 = vld [vmem:[%s11754_s27 + $0xfa0] ss:$8 sps:$4 sm:$0xff]  }
 0x449   : > { %8208 = vmatprep.subr.bf16.mxu0 %v11173_v53  ;;  %v11257_v13 = vld [vmem:[%s11754_s27 + $0x1fa0] ss:$8 sps:$4 sm:$0xff]   ;;  %v11262_v53 = vld [vmem:[%s11754_s27 + $0xfb4] ss:$8 sps:$4 sm:$0xff]  }
 0x44b   : > { %7553 = vmatpush1.bf16.msra.mxu1 %v11168_v23  ;;  %v11265_v23 = vld [vmem:[%s11754_s27 + $0x1fb4] ss:$8 sps:$4 sm:$0xff]  }
 0x44c   : > { %8209 = vmatpush1.bf16.msra.mxu0 %v11171_v59  ;;  %7554 = vmatprep.subr.bf16.mxu1 %v11176_v38  ;;  %v11260_v59 = vld [vmem:[%s11754_s27 + $0xfb0] ss:$8 sps:$4 sm:$0xff]  }
 0x44d   : > { %8210 = vmatprep.subr.bf16.mxu0 %v11179_v40  ;;  %v11263_v38 = vld [vmem:[%s11754_s27 + $0x1fb0] ss:$8 sps:$4 sm:$0xff]   ;;  %v11268_v40 = vld [vmem:[%s11754_s27 + $0xfc4] ss:$8 sps:$4 sm:$0xff]  }
 0x44f   : > { %7555 = vmatpush1.bf16.msra.mxu1 %v11174_v11  ;;  %v11271_v11 = vld [vmem:[%s11754_s27 + $0x1fc4] ss:$8 sps:$4 sm:$0xff]  }
 0x450   : > { %8211 = vmatpush1.bf16.msra.mxu0 %v11177_v27  ;;  %7556 = vmatprep.subr.bf16.mxu1 %v11182_v61  ;;  %v11266_v27 = vld [vmem:[%s11754_s27 + $0xfc0] ss:$8 sps:$4 sm:$0xff]  }
 0x451   : > { %8212 = vmatprep.subr.bf16.mxu0 %v11185_v28  ;;  %v11269_v61 = vld [vmem:[%s11754_s27 + $0x1fc0] ss:$8 sps:$4 sm:$0xff]   ;;  %v11274_v28 = vld [vmem:[%s11754_s27 + $0xfd4] ss:$8 sps:$4 sm:$0xff]  }
 0x453   : > { %7557 = vmatpush1.bf16.msra.mxu1 %v11180_v29  ;;  %v11277_v29 = vld [vmem:[%s11754_s27 + $0x1fd4] ss:$8 sps:$4 sm:$0xff]  }
 0x454   : > { %8213 = vmatpush1.bf16.msra.mxu0 %v11183_v30  ;;  %7558 = vmatprep.subr.bf16.mxu1 %v11188_v31  ;;  %v11272_v30 = vld [vmem:[%s11754_s27 + $0xfd0] ss:$8 sps:$4 sm:$0xff]  }
 0x455   : > { %8214 = vmatprep.subr.bf16.mxu0 %v11191_v32  ;;  %v11275_v31 = vld [vmem:[%s11754_s27 + $0x1fd0] ss:$8 sps:$4 sm:$0xff]   ;;  %v11280_v32 = vld [vmem:[%s11754_s27 + $0xfe4] ss:$8 sps:$4 sm:$0xff]  }
 0x457   : > { %7559 = vmatpush1.bf16.msra.mxu1 %v11186_v16  ;;  %v11283_v16 = vld [vmem:[%s11754_s27 + $0x1fe4] ss:$8 sps:$4 sm:$0xff]  }
 0x458   : > { %8215 = vmatpush1.bf16.msra.mxu0 %v11189_v34  ;;  %7569 = vmatprep.subr.bf16.mxu1 %v11195_v22  ;;  %v11278_v34 = vld [vmem:[%s11754_s27 + $0xfe0] ss:$8 sps:$4 sm:$0xff]  }
 0x459   : > { %8225 = vmatprep.subr.bf16.mxu0 %v11199_v36  ;;  %v11281_v22 = vld [vmem:[%s11754_s27 + $0x1fe0] ss:$8 sps:$4 sm:$0xff]   ;;  %v11286_v36 = vld [vmem:[%s11754_s27 + $0xff4] ss:$8 sps:$4 sm:$0xff]  }
 0x45a   : > { %7561 = vmatmul.mubr.bf16.vlgmr.msra.gmra.mrb[0].mxu1 %v13042_v43 }
 0x45b   : > { %8217 = vmatmul.mubr.bf16.vlgmr.msra.gmra.mrb[0].mxu0 %v13046_v45  ;;  %7570 = vmatpush1.bf16.msra.mxu1 %v11193_v25  ;;  %v11289_v25 = vld [vmem:[%s11754_s27 + $0x1ff4] ss:$8 sps:$4 sm:$0xff]  }
 0x45c   : > { %8226 = vmatpush1.bf16.msra.mxu0 %v11197_v46  ;;  %7571 = vmatprep.subr.bf16.mxu1 %v11202_v42  ;;  %v11284_v46 = vld [vmem:[%s11754_s27 + $0xff0] ss:$8 sps:$4 sm:$0xff]  }
 0x45d   : > { %8227 = vmatprep.subr.bf16.mxu0 %v11205_v26  ;;  %7601 = vmatprep.mubr.bf16.mxu1 %v1573_v56  ;;  %v11287_v42 = vld [vmem:[%s11754_s27 + $0x1ff0] ss:$8 sps:$4 sm:$0xff]   ;;  %v1571_v26 = vcombine.high %v13042_v43, %v13042_v43  ;;  %v1767_v56 = vcombine.high %v13046_v45, %v13046_v45 }
 0x45e   : > { %8257 = vmatprep.mubr.bf16.mxu0 %v1769_v60  ;;  %v11488_v60 = vmov 1983009808  }
 0x45f   : > { %7572 = vmatpush1.bf16.msra.mxu1 %v11200_v50  ;;  %v8270_v50 = vunpack.c.l.s4 %v11488_v60 }
 0x460   : > { %8228 = vmatpush1.bf16.msra.mxu0 %v11203_v57  ;;  %7573 = vmatprep.subr.bf16.mxu1 %v11208_v35 }
 0x461   : > { %8229 = vmatprep.subr.bf16.mxu0 %v11211_v14  ;;  %v8271_v57 = vunpack.c.0.s8 %v8270_v50 }
 0x463   : > { %7574 = vmatpush1.bf16.msra.mxu1 %v11206_v21  ;;  %v8274_v43 = vsub.s32 %v8271_v57, %v11824_v44 }
 0x464   : > { %8230 = vmatpush1.bf16.msra.mxu0 %v11209_v33  ;;  %7575 = vmatprep.subr.bf16.mxu1 %v11214_v37 }
 0x465   : > { %8231 = vmatprep.subr.bf16.mxu0 %v11217_v15 }
 0x467   : > { %7576 = vmatpush1.bf16.msra.mxu1 %v11212_v48 }
 0x468   : > { %8232 = vmatpush1.bf16.msra.mxu0 %v11215_v17  ;;  %7577 = vmatprep.subr.bf16.mxu1 %v11220_v49 }
 0x469   : > { %8233 = vmatprep.subr.bf16.mxu0 %v11223_v51 }
 0x46b   : > { %7578 = vmatpush1.bf16.msra.mxu1 %v11218_v52  ;;  %v337_v52 = vld [vmem:[%s11780_s18] sm:$0xf] }
 0x46c   : > { %8234 = vmatpush1.bf16.msra.mxu0 %v11221_v54  ;;  %7579 = vmatprep.subr.bf16.mxu1 %v11226_v55 }
 0x46d   : > { %8235 = vmatprep.subr.bf16.mxu0 %v11229_v63  ;;  %v8284_v63 = vld [vmem:[%s269_s17] sm:$0x3] (!%p9507_p6) }
 0x46f   : > { %7580 = vmatpush1.bf16.msra.mxu1 %v11224_v0  ;;  %v8288_v0 = vsub.s32 (!%p9507_p6), 0, %v11824_v44 }
 0x470   : > { %8236 = vmatpush1.bf16.msra.mxu0 %v11227_v41  ;;  %7581 = vmatprep.subr.bf16.mxu1 %v11232_v1  ;;  %v8292_v41 = vsub.s32 (!%p9507_p6), 1, %v11824_v44  ;;  %v8304_v1 = vld [vmem:[%s278_s10] sm:$0x3] (!%p9507_p6) }
 0x471   : > { %8237 = vmatprep.subr.bf16.mxu0 %v11235_v47  ;;  %v8289_v47 = vrot.slane (!%p9507_p6), %v8284_v63, %v8288_v0 }
 0x473   : > { %7582 = vmatpush1.bf16.msra.mxu1 %v11230_v3  ;;  %v8293_v3 = vrot.slane (!%p9507_p6), %v8284_v63, %v8292_v41 }
 0x474   : > { %8238 = vmatpush1.bf16.msra.mxu0 %v11233_v39  ;;  %7583 = vmatprep.subr.bf16.mxu1 %v11238_v58  ;;  %v8309_v39 = vrot.slane (!%p9507_p6), %v8304_v1, %v8288_v0  ;;  %v8313_v58 = vrot.slane (!%p9507_p6), %v8304_v1, %v8292_v41 }
 0x475   : > { %8239 = vmatprep.subr.bf16.mxu0 %v11241_v18  ;;  %v8294_v18 = vcombine.low (!%p9507_p6), %v8289_v47, %v8293_v3 }
 0x477   : > { %7584 = vmatpush1.bf16.msra.mxu1 %v11236_v4  ;;  %v8314_v4 = vcombine.low (!%p9507_p6), %v8309_v39, %v8313_v58 }
 0x478   : > { %8240 = vmatpush1.bf16.msra.mxu0 %v11239_v5  ;;  %7585 = vmatprep.subr.bf16.mxu1 %v11244_v6  ;;  %v8301_v6 = vrot.slane (!%p9507_p6), %v8294_v18, %v8274_v43 }
 0x479   : > { %8241 = vmatprep.subr.bf16.mxu0 %v11247_v7  ;;  %v8321_v7 = vrot.slane (!%p9507_p6), %v8314_v4, %v8274_v43 }
 0x47b   : > { %7586 = vmatpush1.bf16.msra.mxu1 %v11242_v8 }
 0x47c   : > { %8242 = vmatpush1.bf16.msra.mxu0 %v11245_v9  ;;  %7587 = vmatprep.subr.bf16.mxu1 %v11250_v10 }
 0x47d   : > { %8243 = vmatprep.subr.bf16.mxu0 %v11253_v62 }
 0x47f   : > { %7588 = vmatpush1.bf16.msra.mxu1 %v11248_v12 }
 0x480   : > { %8244 = vmatpush1.bf16.msra.mxu0 %v11251_v19  ;;  %7589 = vmatprep.subr.bf16.mxu1 %v11256_v20 }
 0x481   : > { %8245 = vmatprep.subr.bf16.mxu0 %v11259_v2 }
 0x483   : > { %7590 = vmatpush1.bf16.msra.mxu1 %v11254_v24 }
 0x484   : > { %8246 = vmatpush1.bf16.msra.mxu0 %v11257_v13  ;;  %7591 = vmatprep.subr.bf16.mxu1 %v11262_v53 }
 0x485   : > { %8247 = vmatprep.subr.bf16.mxu0 %v11265_v23 }
 0x487   : > { %7592 = vmatpush1.bf16.msra.mxu1 %v11260_v59 }
 0x488   : > { %8248 = vmatpush1.bf16.msra.mxu0 %v11263_v38  ;;  %7593 = vmatprep.subr.bf16.mxu1 %v11268_v40 }
 0x489   : > { %8249 = vmatprep.subr.bf16.mxu0 %v11271_v11 }
 0x48b   : > { %7594 = vmatpush1.bf16.msra.mxu1 %v11266_v27 }
 0x48c   : > { %8250 = vmatpush1.bf16.msra.mxu0 %v11269_v61  ;;  %7595 = vmatprep.subr.bf16.mxu1 %v11274_v28 }
 0x48d   : > { %8251 = vmatprep.subr.bf16.mxu0 %v11277_v29 }
 0x48f   : > { %7596 = vmatpush1.bf16.msra.mxu1 %v11272_v30 }
 0x490   : > { %8252 = vmatpush1.bf16.msra.mxu0 %v11275_v31  ;;  %7597 = vmatprep.subr.bf16.mxu1 %v11280_v32 }
 0x491   : > { %8253 = vmatprep.subr.bf16.mxu0 %v11283_v16 }
 0x493   : > { %7598 = vmatpush1.bf16.msra.mxu1 %v11278_v34 }
 0x494   : > { %8254 = vmatpush1.bf16.msra.mxu0 %v11281_v22  ;;  %7599 = vmatprep.subr.bf16.mxu1 %v11286_v36 }
 0x495   : > { %8255 = vmatprep.subr.bf16.mxu0 %v11289_v25 }
 0x497   : > { %7600 = vmatpush1.bf16.msra.mxu1 %v11284_v46 }
 0x498   : > { %8256 = vmatpush1.bf16.msra.mxu0 %v11287_v42 }
 0x49a   : > { %7602 = vmatmul.mubr.bf16.vlgmr.msra.gmra.mrb[0].mxu1 %v1571_v26 }
 0x49b   : > { %8258 = vmatmul.mubr.bf16.vlgmr.msra.gmra.mrb[0].mxu0 %v1767_v56 }
 0x56d   : > { %v7603_v35 = vpop.f32.mrb[0].mxu1 }
 0x56e   : > { %v8259_v14 = vpop.f32.mrb[0].mxu0  ;;  %v7605_v33 = vpop.f32.mrb[1].mxu1 }
 0x56f   : > { %v9513_v21 = vadd.f32 %v8259_v14, %v7603_v35  ;;  %v8261_v37 = vpop.f32.mrb[1].mxu0  ;;  %v7607_v48 = vpop.f32.mrb[2].mxu1 }
 0x570   : > { %v9514_v15 = vadd.f32 %v8261_v37, %v7605_v33  ;;  %v8263_v17 = vpop.f32.mrb[2].mxu0  ;;  %v7608_v45 = vpop.f32.mrb[3].mxu1 }
 0x571   : > { %v8264_v49 = vpop.f32.mrb[3].mxu0 }
 0x572   : > { %v8268_v51 = vcombine.low %v9513_v21, %v9514_v15  ;;  %8282 = sbr.rel (%p9507_p6) target bundleno = 1415 (0x587), region = 56 }
 0x574   : > { %v8275_v54 = vrot.slane %v8268_v51, %v8274_v43 }
 0x576   : > { %v8277_v55 = vadd.f32 %v8275_v54, %v337_v52 }
 0x578   : > { %8278 = vst [vmem:[%s11780_s18] sm:$0xf] %v8277_v55 }
 0x57f   : > { %v8283_v5 = vld [vmem:[%s11780_s18] sm:$0xf] }
 0x580   : > { %v8303_v8 = vmul.f32 %v8301_v6, %v8283_v5 }
 0x582   : > { %v8323_v9 = vadd.f32 %v8321_v7, %v8303_v8 }
 0x584   : > { %v8324_v10 = vmax.f32 %v8323_v9, 0.0 }
 0x586   : > { %8325 = vst [vmem:[%s11780_s18] sm:$0xf] %v8324_v10 }
 0x587 PF: > { %s20_s25 = sadd.s32 1, %s11478_s25   ;;  %s13205_s21 = sld [smem:[#allocation9_spill]] }
 0x588   : > { %p17_p9 = scmp.ge.s32.totalorder %s20_s25, 32   ;;  %s13206_s17 = sld [smem:[#allocation13_spill]] }
 0x589   : > { %s13207_s22 = sld [smem:[#allocation14_spill]]  ;;  %s13208_s6 = sld [smem:[#allocation10_spill]] }
 0x58a   : > { %s13209_s1 = sld [smem:[#allocation11_spill]]  ;;  %s13210_s24 = sld [smem:[#allocation12_spill]] }
 0x58b   : > { %s13211_s15 = smov %s11442_s16  ;;  %s13213_s18 = smov %s11454_s19 }
 0x58c   : > { %s13214_s19 = smov %s11458_s20  ;;  %19 = sbr.rel (!%p17_p9) target bundleno = 13 (0xd), region = 111 }
 0x58d   : > { %s13212_s16 = smov %s13205_s21  ;;  %s13216_s21 = smov %s11470_s23 }
 0x58f   : > { %s13215_s20 = smov %s13207_s22  ;;  %s13217_s22 = smov %s13208_s6 }
 0x590   : > { %s13218_s23 = smov %s13209_s1 }
 0x593   :  { %8348 = vsyncpa [#allocation3], 1 }
 0x594   :  { %8350 = vsyncpa [#allocation3 + $0x1], 1 }
 0x595   :  { %8351 = vsyncpa [#allocation5], 1 }
 0x596   :  { %8353 = vsyncpa [#allocation5 + $0x1], 1 }

</bundles_post_ra>
